<compile_context>
chip_gen: v7x
topology: tpu7x:2x2x1
jax: 0.10.0
libtpu: 0.0.40
codegen_flags: <defaults>
</compile_context>

<pallas_src>
import math

import jax
import jax.numpy as jnp
from jax.experimental import pallas as pl
from jax.experimental.pallas import tpu as pltpu

LN_EPS = 1e-5  # PyTorch nn.LayerNorm default


def _layer_norm(v, g, b):
    mu = jnp.mean(v, axis=-1, keepdims=True)
    var = jnp.mean((v - mu) ** 2, axis=-1, keepdims=True)
    return (v - mu) * jax.lax.rsqrt(var + LN_EPS) * g + b


def _gelu_tanh(m):
    # TODO(synk): nn.GELU() default is the exact erf form; the tanh approximation
    # is used for guaranteed Mosaic (EUP tanh) lowering.
    return 0.5 * m * (1.0 + jnp.tanh(0.7978845608028654 * (m + 0.044715 * m * m * m)))


def _bf16(a):
    return a.astype(jnp.bfloat16)


def _make_kernel(n_heads, q_tile):
    def kernel(x_q_ref, x_kv_ref, g1_ref, b1_ref,
               wq_ref, wk_ref, wv_ref, bq_ref, bk_ref, bv_ref,
               wo_ref, bo_ref, g2_ref, b2_ref,
               w1_ref, bm1_ref, w2_ref, bm2_ref, o_ref):
        qi = pl.program_id(1)

        x_q = x_q_ref[0].astype(jnp.float32)     # (Tq, D) query tile
        x_kv = x_kv_ref[0].astype(jnp.float32)   # (S,  D) full sequence (for K/V)
        Tq, D = x_q.shape
        S = x_kv.shape[0]
        hd = D // n_heads
        scale = 1.0 / math.sqrt(hd)

        # ---- LN1 + fused-QKV projections (bf16 operands, f32 MXU accumulation) ----
        h_kv = _bf16(_layer_norm(x_kv, g1_ref[...], b1_ref[...]))
        h_q = _bf16(_layer_norm(x_q, g1_ref[...], b1_ref[...]))

        q = jnp.dot(h_q, wq_ref[...], preferred_element_type=jnp.float32) + bq_ref[...]
        k = jnp.dot(h_kv, wk_ref[...], preferred_element_type=jnp.float32) + bk_ref[...]
        v = jnp.dot(h_kv, wv_ref[...], preferred_element_type=jnp.float32) + bv_ref[...]

        # Fold 1/sqrt(hd) into q: a (Tq, D) VPU multiply instead of (Tq, S) per head.
        q_b = _bf16(q * scale)
        k_b = _bf16(k)
        v_b = _bf16(v)

        # Tile-local causal mask, offset by this query tile's position.
        row = jax.lax.broadcasted_iota(jnp.int32, (Tq, S), 0) + qi * q_tile
        col = jax.lax.broadcasted_iota(jnp.int32, (Tq, S), 1)
        causal = col <= row

        # ---- causal attention; output projection folded into the head loop ----
        acc = jnp.zeros((Tq, D), jnp.float32)
        for hh in range(n_heads):
            sl = slice(hh * hd, (hh + 1) * hd)
            s = jax.lax.dot_general(                       # q_h @ k_h^T  -> (Tq, S)
                q_b[:, sl], k_b[:, sl],
                (((1,), (1,)), ((), ())),
                preferred_element_type=jnp.float32)
            s = jnp.where(causal, s, -1e30)                # mask in f32 (pre-exp)
            s = s - jnp.max(s, axis=-1, keepdims=True)
            p = jnp.exp(s)
            inv = pl.reciprocal(jnp.sum(p, axis=-1, keepdims=True), approx=True)
            p = _bf16(p * inv)
            ctx = jnp.dot(p, v_b[:, sl], preferred_element_type=jnp.float32)  # (Tq, hd)
            acc = acc + jnp.dot(_bf16(ctx), wo_ref[sl, :],
                                preferred_element_type=jnp.float32)
        attn = acc + bo_ref[...]
        # TODO(synk): residual dropout omitted (eval-mode identity).
        x_mid = x_q + attn

        # ---- LN2 + MLP ----
        h2 = _bf16(_layer_norm(x_mid, g2_ref[...], b2_ref[...]))
        m = jnp.dot(h2, w1_ref[...], preferred_element_type=jnp.float32) + bm1_ref[...]
        m = _bf16(_gelu_tanh(m))
        m = jnp.dot(m, w2_ref[...], preferred_element_type=jnp.float32) + bm2_ref[...]
        o_ref[0] = (x_mid + m).astype(o_ref.dtype)

    return kernel


def transformer_block(x, params, n_heads, q_tile=None):
    """x: (B, S, D) float32; params as produced by init_params (f32)."""
    B, S, D = x.shape
    d_ff = params["w1"].shape[1]
    if q_tile is None:
        q_tile = S if S <= 128 else 128
    assert S % q_tile == 0, "sequence length must be divisible by the query tile"
    n_qt = S // q_tile

    # Weights go to the kernel in bf16 (halves DMA + VMEM); biases/LN stay f32.
    wq = _bf16(params["wqkv"][:, :D])
    wk = _bf16(params["wqkv"][:, D:2 * D])
    wv = _bf16(params["wqkv"][:, 2 * D:])
    bq = params["bqkv"][:, :D]
    bk = params["bqkv"][:, D:2 * D]
    bv = params["bqkv"][:, 2 * D:]
    wo = _bf16(params["wo"])
    w1 = _bf16(params["w1"])
    w2 = _bf16(params["w2"])

    args = (x, x,
            params["ln1_g"], params["ln1_b"],
            wq, wk, wv, bq, bk, bv,
            wo, params["bo"],
            params["ln2_g"], params["ln2_b"],
            w1, params["b1"],
            w2, params["b2"])

    # Rough resident-VMEM estimate -> scoped VMEM limit (capped at 64 MiB so the
    # same configuration remains legal on v7x).
    est = (2 * (3 * D * D + D * D + D * d_ff + d_ff * D)              # bf16 weights
           + 4 * (6 * D + d_ff)                                        # biases + LN params
           + 4 * 2 * (q_tile * D + S * D + q_tile * D)                 # pipelined x / out blocks
           + 4 * (6 * S * D + q_tile * (6 * D + 4 * S + 4 * d_ff)))    # in-kernel temporaries
    vmem_limit = int(min(64 * 2 ** 20, max(32 * 2 ** 20, 2 * est)))

    def build(weight_pipeline_mode):
        def const2d(shape):
            return pl.BlockSpec(shape, lambda b, t: (0, 0),
                                pipeline_mode=weight_pipeline_mode)

        in_specs = [
            pl.BlockSpec((1, q_tile, D), lambda b, t: (b, t, 0)),   # x (query tile)
            pl.BlockSpec((1, S, D), lambda b, t: (b, 0, 0)),        # x (full seq for K/V)
            const2d((1, D)), const2d((1, D)),                       # ln1 gamma, beta
            const2d((D, D)), const2d((D, D)), const2d((D, D)),      # Wq, Wk, Wv
            const2d((1, D)), const2d((1, D)), const2d((1, D)),      # bq, bk, bv
            const2d((D, D)), const2d((1, D)),                       # Wo, bo
            const2d((1, D)), const2d((1, D)),                       # ln2 gamma, beta
            const2d((D, d_ff)), const2d((1, d_ff)),                 # W1, b1
            const2d((d_ff, D)), const2d((1, D)),                    # W2, b2
        ]
        return pl.pallas_call(
            _make_kernel(n_heads, q_tile),
            out_shape=jax.ShapeDtypeStruct((B, S, D), x.dtype),
            grid_spec=pltpu.PrefetchScalarGridSpec(
                num_scalar_prefetch=0,
                grid=(B, n_qt),
                in_specs=in_specs,
                out_specs=pl.BlockSpec((1, q_tile, D), lambda b, t: (b, t, 0)),
            ),
            compiler_params=pltpu.CompilerParams(
                dimension_semantics=("parallel", "parallel"),
                vmem_limit_bytes=vmem_limit,
            ),
        )

    try:
        # Single-buffer the grid-constant weights/biases (halves their VMEM).
        return build(pl.Buffered(1))(*args)
    except Exception:
        # TODO(synk): pl.Buffered(1) unsupported in this JAX build; fall back to
        # default double-buffered weight blocks (correctness unchanged).
        return build(None)(*args)


def transformer_block_ref(x, params, n_heads):
    """Pure-JAX reference mirroring the kernel numerics (bf16 matmul operands,
    f32 accumulation, tanh GELU) for validation."""
    B, S, D = x.shape
    hd = D // n_heads
    scale = 1.0 / math.sqrt(hd)

    def mm(a, w):
        return jnp.dot(_bf16(a), _bf16(w), preferred_element_type=jnp.float32)

    mask = jnp.tril(jnp.ones((S, S), dtype=bool))
    outs = []
    for b in range(B):
        xb = x[b]
        h = _layer_norm(xb, params["ln1_g"], params["ln1_b"])
        qkv = mm(h, params["wqkv"]) + params["bqkv"]
        q = qkv[:, :D] * scale
        k = qkv[:, D:2 * D]
        v = qkv[:, 2 * D:]
        heads = []
        for hh in range(n_heads):
            sl = slice(hh * hd, (hh + 1) * hd)
            s = mm(q[:, sl], k[:, sl].T)
            s = jnp.where(mask, s, -1e30)
            p = jax.nn.softmax(s, axis=-1)
            heads.append(mm(p, v[:, sl]))
        attn = mm(jnp.concatenate(heads, axis=-1), params["wo"]) + params["bo"]
        xb = xb + attn
        h2 = _layer_norm(xb, params["ln2_g"], params["ln2_b"])
        m = mm(h2, params["w1"]) + params["b1"]
        m = mm(_gelu_tanh(m), params["w2"]) + params["b2"]
        outs.append(xb + m)
    return jnp.stack(outs, axis=0)


def init_params(key, d_model, d_ff):
    ks = jax.random.split(key, 6)
    scale = 0.02
    return {
        "ln1_g": jnp.ones((1, d_model), jnp.float32),
        "ln1_b": jnp.zeros((1, d_model), jnp.float32),
        "wqkv": scale * jax.random.normal(ks[0], (d_model, 3 * d_model), jnp.float32),
        "bqkv": jnp.zeros((1, 3 * d_model), jnp.float32),
        "wo": scale * jax.random.normal(ks[1], (d_model, d_model), jnp.float32),
        "bo": jnp.zeros((1, d_model), jnp.float32),
        "ln2_g": jnp.ones((1, d_model), jnp.float32),
        "ln2_b": jnp.zeros((1, d_model), jnp.float32),
        "w1": scale * jax.random.normal(ks[2], (d_model, d_ff), jnp.float32),
        "b1": jnp.zeros((1, d_ff), jnp.float32),
        "w2": scale * jax.random.normal(ks[3], (d_ff, d_model), jnp.float32),
        "b2": jnp.zeros((1, d_model), jnp.float32),
    }


if __name__ == "__main__":
    B, S, D, H, DFF = 2, 8, 32, 4, 64   # batch, seq, d_model, n_heads, d_ff
    key = jax.random.PRNGKey(0)
    kx, kp = jax.random.split(key)
    x = jax.random.normal(kx, (B, S, D), jnp.float32)
    params = init_params(kp, D, DFF)

    out = transformer_block(x, params, H)
    out = jax.block_until_ready(out)

    ref = transformer_block_ref(x, params, H)
    assert out.shape == (B, S, D)
    assert jnp.allclose(out, ref, atol=5e-3, rtol=5e-3), "mismatch vs JAX reference"
    print("KERNEL_OK")
</pallas_src>

<mosaic_0001>
module attributes {stable_mosaic.version = 11 : i64} {
  func.func @kernel(%arg0: i32, %arg1: i32, %arg2: memref<1x8x32xf32, #tpu.memory_space<vmem>>, %arg3: memref<1x8x32xf32, #tpu.memory_space<vmem>>, %arg4: memref<1x32xf32, #tpu.memory_space<vmem>>, %arg5: memref<1x32xf32, #tpu.memory_space<vmem>>, %arg6: memref<32x32xbf16, #tpu.memory_space<vmem>>, %arg7: memref<32x32xbf16, #tpu.memory_space<vmem>>, %arg8: memref<32x32xbf16, #tpu.memory_space<vmem>>, %arg9: memref<1x32xf32, #tpu.memory_space<vmem>>, %arg10: memref<1x32xf32, #tpu.memory_space<vmem>>, %arg11: memref<1x32xf32, #tpu.memory_space<vmem>>, %arg12: memref<32x32xbf16, #tpu.memory_space<vmem>>, %arg13: memref<1x32xf32, #tpu.memory_space<vmem>>, %arg14: memref<1x32xf32, #tpu.memory_space<vmem>>, %arg15: memref<1x32xf32, #tpu.memory_space<vmem>>, %arg16: memref<32x64xbf16, #tpu.memory_space<vmem>>, %arg17: memref<1x64xf32, #tpu.memory_space<vmem>>, %arg18: memref<64x32xbf16, #tpu.memory_space<vmem>>, %arg19: memref<1x32xf32, #tpu.memory_space<vmem>>, %arg20: memref<1x8x32xf32, #tpu.memory_space<vmem>>) attributes {dimension_semantics = [#tpu.dimension_semantics<parallel>, #tpu.dimension_semantics<parallel>], iteration_bounds = array<i64: 2, 1>, scalar_prefetch = 0 : i64, scratch_operands = 0 : i64, tpu.core_type = #tpu.core_type<tc>, window_params = [{transform_indices = @transform_0, window_bounds = array<i64: 1, 8, 32>}, {transform_indices = @transform_1, window_bounds = array<i64: 1, 8, 32>}, {pipeline_mode = #tpu.pipeline_mode<synchronous>, transform_indices = @transform_2, window_bounds = array<i64: 1, 32>}, {pipeline_mode = #tpu.pipeline_mode<synchronous>, transform_indices = @transform_3, window_bounds = array<i64: 1, 32>}, {pipeline_mode = #tpu.pipeline_mode<synchronous>, transform_indices = @transform_4, window_bounds = array<i64: 32, 32>}, {pipeline_mode = #tpu.pipeline_mode<synchronous>, transform_indices = @transform_5, window_bounds = array<i64: 32, 32>}, {pipeline_mode = #tpu.pipeline_mode<synchronous>, transform_indices = @transform_6, window_bounds = array<i64: 32, 32>}, {pipeline_mode = #tpu.pipeline_mode<synchronous>, transform_indices = @transform_7, window_bounds = array<i64: 1, 32>}, {pipeline_mode = #tpu.pipeline_mode<synchronous>, transform_indices = @transform_8, window_bounds = array<i64: 1, 32>}, {pipeline_mode = #tpu.pipeline_mode<synchronous>, transform_indices = @transform_9, window_bounds = array<i64: 1, 32>}, {pipeline_mode = #tpu.pipeline_mode<synchronous>, transform_indices = @transform_10, window_bounds = array<i64: 32, 32>}, {pipeline_mode = #tpu.pipeline_mode<synchronous>, transform_indices = @transform_11, window_bounds = array<i64: 1, 32>}, {pipeline_mode = #tpu.pipeline_mode<synchronous>, transform_indices = @transform_12, window_bounds = array<i64: 1, 32>}, {pipeline_mode = #tpu.pipeline_mode<synchronous>, transform_indices = @transform_13, window_bounds = array<i64: 1, 32>}, {pipeline_mode = #tpu.pipeline_mode<synchronous>, transform_indices = @transform_14, window_bounds = array<i64: 32, 64>}, {pipeline_mode = #tpu.pipeline_mode<synchronous>, transform_indices = @transform_15, window_bounds = array<i64: 1, 64>}, {pipeline_mode = #tpu.pipeline_mode<synchronous>, transform_indices = @transform_16, window_bounds = array<i64: 64, 32>}, {pipeline_mode = #tpu.pipeline_mode<synchronous>, transform_indices = @transform_17, window_bounds = array<i64: 1, 32>}, {transform_indices = @transform_18, window_bounds = array<i64: 1, 8, 32>}]} {
    %c0 = arith.constant 0 : index
    %c0_0 = arith.constant 0 : index
    %c0_1 = arith.constant 0 : index
    %0 = vector.load %arg2[%c0, %c0_0, %c0_1] : memref<1x8x32xf32, #tpu.memory_space<vmem>>, vector<1x8x32xf32>
    %1 = vector.shape_cast %0 : vector<1x8x32xf32> to vector<8x32xf32>
    %c0_2 = arith.constant 0 : index
    %c0_3 = arith.constant 0 : index
    %c0_4 = arith.constant 0 : index
    %2 = vector.load %arg3[%c0_2, %c0_3, %c0_4] : memref<1x8x32xf32, #tpu.memory_space<vmem>>, vector<1x8x32xf32>
    %3 = vector.shape_cast %2 : vector<1x8x32xf32> to vector<8x32xf32>
    %c0_5 = arith.constant 0 : index
    %c0_6 = arith.constant 0 : index
    %4 = vector.load %arg4[%c0_5, %c0_6] : memref<1x32xf32, #tpu.memory_space<vmem>>, vector<1x32xf32>
    %c0_7 = arith.constant 0 : index
    %c0_8 = arith.constant 0 : index
    %5 = vector.load %arg5[%c0_7, %c0_8] : memref<1x32xf32, #tpu.memory_space<vmem>>, vector<1x32xf32>
    %cst = arith.constant dense<0.000000e+00> : vector<8xf32>
    %6 = vector.multi_reduction <add>, %3, %cst [1] : vector<8x32xf32> to vector<8xf32>
    %7 = vector.shape_cast %6 : vector<8xf32> to vector<8x1xf32>
    %cst_9 = arith.constant 3.200000e+01 : f32
    %8 = vector.broadcast %cst_9 : f32 to vector<8x1xf32>
    %9 = arith.divf %7, %8 : vector<8x1xf32>
    %10 = vector.broadcast %9 : vector<8x1xf32> to vector<8x32xf32>
    %11 = arith.subf %3, %10 : vector<8x32xf32>
    %12 = arith.mulf %11, %11 : vector<8x32xf32>
    %cst_10 = arith.constant dense<0.000000e+00> : vector<8xf32>
    %13 = vector.multi_reduction <add>, %12, %cst_10 [1] : vector<8x32xf32> to vector<8xf32>
    %14 = vector.shape_cast %13 : vector<8xf32> to vector<8x1xf32>
    %cst_11 = arith.constant 3.200000e+01 : f32
    %15 = vector.broadcast %cst_11 : f32 to vector<8x1xf32>
    %16 = arith.divf %14, %15 : vector<8x1xf32>
    %17 = vector.broadcast %9 : vector<8x1xf32> to vector<8x32xf32>
    %18 = arith.subf %3, %17 : vector<8x32xf32>
    %cst_12 = arith.constant 9.99999974E-6 : f32
    %19 = vector.broadcast %cst_12 : f32 to vector<8x1xf32>
    %20 = arith.addf %16, %19 : vector<8x1xf32>
    %21 = math.rsqrt %20 : vector<8x1xf32>
    %22 = vector.broadcast %21 : vector<8x1xf32> to vector<8x32xf32>
    %23 = arith.mulf %18, %22 : vector<8x32xf32>
    %24 = vector.broadcast %4 : vector<1x32xf32> to vector<8x32xf32>
    %25 = arith.mulf %23, %24 : vector<8x32xf32>
    %26 = vector.broadcast %5 : vector<1x32xf32> to vector<8x32xf32>
    %27 = arith.addf %25, %26 : vector<8x32xf32>
    %28 = arith.truncf %27 : vector<8x32xf32> to vector<8x32xbf16>
    %c0_13 = arith.constant 0 : index
    %c0_14 = arith.constant 0 : index
    %29 = vector.load %arg4[%c0_13, %c0_14] : memref<1x32xf32, #tpu.memory_space<vmem>>, vector<1x32xf32>
    %c0_15 = arith.constant 0 : index
    %c0_16 = arith.constant 0 : index
    %30 = vector.load %arg5[%c0_15, %c0_16] : memref<1x32xf32, #tpu.memory_space<vmem>>, vector<1x32xf32>
    %cst_17 = arith.constant dense<0.000000e+00> : vector<8xf32>
    %31 = vector.multi_reduction <add>, %1, %cst_17 [1] : vector<8x32xf32> to vector<8xf32>
    %32 = vector.shape_cast %31 : vector<8xf32> to vector<8x1xf32>
    %cst_18 = arith.constant 3.200000e+01 : f32
    %33 = vector.broadcast %cst_18 : f32 to vector<8x1xf32>
    %34 = arith.divf %32, %33 : vector<8x1xf32>
    %35 = vector.broadcast %34 : vector<8x1xf32> to vector<8x32xf32>
    %36 = arith.subf %1, %35 : vector<8x32xf32>
    %37 = arith.mulf %36, %36 : vector<8x32xf32>
    %cst_19 = arith.constant dense<0.000000e+00> : vector<8xf32>
    %38 = vector.multi_reduction <add>, %37, %cst_19 [1] : vector<8x32xf32> to vector<8xf32>
    %39 = vector.shape_cast %38 : vector<8xf32> to vector<8x1xf32>
    %cst_20 = arith.constant 3.200000e+01 : f32
    %40 = vector.broadcast %cst_20 : f32 to vector<8x1xf32>
    %41 = arith.divf %39, %40 : vector<8x1xf32>
    %42 = vector.broadcast %34 : vector<8x1xf32> to vector<8x32xf32>
    %43 = arith.subf %1, %42 : vector<8x32xf32>
    %cst_21 = arith.constant 9.99999974E-6 : f32
    %44 = vector.broadcast %cst_21 : f32 to vector<8x1xf32>
    %45 = arith.addf %41, %44 : vector<8x1xf32>
    %46 = math.rsqrt %45 : vector<8x1xf32>
    %47 = vector.broadcast %46 : vector<8x1xf32> to vector<8x32xf32>
    %48 = arith.mulf %43, %47 : vector<8x32xf32>
    %49 = vector.broadcast %29 : vector<1x32xf32> to vector<8x32xf32>
    %50 = arith.mulf %48, %49 : vector<8x32xf32>
    %51 = vector.broadcast %30 : vector<1x32xf32> to vector<8x32xf32>
    %52 = arith.addf %50, %51 : vector<8x32xf32>
    %53 = arith.truncf %52 : vector<8x32xf32> to vector<8x32xbf16>
    %c0_22 = arith.constant 0 : index
    %c0_23 = arith.constant 0 : index
    %54 = vector.load %arg6[%c0_22, %c0_23] : memref<32x32xbf16, #tpu.memory_space<vmem>>, vector<32x32xbf16>
    %cst_24 = arith.constant dense<0.000000e+00> : vector<8x32xf32>
    %55 = tpu.matmul %53, %54, %cst_24 {dimension_numbers = #tpu.dot_dimension_numbers<[1], [0], [0], [1], [0, 0, 1, 1], [], []>} : vector<8x32xbf16>, vector<32x32xbf16>, vector<8x32xf32> -> vector<8x32xf32>
    %c0_25 = arith.constant 0 : index
    %c0_26 = arith.constant 0 : index
    %56 = vector.load %arg9[%c0_25, %c0_26] : memref<1x32xf32, #tpu.memory_space<vmem>>, vector<1x32xf32>
    %57 = vector.broadcast %56 : vector<1x32xf32> to vector<8x32xf32>
    %58 = arith.addf %55, %57 : vector<8x32xf32>
    %c0_27 = arith.constant 0 : index
    %c0_28 = arith.constant 0 : index
    %59 = vector.load %arg7[%c0_27, %c0_28] : memref<32x32xbf16, #tpu.memory_space<vmem>>, vector<32x32xbf16>
    %cst_29 = arith.constant dense<0.000000e+00> : vector<8x32xf32>
    %60 = tpu.matmul %28, %59, %cst_29 {dimension_numbers = #tpu.dot_dimension_numbers<[1], [0], [0], [1], [0, 0, 1, 1], [], []>} : vector<8x32xbf16>, vector<32x32xbf16>, vector<8x32xf32> -> vector<8x32xf32>
    %c0_30 = arith.constant 0 : index
    %c0_31 = arith.constant 0 : index
    %61 = vector.load %arg10[%c0_30, %c0_31] : memref<1x32xf32, #tpu.memory_space<vmem>>, vector<1x32xf32>
    %62 = vector.broadcast %61 : vector<1x32xf32> to vector<8x32xf32>
    %63 = arith.addf %60, %62 : vector<8x32xf32>
    %c0_32 = arith.constant 0 : index
    %c0_33 = arith.constant 0 : index
    %64 = vector.load %arg8[%c0_32, %c0_33] : memref<32x32xbf16, #tpu.memory_space<vmem>>, vector<32x32xbf16>
    %cst_34 = arith.constant dense<0.000000e+00> : vector<8x32xf32>
    %65 = tpu.matmul %28, %64, %cst_34 {dimension_numbers = #tpu.dot_dimension_numbers<[1], [0], [0], [1], [0, 0, 1, 1], [], []>} : vector<8x32xbf16>, vector<32x32xbf16>, vector<8x32xf32> -> vector<8x32xf32>
    %c0_35 = arith.constant 0 : index
    %c0_36 = arith.constant 0 : index
    %66 = vector.load %arg11[%c0_35, %c0_36] : memref<1x32xf32, #tpu.memory_space<vmem>>, vector<1x32xf32>
    %67 = vector.broadcast %66 : vector<1x32xf32> to vector<8x32xf32>
    %68 = arith.addf %65, %67 : vector<8x32xf32>
    %cst_37 = arith.constant 0.353553385 : f32
    %69 = vector.broadcast %cst_37 : f32 to vector<8x32xf32>
    %70 = arith.mulf %58, %69 : vector<8x32xf32>
    %71 = arith.truncf %70 : vector<8x32xf32> to vector<8x32xbf16>
    %72 = arith.truncf %63 : vector<8x32xf32> to vector<8x32xbf16>
    %73 = arith.truncf %68 : vector<8x32xf32> to vector<8x32xbf16>
    %74 = tpu.iota {dimensions = array<i32: 0>} : vector<8x8xi32>
    %c8_i32 = arith.constant 8 : i32
    %75 = arith.muli %arg1, %c8_i32 : i32
    %76 = vector.broadcast %75 : i32 to vector<8x8xi32>
    %77 = arith.addi %74, %76 : vector<8x8xi32>
    %78 = tpu.iota {dimensions = array<i32: 1>} : vector<8x8xi32>
    %79 = arith.cmpi sle, %78, %77 : vector<8x8xi32>
    %cst_38 = arith.constant 0.000000e+00 : f32
    %80 = vector.broadcast %cst_38 : f32 to vector<8x32xf32>
    %81 = vector.extract_strided_slice %71 {offsets = [0, 0], sizes = [8, 8], strides = [1, 1]} : vector<8x32xbf16> to vector<8x8xbf16>
    %82 = vector.extract_strided_slice %72 {offsets = [0, 0], sizes = [8, 8], strides = [1, 1]} : vector<8x32xbf16> to vector<8x8xbf16>
    %cst_39 = arith.constant dense<0.000000e+00> : vector<8x8xf32>
    %83 = tpu.matmul %81, %82, %cst_39 {dimension_numbers = #tpu.dot_dimension_numbers<[1], [1], [0], [0], [0, 0, 1, 0], [], []>} : vector<8x8xbf16>, vector<8x8xbf16>, vector<8x8xf32> -> vector<8x8xf32>
    %cst_40 = arith.constant -1.000000e+30 : f32
    %84 = vector.broadcast %cst_40 : f32 to vector<8x8xf32>
    %85 = arith.select %79, %83, %84 : vector<8x8xi1>, vector<8x8xf32>
    %cst_41 = arith.constant dense<0xFF800000> : vector<8xf32>
    %86 = vector.multi_reduction <maximumf>, %85, %cst_41 [1] : vector<8x8xf32> to vector<8xf32>
    %87 = vector.shape_cast %86 : vector<8xf32> to vector<8x1xf32>
    %88 = vector.broadcast %87 : vector<8x1xf32> to vector<8x8xf32>
    %89 = arith.subf %85, %88 : vector<8x8xf32>
    %90 = math.exp %89 : vector<8x8xf32>
    %cst_42 = arith.constant dense<0.000000e+00> : vector<8xf32>
    %91 = vector.multi_reduction <add>, %90, %cst_42 [1] : vector<8x8xf32> to vector<8xf32>
    %92 = vector.shape_cast %91 : vector<8xf32> to vector<8x1xf32>
    %93 = tpu.reciprocal %92 {approx = true} : vector<8x1xf32> -> vector<8x1xf32>
    %94 = vector.broadcast %93 : vector<8x1xf32> to vector<8x8xf32>
    %95 = arith.mulf %90, %94 : vector<8x8xf32>
    %96 = arith.truncf %95 : vector<8x8xf32> to vector<8x8xbf16>
    %97 = vector.extract_strided_slice %73 {offsets = [0, 0], sizes = [8, 8], strides = [1, 1]} : vector<8x32xbf16> to vector<8x8xbf16>
    %cst_43 = arith.constant dense<0.000000e+00> : vector<8x8xf32>
    %98 = tpu.matmul %96, %97, %cst_43 {dimension_numbers = #tpu.dot_dimension_numbers<[1], [0], [0], [1], [0, 0, 1, 1], [], []>} : vector<8x8xbf16>, vector<8x8xbf16>, vector<8x8xf32> -> vector<8x8xf32>
    %99 = arith.truncf %98 : vector<8x8xf32> to vector<8x8xbf16>
    %c0_44 = arith.constant 0 : index
    %c0_45 = arith.constant 0 : index
    %100 = vector.load %arg12[%c0_44, %c0_45] : memref<32x32xbf16, #tpu.memory_space<vmem>>, vector<8x32xbf16>
    %cst_46 = arith.constant dense<0.000000e+00> : vector<8x32xf32>
    %101 = tpu.matmul %99, %100, %cst_46 {dimension_numbers = #tpu.dot_dimension_numbers<[1], [0], [0], [1], [0, 0, 1, 1], [], []>} : vector<8x8xbf16>, vector<8x32xbf16>, vector<8x32xf32> -> vector<8x32xf32>
    %102 = arith.addf %80, %101 : vector<8x32xf32>
    %103 = vector.extract_strided_slice %71 {offsets = [0, 8], sizes = [8, 8], strides = [1, 1]} : vector<8x32xbf16> to vector<8x8xbf16>
    %104 = vector.extract_strided_slice %72 {offsets = [0, 8], sizes = [8, 8], strides = [1, 1]} : vector<8x32xbf16> to vector<8x8xbf16>
    %cst_47 = arith.constant dense<0.000000e+00> : vector<8x8xf32>
    %105 = tpu.matmul %103, %104, %cst_47 {dimension_numbers = #tpu.dot_dimension_numbers<[1], [1], [0], [0], [0, 0, 1, 0], [], []>} : vector<8x8xbf16>, vector<8x8xbf16>, vector<8x8xf32> -> vector<8x8xf32>
    %cst_48 = arith.constant -1.000000e+30 : f32
    %106 = vector.broadcast %cst_48 : f32 to vector<8x8xf32>
    %107 = arith.select %79, %105, %106 : vector<8x8xi1>, vector<8x8xf32>
    %cst_49 = arith.constant dense<0xFF800000> : vector<8xf32>
    %108 = vector.multi_reduction <maximumf>, %107, %cst_49 [1] : vector<8x8xf32> to vector<8xf32>
    %109 = vector.shape_cast %108 : vector<8xf32> to vector<8x1xf32>
    %110 = vector.broadcast %109 : vector<8x1xf32> to vector<8x8xf32>
    %111 = arith.subf %107, %110 : vector<8x8xf32>
    %112 = math.exp %111 : vector<8x8xf32>
    %cst_50 = arith.constant dense<0.000000e+00> : vector<8xf32>
    %113 = vector.multi_reduction <add>, %112, %cst_50 [1] : vector<8x8xf32> to vector<8xf32>
    %114 = vector.shape_cast %113 : vector<8xf32> to vector<8x1xf32>
    %115 = tpu.reciprocal %114 {approx = true} : vector<8x1xf32> -> vector<8x1xf32>
    %116 = vector.broadcast %115 : vector<8x1xf32> to vector<8x8xf32>
    %117 = arith.mulf %112, %116 : vector<8x8xf32>
    %118 = arith.truncf %117 : vector<8x8xf32> to vector<8x8xbf16>
    %119 = vector.extract_strided_slice %73 {offsets = [0, 8], sizes = [8, 8], strides = [1, 1]} : vector<8x32xbf16> to vector<8x8xbf16>
    %cst_51 = arith.constant dense<0.000000e+00> : vector<8x8xf32>
    %120 = tpu.matmul %118, %119, %cst_51 {dimension_numbers = #tpu.dot_dimension_numbers<[1], [0], [0], [1], [0, 0, 1, 1], [], []>} : vector<8x8xbf16>, vector<8x8xbf16>, vector<8x8xf32> -> vector<8x8xf32>
    %121 = arith.truncf %120 : vector<8x8xf32> to vector<8x8xbf16>
    %c8 = arith.constant 8 : index
    %c0_52 = arith.constant 0 : index
    %122 = vector.load %arg12[%c8, %c0_52] : memref<32x32xbf16, #tpu.memory_space<vmem>>, vector<8x32xbf16>
    %cst_53 = arith.constant dense<0.000000e+00> : vector<8x32xf32>
    %123 = tpu.matmul %121, %122, %cst_53 {dimension_numbers = #tpu.dot_dimension_numbers<[1], [0], [0], [1], [0, 0, 1, 1], [], []>} : vector<8x8xbf16>, vector<8x32xbf16>, vector<8x32xf32> -> vector<8x32xf32>
    %124 = arith.addf %102, %123 : vector<8x32xf32>
    %125 = vector.extract_strided_slice %71 {offsets = [0, 16], sizes = [8, 8], strides = [1, 1]} : vector<8x32xbf16> to vector<8x8xbf16>
    %126 = vector.extract_strided_slice %72 {offsets = [0, 16], sizes = [8, 8], strides = [1, 1]} : vector<8x32xbf16> to vector<8x8xbf16>
    %cst_54 = arith.constant dense<0.000000e+00> : vector<8x8xf32>
    %127 = tpu.matmul %125, %126, %cst_54 {dimension_numbers = #tpu.dot_dimension_numbers<[1], [1], [0], [0], [0, 0, 1, 0], [], []>} : vector<8x8xbf16>, vector<8x8xbf16>, vector<8x8xf32> -> vector<8x8xf32>
    %cst_55 = arith.constant -1.000000e+30 : f32
    %128 = vector.broadcast %cst_55 : f32 to vector<8x8xf32>
    %129 = arith.select %79, %127, %128 : vector<8x8xi1>, vector<8x8xf32>
    %cst_56 = arith.constant dense<0xFF800000> : vector<8xf32>
    %130 = vector.multi_reduction <maximumf>, %129, %cst_56 [1] : vector<8x8xf32> to vector<8xf32>
    %131 = vector.shape_cast %130 : vector<8xf32> to vector<8x1xf32>
    %132 = vector.broadcast %131 : vector<8x1xf32> to vector<8x8xf32>
    %133 = arith.subf %129, %132 : vector<8x8xf32>
    %134 = math.exp %133 : vector<8x8xf32>
    %cst_57 = arith.constant dense<0.000000e+00> : vector<8xf32>
    %135 = vector.multi_reduction <add>, %134, %cst_57 [1] : vector<8x8xf32> to vector<8xf32>
    %136 = vector.shape_cast %135 : vector<8xf32> to vector<8x1xf32>
    %137 = tpu.reciprocal %136 {approx = true} : vector<8x1xf32> -> vector<8x1xf32>
    %138 = vector.broadcast %137 : vector<8x1xf32> to vector<8x8xf32>
    %139 = arith.mulf %134, %138 : vector<8x8xf32>
    %140 = arith.truncf %139 : vector<8x8xf32> to vector<8x8xbf16>
    %141 = vector.extract_strided_slice %73 {offsets = [0, 16], sizes = [8, 8], strides = [1, 1]} : vector<8x32xbf16> to vector<8x8xbf16>
    %cst_58 = arith.constant dense<0.000000e+00> : vector<8x8xf32>
    %142 = tpu.matmul %140, %141, %cst_58 {dimension_numbers = #tpu.dot_dimension_numbers<[1], [0], [0], [1], [0, 0, 1, 1], [], []>} : vector<8x8xbf16>, vector<8x8xbf16>, vector<8x8xf32> -> vector<8x8xf32>
    %143 = arith.truncf %142 : vector<8x8xf32> to vector<8x8xbf16>
    %c16 = arith.constant 16 : index
    %c0_59 = arith.constant 0 : index
    %144 = vector.load %arg12[%c16, %c0_59] : memref<32x32xbf16, #tpu.memory_space<vmem>>, vector<8x32xbf16>
    %cst_60 = arith.constant dense<0.000000e+00> : vector<8x32xf32>
    %145 = tpu.matmul %143, %144, %cst_60 {dimension_numbers = #tpu.dot_dimension_numbers<[1], [0], [0], [1], [0, 0, 1, 1], [], []>} : vector<8x8xbf16>, vector<8x32xbf16>, vector<8x32xf32> -> vector<8x32xf32>
    %146 = arith.addf %124, %145 : vector<8x32xf32>
    %147 = vector.extract_strided_slice %71 {offsets = [0, 24], sizes = [8, 8], strides = [1, 1]} : vector<8x32xbf16> to vector<8x8xbf16>
    %148 = vector.extract_strided_slice %72 {offsets = [0, 24], sizes = [8, 8], strides = [1, 1]} : vector<8x32xbf16> to vector<8x8xbf16>
    %cst_61 = arith.constant dense<0.000000e+00> : vector<8x8xf32>
    %149 = tpu.matmul %147, %148, %cst_61 {dimension_numbers = #tpu.dot_dimension_numbers<[1], [1], [0], [0], [0, 0, 1, 0], [], []>} : vector<8x8xbf16>, vector<8x8xbf16>, vector<8x8xf32> -> vector<8x8xf32>
    %cst_62 = arith.constant -1.000000e+30 : f32
    %150 = vector.broadcast %cst_62 : f32 to vector<8x8xf32>
    %151 = arith.select %79, %149, %150 : vector<8x8xi1>, vector<8x8xf32>
    %cst_63 = arith.constant dense<0xFF800000> : vector<8xf32>
    %152 = vector.multi_reduction <maximumf>, %151, %cst_63 [1] : vector<8x8xf32> to vector<8xf32>
    %153 = vector.shape_cast %152 : vector<8xf32> to vector<8x1xf32>
    %154 = vector.broadcast %153 : vector<8x1xf32> to vector<8x8xf32>
    %155 = arith.subf %151, %154 : vector<8x8xf32>
    %156 = math.exp %155 : vector<8x8xf32>
    %cst_64 = arith.constant dense<0.000000e+00> : vector<8xf32>
    %157 = vector.multi_reduction <add>, %156, %cst_64 [1] : vector<8x8xf32> to vector<8xf32>
    %158 = vector.shape_cast %157 : vector<8xf32> to vector<8x1xf32>
    %159 = tpu.reciprocal %158 {approx = true} : vector<8x1xf32> -> vector<8x1xf32>
    %160 = vector.broadcast %159 : vector<8x1xf32> to vector<8x8xf32>
    %161 = arith.mulf %156, %160 : vector<8x8xf32>
    %162 = arith.truncf %161 : vector<8x8xf32> to vector<8x8xbf16>
    %163 = vector.extract_strided_slice %73 {offsets = [0, 24], sizes = [8, 8], strides = [1, 1]} : vector<8x32xbf16> to vector<8x8xbf16>
    %cst_65 = arith.constant dense<0.000000e+00> : vector<8x8xf32>
    %164 = tpu.matmul %162, %163, %cst_65 {dimension_numbers = #tpu.dot_dimension_numbers<[1], [0], [0], [1], [0, 0, 1, 1], [], []>} : vector<8x8xbf16>, vector<8x8xbf16>, vector<8x8xf32> -> vector<8x8xf32>
    %165 = arith.truncf %164 : vector<8x8xf32> to vector<8x8xbf16>
    %c24 = arith.constant 24 : index
    %c0_66 = arith.constant 0 : index
    %166 = vector.load %arg12[%c24, %c0_66] : memref<32x32xbf16, #tpu.memory_space<vmem>>, vector<8x32xbf16>
    %cst_67 = arith.constant dense<0.000000e+00> : vector<8x32xf32>
    %167 = tpu.matmul %165, %166, %cst_67 {dimension_numbers = #tpu.dot_dimension_numbers<[1], [0], [0], [1], [0, 0, 1, 1], [], []>} : vector<8x8xbf16>, vector<8x32xbf16>, vector<8x32xf32> -> vector<8x32xf32>
    %168 = arith.addf %146, %167 : vector<8x32xf32>
    %c0_68 = arith.constant 0 : index
    %c0_69 = arith.constant 0 : index
    %169 = vector.load %arg13[%c0_68, %c0_69] : memref<1x32xf32, #tpu.memory_space<vmem>>, vector<1x32xf32>
    %170 = vector.broadcast %169 : vector<1x32xf32> to vector<8x32xf32>
    %171 = arith.addf %168, %170 : vector<8x32xf32>
    %172 = arith.addf %1, %171 : vector<8x32xf32>
    %c0_70 = arith.constant 0 : index
    %c0_71 = arith.constant 0 : index
    %173 = vector.load %arg14[%c0_70, %c0_71] : memref<1x32xf32, #tpu.memory_space<vmem>>, vector<1x32xf32>
    %c0_72 = arith.constant 0 : index
    %c0_73 = arith.constant 0 : index
    %174 = vector.load %arg15[%c0_72, %c0_73] : memref<1x32xf32, #tpu.memory_space<vmem>>, vector<1x32xf32>
    %cst_74 = arith.constant dense<0.000000e+00> : vector<8xf32>
    %175 = vector.multi_reduction <add>, %172, %cst_74 [1] : vector<8x32xf32> to vector<8xf32>
    %176 = vector.shape_cast %175 : vector<8xf32> to vector<8x1xf32>
    %cst_75 = arith.constant 3.200000e+01 : f32
    %177 = vector.broadcast %cst_75 : f32 to vector<8x1xf32>
    %178 = arith.divf %176, %177 : vector<8x1xf32>
    %179 = vector.broadcast %178 : vector<8x1xf32> to vector<8x32xf32>
    %180 = arith.subf %172, %179 : vector<8x32xf32>
    %181 = arith.mulf %180, %180 : vector<8x32xf32>
    %cst_76 = arith.constant dense<0.000000e+00> : vector<8xf32>
    %182 = vector.multi_reduction <add>, %181, %cst_76 [1] : vector<8x32xf32> to vector<8xf32>
    %183 = vector.shape_cast %182 : vector<8xf32> to vector<8x1xf32>
    %cst_77 = arith.constant 3.200000e+01 : f32
    %184 = vector.broadcast %cst_77 : f32 to vector<8x1xf32>
    %185 = arith.divf %183, %184 : vector<8x1xf32>
    %186 = vector.broadcast %178 : vector<8x1xf32> to vector<8x32xf32>
    %187 = arith.subf %172, %186 : vector<8x32xf32>
    %cst_78 = arith.constant 9.99999974E-6 : f32
    %188 = vector.broadcast %cst_78 : f32 to vector<8x1xf32>
    %189 = arith.addf %185, %188 : vector<8x1xf32>
    %190 = math.rsqrt %189 : vector<8x1xf32>
    %191 = vector.broadcast %190 : vector<8x1xf32> to vector<8x32xf32>
    %192 = arith.mulf %187, %191 : vector<8x32xf32>
    %193 = vector.broadcast %173 : vector<1x32xf32> to vector<8x32xf32>
    %194 = arith.mulf %192, %193 : vector<8x32xf32>
    %195 = vector.broadcast %174 : vector<1x32xf32> to vector<8x32xf32>
    %196 = arith.addf %194, %195 : vector<8x32xf32>
    %197 = arith.truncf %196 : vector<8x32xf32> to vector<8x32xbf16>
    %c0_79 = arith.constant 0 : index
    %c0_80 = arith.constant 0 : index
    %198 = vector.load %arg16[%c0_79, %c0_80] : memref<32x64xbf16, #tpu.memory_space<vmem>>, vector<32x64xbf16>
    %cst_81 = arith.constant dense<0.000000e+00> : vector<8x64xf32>
    %199 = tpu.matmul %197, %198, %cst_81 {dimension_numbers = #tpu.dot_dimension_numbers<[1], [0], [0], [1], [0, 0, 1, 1], [], []>} : vector<8x32xbf16>, vector<32x64xbf16>, vector<8x64xf32> -> vector<8x64xf32>
    %c0_82 = arith.constant 0 : index
    %c0_83 = arith.constant 0 : index
    %200 = vector.load %arg17[%c0_82, %c0_83] : memref<1x64xf32, #tpu.memory_space<vmem>>, vector<1x64xf32>
    %201 = vector.broadcast %200 : vector<1x64xf32> to vector<8x64xf32>
    %202 = arith.addf %199, %201 : vector<8x64xf32>
    %cst_84 = arith.constant 5.000000e-01 : f32
    %203 = vector.broadcast %cst_84 : f32 to vector<8x64xf32>
    %204 = arith.mulf %203, %202 : vector<8x64xf32>
    %cst_85 = arith.constant 4.471500e-02 : f32
    %205 = vector.broadcast %cst_85 : f32 to vector<8x64xf32>
    %206 = arith.mulf %205, %202 : vector<8x64xf32>
    %207 = arith.mulf %206, %202 : vector<8x64xf32>
    %208 = arith.mulf %207, %202 : vector<8x64xf32>
    %209 = arith.addf %202, %208 : vector<8x64xf32>
    %cst_86 = arith.constant 0.797884583 : f32
    %210 = vector.broadcast %cst_86 : f32 to vector<8x64xf32>
    %211 = arith.mulf %210, %209 : vector<8x64xf32>
    %212 = math.tanh %211 : vector<8x64xf32>
    %cst_87 = arith.constant 1.000000e+00 : f32
    %213 = vector.broadcast %cst_87 : f32 to vector<8x64xf32>
    %214 = arith.addf %213, %212 : vector<8x64xf32>
    %215 = arith.mulf %204, %214 : vector<8x64xf32>
    %216 = arith.truncf %215 : vector<8x64xf32> to vector<8x64xbf16>
    %c0_88 = arith.constant 0 : index
    %c0_89 = arith.constant 0 : index
    %217 = vector.load %arg18[%c0_88, %c0_89] : memref<64x32xbf16, #tpu.memory_space<vmem>>, vector<64x32xbf16>
    %cst_90 = arith.constant dense<0.000000e+00> : vector<8x32xf32>
    %218 = tpu.matmul %216, %217, %cst_90 {dimension_numbers = #tpu.dot_dimension_numbers<[1], [0], [0], [1], [0, 0, 1, 1], [], []>} : vector<8x64xbf16>, vector<64x32xbf16>, vector<8x32xf32> -> vector<8x32xf32>
    %c0_91 = arith.constant 0 : index
    %c0_92 = arith.constant 0 : index
    %219 = vector.load %arg19[%c0_91, %c0_92] : memref<1x32xf32, #tpu.memory_space<vmem>>, vector<1x32xf32>
    %220 = vector.broadcast %219 : vector<1x32xf32> to vector<8x32xf32>
    %221 = arith.addf %218, %220 : vector<8x32xf32>
    %222 = arith.addf %172, %221 : vector<8x32xf32>
    %c0_93 = arith.constant 0 : index
    %c0_94 = arith.constant 0 : index
    %c0_95 = arith.constant 0 : index
    %223 = vector.load %arg20[%c0_93, %c0_94, %c0_95] : memref<1x8x32xf32, #tpu.memory_space<vmem>>, vector<1x8x32xf32>
    %224 = vector.shape_cast %223 : vector<1x8x32xf32> to vector<8x32xf32>
    %225 = vector.shape_cast %222 : vector<8x32xf32> to vector<1x8x32xf32>
    tpu.vector_store %arg20[%c0_93, %c0_94, %c0_95], %225 {strides = array<i32>} : memref<1x8x32xf32, #tpu.memory_space<vmem>>, vector<1x8x32xf32>,
    return
  }
  func.func @transform_0(%arg0: i32, %arg1: i32) -> (i32, i32, i32) {
    %c0_i32 = arith.constant 0 : i32
    %c0_i32_0 = arith.constant 0 : i32
    return %arg0, %arg1, %c0_i32 : i32, i32, i32
  }
  func.func @transform_1(%arg0: i32, %arg1: i32) -> (i32, i32, i32) {
    %c0_i32 = arith.constant 0 : i32
    %c0_i32_0 = arith.constant 0 : i32
    %c0_i32_1 = arith.constant 0 : i32
    return %arg0, %c0_i32, %c0_i32_0 : i32, i32, i32
  }
  func.func @transform_2(%arg0: i32, %arg1: i32) -> (i32, i32) {
    %c0_i32 = arith.constant 0 : i32
    %c0_i32_0 = arith.constant 0 : i32
    %c0_i32_1 = arith.constant 0 : i32
    return %c0_i32, %c0_i32_0 : i32, i32
  }
  func.func @transform_3(%arg0: i32, %arg1: i32) -> (i32, i32) {
    %c0_i32 = arith.constant 0 : i32
    %c0_i32_0 = arith.constant 0 : i32
    %c0_i32_1 = arith.constant 0 : i32
    return %c0_i32, %c0_i32_0 : i32, i32
  }
  func.func @transform_4(%arg0: i32, %arg1: i32) -> (i32, i32) {
    %c0_i32 = arith.constant 0 : i32
    %c0_i32_0 = arith.constant 0 : i32
    %c0_i32_1 = arith.constant 0 : i32
    return %c0_i32, %c0_i32_0 : i32, i32
  }
  func.func @transform_5(%arg0: i32, %arg1: i32) -> (i32, i32) {
    %c0_i32 = arith.constant 0 : i32
    %c0_i32_0 = arith.constant 0 : i32
    %c0_i32_1 = arith.constant 0 : i32
    return %c0_i32, %c0_i32_0 : i32, i32
  }
  func.func @transform_6(%arg0: i32, %arg1: i32) -> (i32, i32) {
    %c0_i32 = arith.constant 0 : i32
    %c0_i32_0 = arith.constant 0 : i32
    %c0_i32_1 = arith.constant 0 : i32
    return %c0_i32, %c0_i32_0 : i32, i32
  }
  func.func @transform_7(%arg0: i32, %arg1: i32) -> (i32, i32) {
    %c0_i32 = arith.constant 0 : i32
    %c0_i32_0 = arith.constant 0 : i32
    %c0_i32_1 = arith.constant 0 : i32
    return %c0_i32, %c0_i32_0 : i32, i32
  }
  func.func @transform_8(%arg0: i32, %arg1: i32) -> (i32, i32) {
    %c0_i32 = arith.constant 0 : i32
    %c0_i32_0 = arith.constant 0 : i32
    %c0_i32_1 = arith.constant 0 : i32
    return %c0_i32, %c0_i32_0 : i32, i32
  }
  func.func @transform_9(%arg0: i32, %arg1: i32) -> (i32, i32) {
    %c0_i32 = arith.constant 0 : i32
    %c0_i32_0 = arith.constant 0 : i32
    %c0_i32_1 = arith.constant 0 : i32
    return %c0_i32, %c0_i32_0 : i32, i32
  }
  func.func @transform_10(%arg0: i32, %arg1: i32) -> (i32, i32) {
    %c0_i32 = arith.constant 0 : i32
    %c0_i32_0 = arith.constant 0 : i32
    %c0_i32_1 = arith.constant 0 : i32
    return %c0_i32, %c0_i32_0 : i32, i32
  }
  func.func @transform_11(%arg0: i32, %arg1: i32) -> (i32, i32) {
    %c0_i32 = arith.constant 0 : i32
    %c0_i32_0 = arith.constant 0 : i32
    %c0_i32_1 = arith.constant 0 : i32
    return %c0_i32, %c0_i32_0 : i32, i32
  }
  func.func @transform_12(%arg0: i32, %arg1: i32) -> (i32, i32) {
    %c0_i32 = arith.constant 0 : i32
    %c0_i32_0 = arith.constant 0 : i32
    %c0_i32_1 = arith.constant 0 : i32
    return %c0_i32, %c0_i32_0 : i32, i32
  }
  func.func @transform_13(%arg0: i32, %arg1: i32) -> (i32, i32) {
    %c0_i32 = arith.constant 0 : i32
    %c0_i32_0 = arith.constant 0 : i32
    %c0_i32_1 = arith.constant 0 : i32
    return %c0_i32, %c0_i32_0 : i32, i32
  }
  func.func @transform_14(%arg0: i32, %arg1: i32) -> (i32, i32) {
    %c0_i32 = arith.constant 0 : i32
    %c0_i32_0 = arith.constant 0 : i32
    %c0_i32_1 = arith.constant 0 : i32
    return %c0_i32, %c0_i32_0 : i32, i32
  }
  func.func @transform_15(%arg0: i32, %arg1: i32) -> (i32, i32) {
    %c0_i32 = arith.constant 0 : i32
    %c0_i32_0 = arith.constant 0 : i32
    %c0_i32_1 = arith.constant 0 : i32
    return %c0_i32, %c0_i32_0 : i32, i32
  }
  func.func @transform_16(%arg0: i32, %arg1: i32) -> (i32, i32) {
    %c0_i32 = arith.constant 0 : i32
    %c0_i32_0 = arith.constant 0 : i32
    %c0_i32_1 = arith.constant 0 : i32
    return %c0_i32, %c0_i32_0 : i32, i32
  }
  func.func @transform_17(%arg0: i32, %arg1: i32) -> (i32, i32) {
    %c0_i32 = arith.constant 0 : i32
    %c0_i32_0 = arith.constant 0 : i32
    %c0_i32_1 = arith.constant 0 : i32
    return %c0_i32, %c0_i32_0 : i32, i32
  }
  func.func @transform_18(%arg0: i32, %arg1: i32) -> (i32, i32, i32) {
    %c0_i32 = arith.constant 0 : i32
    %c0_i32_0 = arith.constant 0 : i32
    return %arg0, %arg1, %c0_i32 : i32, i32, i32
  }
}

module attributes {stable_mosaic.version = 11 : i64} {
  func.func @kernel(%arg0: i32, %arg1: i32, %arg2: memref<1x8x32xf32, #tpu.memory_space<vmem>>, %arg3: memref<1x8x32xf32, #tpu.memory_space<vmem>>, %arg4: memref<1x32xf32, #tpu.memory_space<vmem>>, %arg5: memref<1x32xf32, #tpu.memory_space<vmem>>, %arg6: memref<32x32xbf16, #tpu.memory_space<vmem>>, %arg7: memref<32x32xbf16, #tpu.memory_space<vmem>>, %arg8: memref<32x32xbf16, #tpu.memory_space<vmem>>, %arg9: memref<1x32xf32, #tpu.memory_space<vmem>>, %arg10: memref<1x32xf32, #tpu.memory_space<vmem>>, %arg11: memref<1x32xf32, #tpu.memory_space<vmem>>, %arg12: memref<32x32xbf16, #tpu.memory_space<vmem>>, %arg13: memref<1x32xf32, #tpu.memory_space<vmem>>, %arg14: memref<1x32xf32, #tpu.memory_space<vmem>>, %arg15: memref<1x32xf32, #tpu.memory_space<vmem>>, %arg16: memref<32x64xbf16, #tpu.memory_space<vmem>>, %arg17: memref<1x64xf32, #tpu.memory_space<vmem>>, %arg18: memref<64x32xbf16, #tpu.memory_space<vmem>>, %arg19: memref<1x32xf32, #tpu.memory_space<vmem>>, %arg20: memref<1x8x32xf32, #tpu.memory_space<vmem>>) attributes {dimension_semantics = [#tpu.dimension_semantics<parallel>, #tpu.dimension_semantics<parallel>], iteration_bounds = array<i64: 2, 1>, scalar_prefetch = 0 : i64, scratch_operands = 0 : i64, tpu.core_type = #tpu.core_type<tc>, window_params = [{transform_indices = @transform_0, window_bounds = array<i64: 1, 8, 32>}, {transform_indices = @transform_1, window_bounds = array<i64: 1, 8, 32>}, {pipeline_mode = #tpu.pipeline_mode<synchronous>, transform_indices = @transform_2, window_bounds = array<i64: 1, 32>}, {pipeline_mode = #tpu.pipeline_mode<synchronous>, transform_indices = @transform_3, window_bounds = array<i64: 1, 32>}, {pipeline_mode = #tpu.pipeline_mode<synchronous>, transform_indices = @transform_4, window_bounds = array<i64: 32, 32>}, {pipeline_mode = #tpu.pipeline_mode<synchronous>, transform_indices = @transform_5, window_bounds = array<i64: 32, 32>}, {pipeline_mode = #tpu.pipeline_mode<synchronous>, transform_indices = @transform_6, window_bounds = array<i64: 32, 32>}, {pipeline_mode = #tpu.pipeline_mode<synchronous>, transform_indices = @transform_7, window_bounds = array<i64: 1, 32>}, {pipeline_mode = #tpu.pipeline_mode<synchronous>, transform_indices = @transform_8, window_bounds = array<i64: 1, 32>}, {pipeline_mode = #tpu.pipeline_mode<synchronous>, transform_indices = @transform_9, window_bounds = array<i64: 1, 32>}, {pipeline_mode = #tpu.pipeline_mode<synchronous>, transform_indices = @transform_10, window_bounds = array<i64: 32, 32>}, {pipeline_mode = #tpu.pipeline_mode<synchronous>, transform_indices = @transform_11, window_bounds = array<i64: 1, 32>}, {pipeline_mode = #tpu.pipeline_mode<synchronous>, transform_indices = @transform_12, window_bounds = array<i64: 1, 32>}, {pipeline_mode = #tpu.pipeline_mode<synchronous>, transform_indices = @transform_13, window_bounds = array<i64: 1, 32>}, {pipeline_mode = #tpu.pipeline_mode<synchronous>, transform_indices = @transform_14, window_bounds = array<i64: 32, 64>}, {pipeline_mode = #tpu.pipeline_mode<synchronous>, transform_indices = @transform_15, window_bounds = array<i64: 1, 64>}, {pipeline_mode = #tpu.pipeline_mode<synchronous>, transform_indices = @transform_16, window_bounds = array<i64: 64, 32>}, {pipeline_mode = #tpu.pipeline_mode<synchronous>, transform_indices = @transform_17, window_bounds = array<i64: 1, 32>}, {transform_indices = @transform_18, window_bounds = array<i64: 1, 8, 32>}]} {
    %c0 = arith.constant 0 : index
    %c0_0 = arith.constant 0 : index
    %c0_1 = arith.constant 0 : index
    %0 = vector.load %arg2[%c0, %c0_0, %c0_1] : memref<1x8x32xf32, #tpu.memory_space<vmem>>, vector<1x8x32xf32>
    %1 = vector.shape_cast %0 : vector<1x8x32xf32> to vector<8x32xf32>
    %c0_2 = arith.constant 0 : index
    %c0_3 = arith.constant 0 : index
    %c0_4 = arith.constant 0 : index
    %2 = vector.load %arg3[%c0_2, %c0_3, %c0_4] : memref<1x8x32xf32, #tpu.memory_space<vmem>>, vector<1x8x32xf32>
    %3 = vector.shape_cast %2 : vector<1x8x32xf32> to vector<8x32xf32>
    %c0_5 = arith.constant 0 : index
    %c0_6 = arith.constant 0 : index
    %4 = vector.load %arg4[%c0_5, %c0_6] : memref<1x32xf32, #tpu.memory_space<vmem>>, vector<1x32xf32>
    %c0_7 = arith.constant 0 : index
    %c0_8 = arith.constant 0 : index
    %5 = vector.load %arg5[%c0_7, %c0_8] : memref<1x32xf32, #tpu.memory_space<vmem>>, vector<1x32xf32>
    %cst = arith.constant dense<0.000000e+00> : vector<8xf32>
    %6 = vector.multi_reduction <add>, %3, %cst [1] : vector<8x32xf32> to vector<8xf32>
    %7 = vector.shape_cast %6 : vector<8xf32> to vector<8x1xf32>
    %cst_9 = arith.constant 3.200000e+01 : f32
    %8 = vector.broadcast %cst_9 : f32 to vector<8x1xf32>
    %9 = arith.divf %7, %8 : vector<8x1xf32>
    %10 = vector.broadcast %9 : vector<8x1xf32> to vector<8x32xf32>
    %11 = arith.subf %3, %10 : vector<8x32xf32>
    %12 = arith.mulf %11, %11 : vector<8x32xf32>
    %cst_10 = arith.constant dense<0.000000e+00> : vector<8xf32>
    %13 = vector.multi_reduction <add>, %12, %cst_10 [1] : vector<8x32xf32> to vector<8xf32>
    %14 = vector.shape_cast %13 : vector<8xf32> to vector<8x1xf32>
    %cst_11 = arith.constant 3.200000e+01 : f32
    %15 = vector.broadcast %cst_11 : f32 to vector<8x1xf32>
    %16 = arith.divf %14, %15 : vector<8x1xf32>
    %17 = vector.broadcast %9 : vector<8x1xf32> to vector<8x32xf32>
    %18 = arith.subf %3, %17 : vector<8x32xf32>
    %cst_12 = arith.constant 9.99999974E-6 : f32
    %19 = vector.broadcast %cst_12 : f32 to vector<8x1xf32>
    %20 = arith.addf %16, %19 : vector<8x1xf32>
    %21 = math.rsqrt %20 : vector<8x1xf32>
    %22 = vector.broadcast %21 : vector<8x1xf32> to vector<8x32xf32>
    %23 = arith.mulf %18, %22 : vector<8x32xf32>
    %24 = vector.broadcast %4 : vector<1x32xf32> to vector<8x32xf32>
    %25 = arith.mulf %23, %24 : vector<8x32xf32>
    %26 = vector.broadcast %5 : vector<1x32xf32> to vector<8x32xf32>
    %27 = arith.addf %25, %26 : vector<8x32xf32>
    %28 = arith.truncf %27 : vector<8x32xf32> to vector<8x32xbf16>
    %c0_13 = arith.constant 0 : index
    %c0_14 = arith.constant 0 : index
    %29 = vector.load %arg4[%c0_13, %c0_14] : memref<1x32xf32, #tpu.memory_space<vmem>>, vector<1x32xf32>
    %c0_15 = arith.constant 0 : index
    %c0_16 = arith.constant 0 : index
    %30 = vector.load %arg5[%c0_15, %c0_16] : memref<1x32xf32, #tpu.memory_space<vmem>>, vector<1x32xf32>
    %cst_17 = arith.constant dense<0.000000e+00> : vector<8xf32>
    %31 = vector.multi_reduction <add>, %1, %cst_17 [1] : vector<8x32xf32> to vector<8xf32>
    %32 = vector.shape_cast %31 : vector<8xf32> to vector<8x1xf32>
    %cst_18 = arith.constant 3.200000e+01 : f32
    %33 = vector.broadcast %cst_18 : f32 to vector<8x1xf32>
    %34 = arith.divf %32, %33 : vector<8x1xf32>
    %35 = vector.broadcast %34 : vector<8x1xf32> to vector<8x32xf32>
    %36 = arith.subf %1, %35 : vector<8x32xf32>
    %37 = arith.mulf %36, %36 : vector<8x32xf32>
    %cst_19 = arith.constant dense<0.000000e+00> : vector<8xf32>
    %38 = vector.multi_reduction <add>, %37, %cst_19 [1] : vector<8x32xf32> to vector<8xf32>
    %39 = vector.shape_cast %38 : vector<8xf32> to vector<8x1xf32>
    %cst_20 = arith.constant 3.200000e+01 : f32
    %40 = vector.broadcast %cst_20 : f32 to vector<8x1xf32>
    %41 = arith.divf %39, %40 : vector<8x1xf32>
    %42 = vector.broadcast %34 : vector<8x1xf32> to vector<8x32xf32>
    %43 = arith.subf %1, %42 : vector<8x32xf32>
    %cst_21 = arith.constant 9.99999974E-6 : f32
    %44 = vector.broadcast %cst_21 : f32 to vector<8x1xf32>
    %45 = arith.addf %41, %44 : vector<8x1xf32>
    %46 = math.rsqrt %45 : vector<8x1xf32>
    %47 = vector.broadcast %46 : vector<8x1xf32> to vector<8x32xf32>
    %48 = arith.mulf %43, %47 : vector<8x32xf32>
    %49 = vector.broadcast %29 : vector<1x32xf32> to vector<8x32xf32>
    %50 = arith.mulf %48, %49 : vector<8x32xf32>
    %51 = vector.broadcast %30 : vector<1x32xf32> to vector<8x32xf32>
    %52 = arith.addf %50, %51 : vector<8x32xf32>
    %53 = arith.truncf %52 : vector<8x32xf32> to vector<8x32xbf16>
    %c0_22 = arith.constant 0 : index
    %c0_23 = arith.constant 0 : index
    %54 = vector.load %arg6[%c0_22, %c0_23] : memref<32x32xbf16, #tpu.memory_space<vmem>>, vector<32x32xbf16>
    %cst_24 = arith.constant dense<0.000000e+00> : vector<8x32xf32>
    %55 = tpu.matmul %53, %54, %cst_24 {dimension_numbers = #tpu.dot_dimension_numbers<[1], [0], [0], [1], [0, 0, 1, 1], [], []>} : vector<8x32xbf16>, vector<32x32xbf16>, vector<8x32xf32> -> vector<8x32xf32>
    %c0_25 = arith.constant 0 : index
    %c0_26 = arith.constant 0 : index
    %56 = vector.load %arg9[%c0_25, %c0_26] : memref<1x32xf32, #tpu.memory_space<vmem>>, vector<1x32xf32>
    %57 = vector.broadcast %56 : vector<1x32xf32> to vector<8x32xf32>
    %58 = arith.addf %55, %57 : vector<8x32xf32>
    %c0_27 = arith.constant 0 : index
    %c0_28 = arith.constant 0 : index
    %59 = vector.load %arg7[%c0_27, %c0_28] : memref<32x32xbf16, #tpu.memory_space<vmem>>, vector<32x32xbf16>
    %cst_29 = arith.constant dense<0.000000e+00> : vector<8x32xf32>
    %60 = tpu.matmul %28, %59, %cst_29 {dimension_numbers = #tpu.dot_dimension_numbers<[1], [0], [0], [1], [0, 0, 1, 1], [], []>} : vector<8x32xbf16>, vector<32x32xbf16>, vector<8x32xf32> -> vector<8x32xf32>
    %c0_30 = arith.constant 0 : index
    %c0_31 = arith.constant 0 : index
    %61 = vector.load %arg10[%c0_30, %c0_31] : memref<1x32xf32, #tpu.memory_space<vmem>>, vector<1x32xf32>
    %62 = vector.broadcast %61 : vector<1x32xf32> to vector<8x32xf32>
    %63 = arith.addf %60, %62 : vector<8x32xf32>
    %c0_32 = arith.constant 0 : index
    %c0_33 = arith.constant 0 : index
    %64 = vector.load %arg8[%c0_32, %c0_33] : memref<32x32xbf16, #tpu.memory_space<vmem>>, vector<32x32xbf16>
    %cst_34 = arith.constant dense<0.000000e+00> : vector<8x32xf32>
    %65 = tpu.matmul %28, %64, %cst_34 {dimension_numbers = #tpu.dot_dimension_numbers<[1], [0], [0], [1], [0, 0, 1, 1], [], []>} : vector<8x32xbf16>, vector<32x32xbf16>, vector<8x32xf32> -> vector<8x32xf32>
    %c0_35 = arith.constant 0 : index
    %c0_36 = arith.constant 0 : index
    %66 = vector.load %arg11[%c0_35, %c0_36] : memref<1x32xf32, #tpu.memory_space<vmem>>, vector<1x32xf32>
    %67 = vector.broadcast %66 : vector<1x32xf32> to vector<8x32xf32>
    %68 = arith.addf %65, %67 : vector<8x32xf32>
    %cst_37 = arith.constant 0.353553385 : f32
    %69 = vector.broadcast %cst_37 : f32 to vector<8x32xf32>
    %70 = arith.mulf %58, %69 : vector<8x32xf32>
    %71 = arith.truncf %70 : vector<8x32xf32> to vector<8x32xbf16>
    %72 = arith.truncf %63 : vector<8x32xf32> to vector<8x32xbf16>
    %73 = arith.truncf %68 : vector<8x32xf32> to vector<8x32xbf16>
    %74 = tpu.iota {dimensions = array<i32: 0>} : vector<8x8xi32>
    %c8_i32 = arith.constant 8 : i32
    %75 = arith.muli %arg1, %c8_i32 : i32
    %76 = vector.broadcast %75 : i32 to vector<8x8xi32>
    %77 = arith.addi %74, %76 : vector<8x8xi32>
    %78 = tpu.iota {dimensions = array<i32: 1>} : vector<8x8xi32>
    %79 = arith.cmpi sle, %78, %77 : vector<8x8xi32>
    %cst_38 = arith.constant 0.000000e+00 : f32
    %80 = vector.broadcast %cst_38 : f32 to vector<8x32xf32>
    %81 = vector.extract_strided_slice %71 {offsets = [0, 0], sizes = [8, 8], strides = [1, 1]} : vector<8x32xbf16> to vector<8x8xbf16>
    %82 = vector.extract_strided_slice %72 {offsets = [0, 0], sizes = [8, 8], strides = [1, 1]} : vector<8x32xbf16> to vector<8x8xbf16>
    %cst_39 = arith.constant dense<0.000000e+00> : vector<8x8xf32>
    %83 = tpu.matmul %81, %82, %cst_39 {dimension_numbers = #tpu.dot_dimension_numbers<[1], [1], [0], [0], [0, 0, 1, 0], [], []>} : vector<8x8xbf16>, vector<8x8xbf16>, vector<8x8xf32> -> vector<8x8xf32>
    %cst_40 = arith.constant -1.000000e+30 : f32
    %84 = vector.broadcast %cst_40 : f32 to vector<8x8xf32>
    %85 = arith.select %79, %83, %84 : vector<8x8xi1>, vector<8x8xf32>
    %cst_41 = arith.constant dense<0xFF800000> : vector<8xf32>
    %86 = vector.multi_reduction <maximumf>, %85, %cst_41 [1] : vector<8x8xf32> to vector<8xf32>
    %87 = vector.shape_cast %86 : vector<8xf32> to vector<8x1xf32>
    %88 = vector.broadcast %87 : vector<8x1xf32> to vector<8x8xf32>
    %89 = arith.subf %85, %88 : vector<8x8xf32>
    %90 = math.exp %89 : vector<8x8xf32>
    %cst_42 = arith.constant dense<0.000000e+00> : vector<8xf32>
    %91 = vector.multi_reduction <add>, %90, %cst_42 [1] : vector<8x8xf32> to vector<8xf32>
    %92 = vector.shape_cast %91 : vector<8xf32> to vector<8x1xf32>
    %93 = tpu.reciprocal %92 {approx = true} : vector<8x1xf32> -> vector<8x1xf32>
    %94 = vector.broadcast %93 : vector<8x1xf32> to vector<8x8xf32>
    %95 = arith.mulf %90, %94 : vector<8x8xf32>
    %96 = arith.truncf %95 : vector<8x8xf32> to vector<8x8xbf16>
    %97 = vector.extract_strided_slice %73 {offsets = [0, 0], sizes = [8, 8], strides = [1, 1]} : vector<8x32xbf16> to vector<8x8xbf16>
    %cst_43 = arith.constant dense<0.000000e+00> : vector<8x8xf32>
    %98 = tpu.matmul %96, %97, %cst_43 {dimension_numbers = #tpu.dot_dimension_numbers<[1], [0], [0], [1], [0, 0, 1, 1], [], []>} : vector<8x8xbf16>, vector<8x8xbf16>, vector<8x8xf32> -> vector<8x8xf32>
    %99 = arith.truncf %98 : vector<8x8xf32> to vector<8x8xbf16>
    %c0_44 = arith.constant 0 : index
    %c0_45 = arith.constant 0 : index
    %100 = vector.load %arg12[%c0_44, %c0_45] : memref<32x32xbf16, #tpu.memory_space<vmem>>, vector<8x32xbf16>
    %cst_46 = arith.constant dense<0.000000e+00> : vector<8x32xf32>
    %101 = tpu.matmul %99, %100, %cst_46 {dimension_numbers = #tpu.dot_dimension_numbers<[1], [0], [0], [1], [0, 0, 1, 1], [], []>} : vector<8x8xbf16>, vector<8x32xbf16>, vector<8x32xf32> -> vector<8x32xf32>
    %102 = arith.addf %80, %101 : vector<8x32xf32>
    %103 = vector.extract_strided_slice %71 {offsets = [0, 8], sizes = [8, 8], strides = [1, 1]} : vector<8x32xbf16> to vector<8x8xbf16>
    %104 = vector.extract_strided_slice %72 {offsets = [0, 8], sizes = [8, 8], strides = [1, 1]} : vector<8x32xbf16> to vector<8x8xbf16>
    %cst_47 = arith.constant dense<0.000000e+00> : vector<8x8xf32>
    %105 = tpu.matmul %103, %104, %cst_47 {dimension_numbers = #tpu.dot_dimension_numbers<[1], [1], [0], [0], [0, 0, 1, 0], [], []>} : vector<8x8xbf16>, vector<8x8xbf16>, vector<8x8xf32> -> vector<8x8xf32>
    %cst_48 = arith.constant -1.000000e+30 : f32
    %106 = vector.broadcast %cst_48 : f32 to vector<8x8xf32>
    %107 = arith.select %79, %105, %106 : vector<8x8xi1>, vector<8x8xf32>
    %cst_49 = arith.constant dense<0xFF800000> : vector<8xf32>
    %108 = vector.multi_reduction <maximumf>, %107, %cst_49 [1] : vector<8x8xf32> to vector<8xf32>
    %109 = vector.shape_cast %108 : vector<8xf32> to vector<8x1xf32>
    %110 = vector.broadcast %109 : vector<8x1xf32> to vector<8x8xf32>
    %111 = arith.subf %107, %110 : vector<8x8xf32>
    %112 = math.exp %111 : vector<8x8xf32>
    %cst_50 = arith.constant dense<0.000000e+00> : vector<8xf32>
    %113 = vector.multi_reduction <add>, %112, %cst_50 [1] : vector<8x8xf32> to vector<8xf32>
    %114 = vector.shape_cast %113 : vector<8xf32> to vector<8x1xf32>
    %115 = tpu.reciprocal %114 {approx = true} : vector<8x1xf32> -> vector<8x1xf32>
    %116 = vector.broadcast %115 : vector<8x1xf32> to vector<8x8xf32>
    %117 = arith.mulf %112, %116 : vector<8x8xf32>
    %118 = arith.truncf %117 : vector<8x8xf32> to vector<8x8xbf16>
    %119 = vector.extract_strided_slice %73 {offsets = [0, 8], sizes = [8, 8], strides = [1, 1]} : vector<8x32xbf16> to vector<8x8xbf16>
    %cst_51 = arith.constant dense<0.000000e+00> : vector<8x8xf32>
    %120 = tpu.matmul %118, %119, %cst_51 {dimension_numbers = #tpu.dot_dimension_numbers<[1], [0], [0], [1], [0, 0, 1, 1], [], []>} : vector<8x8xbf16>, vector<8x8xbf16>, vector<8x8xf32> -> vector<8x8xf32>
    %121 = arith.truncf %120 : vector<8x8xf32> to vector<8x8xbf16>
    %c8 = arith.constant 8 : index
    %c0_52 = arith.constant 0 : index
    %122 = vector.load %arg12[%c8, %c0_52] : memref<32x32xbf16, #tpu.memory_space<vmem>>, vector<8x32xbf16>
    %cst_53 = arith.constant dense<0.000000e+00> : vector<8x32xf32>
    %123 = tpu.matmul %121, %122, %cst_53 {dimension_numbers = #tpu.dot_dimension_numbers<[1], [0], [0], [1], [0, 0, 1, 1], [], []>} : vector<8x8xbf16>, vector<8x32xbf16>, vector<8x32xf32> -> vector<8x32xf32>
    %124 = arith.addf %102, %123 : vector<8x32xf32>
    %125 = vector.extract_strided_slice %71 {offsets = [0, 16], sizes = [8, 8], strides = [1, 1]} : vector<8x32xbf16> to vector<8x8xbf16>
    %126 = vector.extract_strided_slice %72 {offsets = [0, 16], sizes = [8, 8], strides = [1, 1]} : vector<8x32xbf16> to vector<8x8xbf16>
    %cst_54 = arith.constant dense<0.000000e+00> : vector<8x8xf32>
    %127 = tpu.matmul %125, %126, %cst_54 {dimension_numbers = #tpu.dot_dimension_numbers<[1], [1], [0], [0], [0, 0, 1, 0], [], []>} : vector<8x8xbf16>, vector<8x8xbf16>, vector<8x8xf32> -> vector<8x8xf32>
    %cst_55 = arith.constant -1.000000e+30 : f32
    %128 = vector.broadcast %cst_55 : f32 to vector<8x8xf32>
    %129 = arith.select %79, %127, %128 : vector<8x8xi1>, vector<8x8xf32>
    %cst_56 = arith.constant dense<0xFF800000> : vector<8xf32>
    %130 = vector.multi_reduction <maximumf>, %129, %cst_56 [1] : vector<8x8xf32> to vector<8xf32>
    %131 = vector.shape_cast %130 : vector<8xf32> to vector<8x1xf32>
    %132 = vector.broadcast %131 : vector<8x1xf32> to vector<8x8xf32>
    %133 = arith.subf %129, %132 : vector<8x8xf32>
    %134 = math.exp %133 : vector<8x8xf32>
    %cst_57 = arith.constant dense<0.000000e+00> : vector<8xf32>
    %135 = vector.multi_reduction <add>, %134, %cst_57 [1] : vector<8x8xf32> to vector<8xf32>
    %136 = vector.shape_cast %135 : vector<8xf32> to vector<8x1xf32>
    %137 = tpu.reciprocal %136 {approx = true} : vector<8x1xf32> -> vector<8x1xf32>
    %138 = vector.broadcast %137 : vector<8x1xf32> to vector<8x8xf32>
    %139 = arith.mulf %134, %138 : vector<8x8xf32>
    %140 = arith.truncf %139 : vector<8x8xf32> to vector<8x8xbf16>
    %141 = vector.extract_strided_slice %73 {offsets = [0, 16], sizes = [8, 8], strides = [1, 1]} : vector<8x32xbf16> to vector<8x8xbf16>
    %cst_58 = arith.constant dense<0.000000e+00> : vector<8x8xf32>
    %142 = tpu.matmul %140, %141, %cst_58 {dimension_numbers = #tpu.dot_dimension_numbers<[1], [0], [0], [1], [0, 0, 1, 1], [], []>} : vector<8x8xbf16>, vector<8x8xbf16>, vector<8x8xf32> -> vector<8x8xf32>
    %143 = arith.truncf %142 : vector<8x8xf32> to vector<8x8xbf16>
    %c16 = arith.constant 16 : index
    %c0_59 = arith.constant 0 : index
    %144 = vector.load %arg12[%c16, %c0_59] : memref<32x32xbf16, #tpu.memory_space<vmem>>, vector<8x32xbf16>
    %cst_60 = arith.constant dense<0.000000e+00> : vector<8x32xf32>
    %145 = tpu.matmul %143, %144, %cst_60 {dimension_numbers = #tpu.dot_dimension_numbers<[1], [0], [0], [1], [0, 0, 1, 1], [], []>} : vector<8x8xbf16>, vector<8x32xbf16>, vector<8x32xf32> -> vector<8x32xf32>
    %146 = arith.addf %124, %145 : vector<8x32xf32>
    %147 = vector.extract_strided_slice %71 {offsets = [0, 24], sizes = [8, 8], strides = [1, 1]} : vector<8x32xbf16> to vector<8x8xbf16>
    %148 = vector.extract_strided_slice %72 {offsets = [0, 24], sizes = [8, 8], strides = [1, 1]} : vector<8x32xbf16> to vector<8x8xbf16>
    %cst_61 = arith.constant dense<0.000000e+00> : vector<8x8xf32>
    %149 = tpu.matmul %147, %148, %cst_61 {dimension_numbers = #tpu.dot_dimension_numbers<[1], [1], [0], [0], [0, 0, 1, 0], [], []>} : vector<8x8xbf16>, vector<8x8xbf16>, vector<8x8xf32> -> vector<8x8xf32>
    %cst_62 = arith.constant -1.000000e+30 : f32
    %150 = vector.broadcast %cst_62 : f32 to vector<8x8xf32>
    %151 = arith.select %79, %149, %150 : vector<8x8xi1>, vector<8x8xf32>
    %cst_63 = arith.constant dense<0xFF800000> : vector<8xf32>
    %152 = vector.multi_reduction <maximumf>, %151, %cst_63 [1] : vector<8x8xf32> to vector<8xf32>
    %153 = vector.shape_cast %152 : vector<8xf32> to vector<8x1xf32>
    %154 = vector.broadcast %153 : vector<8x1xf32> to vector<8x8xf32>
    %155 = arith.subf %151, %154 : vector<8x8xf32>
    %156 = math.exp %155 : vector<8x8xf32>
    %cst_64 = arith.constant dense<0.000000e+00> : vector<8xf32>
    %157 = vector.multi_reduction <add>, %156, %cst_64 [1] : vector<8x8xf32> to vector<8xf32>
    %158 = vector.shape_cast %157 : vector<8xf32> to vector<8x1xf32>
    %159 = tpu.reciprocal %158 {approx = true} : vector<8x1xf32> -> vector<8x1xf32>
    %160 = vector.broadcast %159 : vector<8x1xf32> to vector<8x8xf32>
    %161 = arith.mulf %156, %160 : vector<8x8xf32>
    %162 = arith.truncf %161 : vector<8x8xf32> to vector<8x8xbf16>
    %163 = vector.extract_strided_slice %73 {offsets = [0, 24], sizes = [8, 8], strides = [1, 1]} : vector<8x32xbf16> to vector<8x8xbf16>
    %cst_65 = arith.constant dense<0.000000e+00> : vector<8x8xf32>
    %164 = tpu.matmul %162, %163, %cst_65 {dimension_numbers = #tpu.dot_dimension_numbers<[1], [0], [0], [1], [0, 0, 1, 1], [], []>} : vector<8x8xbf16>, vector<8x8xbf16>, vector<8x8xf32> -> vector<8x8xf32>
    %165 = arith.truncf %164 : vector<8x8xf32> to vector<8x8xbf16>
    %c24 = arith.constant 24 : index
    %c0_66 = arith.constant 0 : index
    %166 = vector.load %arg12[%c24, %c0_66] : memref<32x32xbf16, #tpu.memory_space<vmem>>, vector<8x32xbf16>
    %cst_67 = arith.constant dense<0.000000e+00> : vector<8x32xf32>
    %167 = tpu.matmul %165, %166, %cst_67 {dimension_numbers = #tpu.dot_dimension_numbers<[1], [0], [0], [1], [0, 0, 1, 1], [], []>} : vector<8x8xbf16>, vector<8x32xbf16>, vector<8x32xf32> -> vector<8x32xf32>
    %168 = arith.addf %146, %167 : vector<8x32xf32>
    %c0_68 = arith.constant 0 : index
    %c0_69 = arith.constant 0 : index
    %169 = vector.load %arg13[%c0_68, %c0_69] : memref<1x32xf32, #tpu.memory_space<vmem>>, vector<1x32xf32>
    %170 = vector.broadcast %169 : vector<1x32xf32> to vector<8x32xf32>
    %171 = arith.addf %168, %170 : vector<8x32xf32>
    %172 = arith.addf %1, %171 : vector<8x32xf32>
    %c0_70 = arith.constant 0 : index
    %c0_71 = arith.constant 0 : index
    %173 = vector.load %arg14[%c0_70, %c0_71] : memref<1x32xf32, #tpu.memory_space<vmem>>, vector<1x32xf32>
    %c0_72 = arith.constant 0 : index
    %c0_73 = arith.constant 0 : index
    %174 = vector.load %arg15[%c0_72, %c0_73] : memref<1x32xf32, #tpu.memory_space<vmem>>, vector<1x32xf32>
    %cst_74 = arith.constant dense<0.000000e+00> : vector<8xf32>
    %175 = vector.multi_reduction <add>, %172, %cst_74 [1] : vector<8x32xf32> to vector<8xf32>
    %176 = vector.shape_cast %175 : vector<8xf32> to vector<8x1xf32>
    %cst_75 = arith.constant 3.200000e+01 : f32
    %177 = vector.broadcast %cst_75 : f32 to vector<8x1xf32>
    %178 = arith.divf %176, %177 : vector<8x1xf32>
    %179 = vector.broadcast %178 : vector<8x1xf32> to vector<8x32xf32>
    %180 = arith.subf %172, %179 : vector<8x32xf32>
    %181 = arith.mulf %180, %180 : vector<8x32xf32>
    %cst_76 = arith.constant dense<0.000000e+00> : vector<8xf32>
    %182 = vector.multi_reduction <add>, %181, %cst_76 [1] : vector<8x32xf32> to vector<8xf32>
    %183 = vector.shape_cast %182 : vector<8xf32> to vector<8x1xf32>
    %cst_77 = arith.constant 3.200000e+01 : f32
    %184 = vector.broadcast %cst_77 : f32 to vector<8x1xf32>
    %185 = arith.divf %183, %184 : vector<8x1xf32>
    %186 = vector.broadcast %178 : vector<8x1xf32> to vector<8x32xf32>
    %187 = arith.subf %172, %186 : vector<8x32xf32>
    %cst_78 = arith.constant 9.99999974E-6 : f32
    %188 = vector.broadcast %cst_78 : f32 to vector<8x1xf32>
    %189 = arith.addf %185, %188 : vector<8x1xf32>
    %190 = math.rsqrt %189 : vector<8x1xf32>
    %191 = vector.broadcast %190 : vector<8x1xf32> to vector<8x32xf32>
    %192 = arith.mulf %187, %191 : vector<8x32xf32>
    %193 = vector.broadcast %173 : vector<1x32xf32> to vector<8x32xf32>
    %194 = arith.mulf %192, %193 : vector<8x32xf32>
    %195 = vector.broadcast %174 : vector<1x32xf32> to vector<8x32xf32>
    %196 = arith.addf %194, %195 : vector<8x32xf32>
    %197 = arith.truncf %196 : vector<8x32xf32> to vector<8x32xbf16>
    %c0_79 = arith.constant 0 : index
    %c0_80 = arith.constant 0 : index
    %198 = vector.load %arg16[%c0_79, %c0_80] : memref<32x64xbf16, #tpu.memory_space<vmem>>, vector<32x64xbf16>
    %cst_81 = arith.constant dense<0.000000e+00> : vector<8x64xf32>
    %199 = tpu.matmul %197, %198, %cst_81 {dimension_numbers = #tpu.dot_dimension_numbers<[1], [0], [0], [1], [0, 0, 1, 1], [], []>} : vector<8x32xbf16>, vector<32x64xbf16>, vector<8x64xf32> -> vector<8x64xf32>
    %c0_82 = arith.constant 0 : index
    %c0_83 = arith.constant 0 : index
    %200 = vector.load %arg17[%c0_82, %c0_83] : memref<1x64xf32, #tpu.memory_space<vmem>>, vector<1x64xf32>
    %201 = vector.broadcast %200 : vector<1x64xf32> to vector<8x64xf32>
    %202 = arith.addf %199, %201 : vector<8x64xf32>
    %cst_84 = arith.constant 5.000000e-01 : f32
    %203 = vector.broadcast %cst_84 : f32 to vector<8x64xf32>
    %204 = arith.mulf %203, %202 : vector<8x64xf32>
    %cst_85 = arith.constant 4.471500e-02 : f32
    %205 = vector.broadcast %cst_85 : f32 to vector<8x64xf32>
    %206 = arith.mulf %205, %202 : vector<8x64xf32>
    %207 = arith.mulf %206, %202 : vector<8x64xf32>
    %208 = arith.mulf %207, %202 : vector<8x64xf32>
    %209 = arith.addf %202, %208 : vector<8x64xf32>
    %cst_86 = arith.constant 0.797884583 : f32
    %210 = vector.broadcast %cst_86 : f32 to vector<8x64xf32>
    %211 = arith.mulf %210, %209 : vector<8x64xf32>
    %212 = math.tanh %211 : vector<8x64xf32>
    %cst_87 = arith.constant 1.000000e+00 : f32
    %213 = vector.broadcast %cst_87 : f32 to vector<8x64xf32>
    %214 = arith.addf %213, %212 : vector<8x64xf32>
    %215 = arith.mulf %204, %214 : vector<8x64xf32>
    %216 = arith.truncf %215 : vector<8x64xf32> to vector<8x64xbf16>
    %c0_88 = arith.constant 0 : index
    %c0_89 = arith.constant 0 : index
    %217 = vector.load %arg18[%c0_88, %c0_89] : memref<64x32xbf16, #tpu.memory_space<vmem>>, vector<64x32xbf16>
    %cst_90 = arith.constant dense<0.000000e+00> : vector<8x32xf32>
    %218 = tpu.matmul %216, %217, %cst_90 {dimension_numbers = #tpu.dot_dimension_numbers<[1], [0], [0], [1], [0, 0, 1, 1], [], []>} : vector<8x64xbf16>, vector<64x32xbf16>, vector<8x32xf32> -> vector<8x32xf32>
    %c0_91 = arith.constant 0 : index
    %c0_92 = arith.constant 0 : index
    %219 = vector.load %arg19[%c0_91, %c0_92] : memref<1x32xf32, #tpu.memory_space<vmem>>, vector<1x32xf32>
    %220 = vector.broadcast %219 : vector<1x32xf32> to vector<8x32xf32>
    %221 = arith.addf %218, %220 : vector<8x32xf32>
    %222 = arith.addf %172, %221 : vector<8x32xf32>
    %c0_93 = arith.constant 0 : index
    %c0_94 = arith.constant 0 : index
    %c0_95 = arith.constant 0 : index
    %223 = vector.load %arg20[%c0_93, %c0_94, %c0_95] : memref<1x8x32xf32, #tpu.memory_space<vmem>>, vector<1x8x32xf32>
    %224 = vector.shape_cast %223 : vector<1x8x32xf32> to vector<8x32xf32>
    %225 = vector.shape_cast %222 : vector<8x32xf32> to vector<1x8x32xf32>
    tpu.vector_store %arg20[%c0_93, %c0_94, %c0_95], %225 {strides = array<i32>} : memref<1x8x32xf32, #tpu.memory_space<vmem>>, vector<1x8x32xf32>,
    return
  }
  func.func @transform_0(%arg0: i32, %arg1: i32) -> (i32, i32, i32) {
    %c0_i32 = arith.constant 0 : i32
    %c0_i32_0 = arith.constant 0 : i32
    return %arg0, %arg1, %c0_i32 : i32, i32, i32
  }
  func.func @transform_1(%arg0: i32, %arg1: i32) -> (i32, i32, i32) {
    %c0_i32 = arith.constant 0 : i32
    %c0_i32_0 = arith.constant 0 : i32
    %c0_i32_1 = arith.constant 0 : i32
    return %arg0, %c0_i32, %c0_i32_0 : i32, i32, i32
  }
  func.func @transform_2(%arg0: i32, %arg1: i32) -> (i32, i32) {
    %c0_i32 = arith.constant 0 : i32
    %c0_i32_0 = arith.constant 0 : i32
    %c0_i32_1 = arith.constant 0 : i32
    return %c0_i32, %c0_i32_0 : i32, i32
  }
  func.func @transform_3(%arg0: i32, %arg1: i32) -> (i32, i32) {
    %c0_i32 = arith.constant 0 : i32
    %c0_i32_0 = arith.constant 0 : i32
    %c0_i32_1 = arith.constant 0 : i32
    return %c0_i32, %c0_i32_0 : i32, i32
  }
  func.func @transform_4(%arg0: i32, %arg1: i32) -> (i32, i32) {
    %c0_i32 = arith.constant 0 : i32
    %c0_i32_0 = arith.constant 0 : i32
    %c0_i32_1 = arith.constant 0 : i32
    return %c0_i32, %c0_i32_0 : i32, i32
  }
  func.func @transform_5(%arg0: i32, %arg1: i32) -> (i32, i32) {
    %c0_i32 = arith.constant 0 : i32
    %c0_i32_0 = arith.constant 0 : i32
    %c0_i32_1 = arith.constant 0 : i32
    return %c0_i32, %c0_i32_0 : i32, i32
  }
  func.func @transform_6(%arg0: i32, %arg1: i32) -> (i32, i32) {
    %c0_i32 = arith.constant 0 : i32
    %c0_i32_0 = arith.constant 0 : i32
    %c0_i32_1 = arith.constant 0 : i32
    return %c0_i32, %c0_i32_0 : i32, i32
  }
  func.func @transform_7(%arg0: i32, %arg1: i32) -> (i32, i32) {
    %c0_i32 = arith.constant 0 : i32
    %c0_i32_0 = arith.constant 0 : i32
    %c0_i32_1 = arith.constant 0 : i32
    return %c0_i32, %c0_i32_0 : i32, i32
  }
  func.func @transform_8(%arg0: i32, %arg1: i32) -> (i32, i32) {
    %c0_i32 = arith.constant 0 : i32
    %c0_i32_0 = arith.constant 0 : i32
    %c0_i32_1 = arith.constant 0 : i32
    return %c0_i32, %c0_i32_0 : i32, i32
  }
  func.func @transform_9(%arg0: i32, %arg1: i32) -> (i32, i32) {
    %c0_i32 = arith.constant 0 : i32
    %c0_i32_0 = arith.constant 0 : i32
    %c0_i32_1 = arith.constant 0 : i32
    return %c0_i32, %c0_i32_0 : i32, i32
  }
  func.func @transform_10(%arg0: i32, %arg1: i32) -> (i32, i32) {
    %c0_i32 = arith.constant 0 : i32
    %c0_i32_0 = arith.constant 0 : i32
    %c0_i32_1 = arith.constant 0 : i32
    return %c0_i32, %c0_i32_0 : i32, i32
  }
  func.func @transform_11(%arg0: i32, %arg1: i32) -> (i32, i32) {
    %c0_i32 = arith.constant 0 : i32
    %c0_i32_0 = arith.constant 0 : i32
    %c0_i32_1 = arith.constant 0 : i32
    return %c0_i32, %c0_i32_0 : i32, i32
  }
  func.func @transform_12(%arg0: i32, %arg1: i32) -> (i32, i32) {
    %c0_i32 = arith.constant 0 : i32
    %c0_i32_0 = arith.constant 0 : i32
    %c0_i32_1 = arith.constant 0 : i32
    return %c0_i32, %c0_i32_0 : i32, i32
  }
  func.func @transform_13(%arg0: i32, %arg1: i32) -> (i32, i32) {
    %c0_i32 = arith.constant 0 : i32
    %c0_i32_0 = arith.constant 0 : i32
    %c0_i32_1 = arith.constant 0 : i32
    return %c0_i32, %c0_i32_0 : i32, i32
  }
  func.func @transform_14(%arg0: i32, %arg1: i32) -> (i32, i32) {
    %c0_i32 = arith.constant 0 : i32
    %c0_i32_0 = arith.constant 0 : i32
    %c0_i32_1 = arith.constant 0 : i32
    return %c0_i32, %c0_i32_0 : i32, i32
  }
  func.func @transform_15(%arg0: i32, %arg1: i32) -> (i32, i32) {
    %c0_i32 = arith.constant 0 : i32
    %c0_i32_0 = arith.constant 0 : i32
    %c0_i32_1 = arith.constant 0 : i32
    return %c0_i32, %c0_i32_0 : i32, i32
  }
  func.func @transform_16(%arg0: i32, %arg1: i32) -> (i32, i32) {
    %c0_i32 = arith.constant 0 : i32
    %c0_i32_0 = arith.constant 0 : i32
    %c0_i32_1 = arith.constant 0 : i32
    return %c0_i32, %c0_i32_0 : i32, i32
  }
  func.func @transform_17(%arg0: i32, %arg1: i32) -> (i32, i32) {
    %c0_i32 = arith.constant 0 : i32
    %c0_i32_0 = arith.constant 0 : i32
    %c0_i32_1 = arith.constant 0 : i32
    return %c0_i32, %c0_i32_0 : i32, i32
  }
  func.func @transform_18(%arg0: i32, %arg1: i32) -> (i32, i32, i32) {
    %c0_i32 = arith.constant 0 : i32
    %c0_i32_0 = arith.constant 0 : i32
    return %arg0, %arg1, %c0_i32 : i32, i32, i32
  }
}

</mosaic_0001>

<bundles_post_ra>
// kernel: tpu_custom_call.1
= control target key start
LH: loop header
LB: loop body
LE: loop exit
PB: predicated region body
PF: predicated region fallthrough
CT: control target
= control target key end

     0   :  { %s3429_s0 = inlined_call_operand.vmem [shape: f32[2,8,32], index: 0, kind: input, shape index: {}]   ;;  %s3430_s1 = inlined_call_operand.vmem [shape: f32[2,8,32], index: 1, kind: input, shape index: {}]   ;;  %s3431_s2 = inlined_call_operand.vmem [shape: f32[1,32], index: 2, kind: input, shape index: {}]   ;;  %s3432_s3 = inlined_call_operand.hbm [shape: f32[1,32], index: 3, kind: input, shape index: {}]   ;;  %s3433_s4 = inlined_call_operand.vmem [shape: bf16[32,32], index: 4, kind: input, shape index: {}]   ;;  %s3434_s5 = inlined_call_operand.hbm [shape: bf16[32,32], index: 5, kind: input, shape index: {}]   ;;  %s3435_s6 = inlined_call_operand.hbm [shape: bf16[32,32], index: 6, kind: input, shape index: {}]   ;;  %s3436_s7 = inlined_call_operand.hbm [shape: f32[1,32], index: 7, kind: input, shape index: {}]   ;;  %s3437_s8 = inlined_call_operand.hbm [shape: f32[1,32], index: 8, kind: input, shape index: {}]   ;;  %s3438_s9 = inlined_call_operand.hbm [shape: f32[1,32], index: 9, kind: input, shape index: {}]   ;;  %s3439_s10 = inlined_call_operand.vmem [shape: bf16[32,32], index: 10, kind: input, shape index: {}]   ;;  %s3440_s11 = inlined_call_operand.hbm [shape: f32[1,32], index: 11, kind: input, shape index: {}]   ;;  %s3441_s12 = inlined_call_operand.hbm [shape: f32[1,32], index: 12, kind: input, shape index: {}]   ;;  %s3442_s13 = inlined_call_operand.hbm [shape: f32[1,32], index: 13, kind: input, shape index: {}]   ;;  %s3443_s14 = inlined_call_operand.vmem [shape: bf16[32,64], index: 14, kind: input, shape index: {}]   ;;  %s3444_s15 = inlined_call_operand.vmem [shape: f32[1,64], index: 15, kind: input, shape index: {}]   ;;  %s3445_s16 = inlined_call_operand.vmem [shape: bf16[64,32], index: 16, kind: input, shape index: {}]   ;;  %s3446_s17 = inlined_call_operand.vmem [shape: f32[1,32], index: 17, kind: input, shape index: {}]   ;;  %s3447_s18 = inlined_call_operand.hbm [shape: f32[2,8,32], index: 18, kind: output, shape index: {}]  }
   0x1   :  { %3465 = sst [smem:[#allocation33_spill]] %s3429_s0 }
   0x2   :  { %3466 = sst [smem:[#allocation34_spill]] %s3430_s1 }
   0x3   :  { %3467 = sst [smem:[#allocation35_spill]] %s3431_s2 }
   0x4   :  { %3468 = sst [smem:[#allocation36_spill]] %s3432_s3 }
   0x5   :  { %3469 = sst [smem:[#allocation37_spill]] %s3434_s5 }
   0x6   :  { %3470 = sst [smem:[#allocation38_spill]] %s3444_s15 }
   0x7   :  { %3471 = sst [smem:[#allocation39_spill]] %s3446_s17 }
   0x8   :  { %3472 = sst [smem:[#allocation40_spill]] %s3447_s18 }
   0x9   :  { %23 = vsyncpa [#allocation3], 0 }
   0xa   :  { %24 = vsyncpa [#allocation6], 0 }
   0xb   :  { %25 = vsyncpa [#allocation9], 0 }
   0xc   :  { %26 = vsyncpa [#allocation12], 0 }
   0xd   :  { %27 = vsyncpa [#allocation15], 0 }
   0xe   :  { %28 = vsyncpa [#allocation4], 0 }
   0xf   :  { %30 = vsyncpa [#allocation4 + $0x1], 0  ;;  %s2890_s27 = smov 0   ;;  %s2892_s28 = smov 0  }
  0x10   :  { %s2894_s29 = smov 0   ;;  %s2896_s30 = smov 0  }
  0x11   :  { %s2898_s0 = smov 0   ;;  %s2900_s19 = smov 0  }
  0x12 LB: > { %3473 = sst [smem:[#allocation24_spill]] %s2756_s27  ;;  %s2011_s1 = sadd.s32 4294967295, %s2776_s19   ;;  %s2776_s19 = sphi %s2900_s19, %s36_s19   ;;  %s2772_s0 = sphi %s2898_s0, %s3511_s0   ;;  %s2768_s30 = sphi %s2896_s30, %s3510_s30   ;;  %s2764_s29 = sphi %s2894_s29, %s3509_s29   ;;  %s2760_s28 = sphi %s2892_s28, %s3508_s28   ;;  %s2756_s27 = sphi %s2890_s27, %s3507_s27  }
  0x13   : > { %3474 = sst [smem:[#allocation25_spill]] %s2760_s28  ;;  %s2012_s20 = sadd.s32 4294967294, %s2776_s19  }
  0x14   : > { %3475 = sst [smem:[#allocation26_spill]] %s2764_s29  ;;  %s48_s21 = sadd.s32 1, %s2772_s0 }
  0x15   : > { %3476 = sst [smem:[#allocation27_spill]] %s2772_s0  ;;  %s447_s22 = sadd.s32 1, %s2764_s29 }
  0x16   : > { %3477 = sst [smem:[#allocation28_spill]] %s2776_s19  ;;  %p50_p0 = scmp.ge.s32.totalorder %s48_s21, 2 }
  0x17   : > { %p457_p1 = scmp.ne.s32.totalorder %s2764_s29, %s2760_s28  ;;  %p458_p2 = scmp.eq.s32.totalorder %s2011_s1, 1 }
  0x18   : > { %p463_p3 = scmp.ne.s32.totalorder %s2760_s28, %s2756_s27  ;;  %s3513_s21 = smov (%p50_p0, %s48_s21), 0 }
  0x19   : > { %3478 = sst [smem:[#allocation29_spill]] %s3513_s21  ;;  %p2930_p4 = por %p458_p2, %p457_p1 }
  0x1a   : > { %p464_p5 = scmp.eq.s32.totalorder %s2012_s20, 1  ;;  %s442_s23 = ssub.s32 %s2772_s0, %s3513_s21 }
  0x1b   : > { %s3479_s2 = scalar_select %p2930_p4, 1, 0 }
  0x1c   : > { %p2013_p6 = scmp.ge.s32.totalorder %s2776_s19, 1  ;;  %p445_p7 = scmp.eq.s32.totalorder %s442_s23, 0 }
  0x1d   : > { %3480 = sst [smem:[#allocation30_spill]] %s3479_s2  ;;  %p2937_p8 = por %p464_p5, %p463_p3 }
  0x1e   : > { %p471_p9 = scmp.lt.s32.totalorder %s2776_s19, 3  ;;  %p2949_p11 = scmp.eq.s32.totalorder %s2011_s1, 0 }
  0x1f   : > { %s3481_s24 = scalar_select %p2937_p8, 1, 0 }
  0x20   : > { %s2943_s25 = scalar_select %p445_p7, %s2764_s29, %s447_s22  }
  0x21   : > { %3482 = sst [smem:[#allocation31_spill]] %s3481_s24  ;;  %p2945_p10 = pnand %p2013_p6, %p471_p9 }
  0x22   : > { %3483 = sst [smem:[#allocation32_spill]] %s2943_s25  ;;  %s2778_s20 = smov [#allocation5]  }
  0x23   : > { %s3484_s26 = scalar_select %p2945_p10, 1, 0 }
  0x24   : > { %s3485_s27 = scalar_select %p2949_p11, 1, 0 }
  0x25   : > { %p2275_p12 = pneg %p2945_p10  ;;  %s500_s23 = sshll.u32 %s2778_s20, 4  ;;  %s501_s23 = int_to_ptr.vmem [resolvable:$true] %s500_s23 }
  0x26   : > { %s2779_s22 = smov [#allocation8]   ;;  %s3487_s5 = sld [smem:[#allocation37_spill]] }
  0x27   : > { %p2957_p13 = pnand %p2949_p11, %p2275_p12  ;;  %s527_s0 = sshll.u32 %s2779_s22, 4  ;;  %s2961_s0 = int_to_ptr.vmem [resolvable:$true] %s527_s0 }
  0x29   : > { %p2971_p1 = pneg %p2957_p13 }
  0x2c   : > { %s2426_s29 = scalar_lea.hbm %s3487_s5, 256 }
  0x2d   : > { %p2427_p0 = scmp.ne.s32.totalorder %s3487_s5, %s2426_s29  ;;  %p2433_p5 = scmp.lt.u32.totalorder %s2426_s29, %s3487_s5 }
  0x2f   : > { %p2429_p2 = pnand %p2971_p1, %p2427_p0 }
  0x31   : > { %p2430_p3 = pneg %p2429_p2 }
  0x33   : > { %p2435_p6 = pnand %p2433_p5, %p2430_p3 }
  0x35   : > { %2438 = shalt.err (!%p2435_p6)
}
  0x36   : > { %s2439_s25 = scalar_lea.vmem %s501_s23, 256  ;;  %p2447_p8 = scmp.lt.s32.totalorder %s501_s23, %s501_s23 }
  0x37   : > { %p2440_p7 = scmp.ne.s32.totalorder %s501_s23, %s2439_s25  ;;  %p2448_p4 = scmp.lt.s32.totalorder %s2439_s25, %s2439_s25 }
  0x39   : > { %p2442_p9 = pnand %p2440_p7, %p2971_p1  ;;  %p2449_p11 = por %p2448_p4, %p2447_p8 }
  0x3b   : > { %p2443_p12 = pneg %p2442_p9 }
  0x3d   : > { %p2450_p10 = pnand %p2449_p11, %p2443_p12 }
  0x3f   : > { %2453 = shalt.err (!%p2450_p10)
}
  0x40   : > { %s3463_s19 = smov 64   ;;  %s3464_s24 = smov 4  }
  0x41   : > { %2281 = dma.hbm_to_vmem [thread:$0]  (!%p2957_p13), %s3487_s5, 256, %s501_s23, [#allocation6], %s3463_s19, %s3463_s19, %s3464_s24  }
  0x42   : > { %s2454_s2 = scalar_lea.hbm %s3436_s7, 16 }
  0x43   : > { %p2455_p4 = scmp.ne.s32.totalorder %s3436_s7, %s2454_s2  ;;  %p2461_p11 = scmp.lt.u32.totalorder %s2454_s2, %s3436_s7 }
  0x45   : > { %p2457_p8 = pnand %p2455_p4, %p2971_p1 }
  0x47   : > { %p2458_p10 = pneg %p2457_p8 }
  0x49   : > { %p2463_p0 = pnand %p2461_p11, %p2458_p10 }
  0x4b   : > { %2466 = shalt.err (!%p2463_p0)
}
  0x4c   : > { %s2467_s23 = scalar_lea.vmem %s2961_s0, 16  ;;  %s2474_s17 = scalar_lea.vmem %s2961_s0, 32 }
  0x4d   : > { %p2468_p2 = scmp.ne.s32.totalorder %s2961_s0, %s2467_s23  ;;  %p2475_p6 = scmp.lt.s32.totalorder %s2961_s0, %s2961_s0 }
  0x4e   : > { %p2476_p7 = scmp.lt.s32.totalorder %s2474_s17, %s2467_s23 }
  0x4f   : > { %p2470_p3 = pnand %p2468_p2, %p2971_p1 }
  0x50   : > { %p2477_p9 = por %p2476_p7, %p2475_p6 }
  0x51   : > { %p2471_p5 = pneg %p2470_p3 }
  0x53   : > { %p2478_p12 = pnand %p2477_p9, %p2471_p5 }
  0x55   : > { %2481 = shalt.err (!%p2478_p12)
}
  0x56   : > { %2287 = dma.hbm_to_vmem [thread:$0]  (!%p2957_p13), %s3436_s7, 16, %s2961_s0, [#allocation9]  }
  0x57   : > { %s2782_s2 = smov [#allocation11]   ;;  %s2783_s29 = smov [#allocation14]  }
  0x58   : > { %s549_s18 = sshll.u32 %s2782_s2, 4  ;;  %s574_s1 = sshll.u32 %s2783_s29, 4  ;;  %s550_s18 = int_to_ptr.vmem [resolvable:$true] %s549_s18  ;;  %s575_s1 = int_to_ptr.vmem [resolvable:$true] %s574_s1 }
  0x59   : > { %s2482_s23 = scalar_lea.hbm %s3438_s9, 16 }
  0x5a   : > { %p2483_p4 = scmp.ne.s32.totalorder %s3438_s9, %s2482_s23  ;;  %p2489_p11 = scmp.lt.u32.totalorder %s2482_s23, %s3438_s9 }
  0x5c   : > { %p2485_p8 = pnand %p2483_p4, %p2971_p1 }
  0x5e   : > { %p2486_p10 = pneg %p2485_p8 }
  0x60   : > { %p2491_p0 = pnand %p2489_p11, %p2486_p10 }
  0x62   : > { %2494 = shalt.err (!%p2491_p0)
}
  0x63   : > { %s2495_s0 = scalar_lea.vmem %s550_s18, 16  ;;  %s2502_s28 = scalar_lea.vmem %s550_s18, 32 }
  0x64   : > { %p2496_p2 = scmp.ne.s32.totalorder %s550_s18, %s2495_s0  ;;  %p2503_p6 = scmp.lt.s32.totalorder %s550_s18, %s550_s18 }
  0x65   : > { %p2504_p7 = scmp.lt.s32.totalorder %s2502_s28, %s2495_s0 }
  0x66   : > { %p2498_p3 = pnand %p2496_p2, %p2971_p1 }
  0x67   : > { %p2505_p9 = por %p2504_p7, %p2503_p6 }
  0x68   : > { %p2499_p5 = pneg %p2498_p3 }
  0x6a   : > { %p2506_p12 = pnand %p2505_p9, %p2499_p5 }
  0x6c   : > { %2509 = shalt.err (!%p2506_p12)
}
  0x6d   : > { %2293 = dma.hbm_to_vmem [thread:$0]  (!%p2957_p13), %s3438_s9, 16, %s550_s18, [#allocation12]  }
  0x6e   : > { %s2510_s22 = scalar_lea.hbm %s3441_s12, 16 }
  0x6f   : > { %p2511_p4 = scmp.ne.s32.totalorder %s3441_s12, %s2510_s22  ;;  %p2517_p11 = scmp.lt.u32.totalorder %s2510_s22, %s3441_s12 }
  0x71   : > { %p2513_p8 = pnand %p2511_p4, %p2971_p1 }
  0x73   : > { %p2514_p10 = pneg %p2513_p8 }
  0x75   : > { %p2519_p0 = pnand %p2517_p11, %p2514_p10 }
  0x77   : > { %2522 = shalt.err (!%p2519_p0)
}
  0x78   : > { %s2523_s0 = scalar_lea.vmem %s575_s1, 16  ;;  %s2530_s18 = scalar_lea.vmem %s575_s1, 32 }
  0x79   : > { %p2524_p2 = scmp.ne.s32.totalorder %s575_s1, %s2523_s0  ;;  %p2531_p6 = scmp.lt.s32.totalorder %s575_s1, %s575_s1 }
  0x7a   : > { %p2532_p7 = scmp.lt.s32.totalorder %s2530_s18, %s2523_s0 }
  0x7b   : > { %p2526_p3 = pnand %p2524_p2, %p2971_p1 }
  0x7c   : > { %p2533_p9 = por %p2532_p7, %p2531_p6 }
  0x7d   : > { %p2527_p5 = pneg %p2526_p3 }
  0x7f   : > { %p2534_p12 = pnand %p2533_p9, %p2527_p5 }
  0x81   : > { %2537 = shalt.err (!%p2534_p12)
}
  0x82   : > { %2299 = dma.hbm_to_vmem [thread:$0]  (!%p2957_p13), %s3441_s12, 16, %s575_s1, [#allocation15]  }
  0x83   : > { %s2784_s2 = smov [#allocation2]   ;;  %s2785_s29 = smov [#allocation7]  }
  0x84   : > { %s487_s24 = sshll.u32 %s2784_s2, 4  ;;  %s513_s22 = sshll.u32 %s2785_s29, 4  ;;  %s488_s24 = int_to_ptr.vmem [resolvable:$true] %s487_s24  ;;  %s514_s22 = int_to_ptr.vmem [resolvable:$true] %s513_s22 }
  0x85   : > { %s3489_s3 = sld [smem:[#allocation36_spill]] }
  0x8b   : > { %s2538_s17 = scalar_lea.hbm %s3489_s3, 16 }
  0x8c   : > { %p2539_p4 = scmp.ne.s32.totalorder %s3489_s3, %s2538_s17  ;;  %p2545_p11 = scmp.lt.u32.totalorder %s2538_s17, %s3489_s3 }
  0x8e   : > { %p2541_p8 = pnand %p2539_p4, %p2971_p1 }
  0x90   : > { %p2542_p10 = pneg %p2541_p8 }
  0x92   : > { %p2547_p0 = pnand %p2545_p11, %p2542_p10 }
  0x94   : > { %2550 = shalt.err (!%p2547_p0)
}
  0x95   : > { %s2551_s1 = scalar_lea.vmem %s488_s24, 16  ;;  %s2558_s19 = scalar_lea.vmem %s488_s24, 32 }
  0x96   : > { %p2552_p2 = scmp.ne.s32.totalorder %s488_s24, %s2551_s1  ;;  %p2559_p6 = scmp.lt.s32.totalorder %s488_s24, %s488_s24 }
  0x97   : > { %p2560_p7 = scmp.lt.s32.totalorder %s2558_s19, %s2551_s1 }
  0x98   : > { %p2554_p3 = pnand %p2552_p2, %p2971_p1 }
  0x99   : > { %p2561_p9 = por %p2560_p7, %p2559_p6 }
  0x9a   : > { %p2555_p5 = pneg %p2554_p3 }
  0x9c   : > { %p2562_p12 = pnand %p2561_p9, %p2555_p5 }
  0x9e   : > { %2565 = shalt.err (!%p2562_p12)
}
  0x9f   : > { %2278 = dma.hbm_to_vmem [thread:$0]  (!%p2957_p13), %s3489_s3, 16, %s488_s24, [#allocation3]  }
  0xa0   : > { %s2566_s17 = scalar_lea.hbm %s3435_s6, 256 }
  0xa1   : > { %p2567_p4 = scmp.ne.s32.totalorder %s3435_s6, %s2566_s17  ;;  %p2573_p11 = scmp.lt.u32.totalorder %s2566_s17, %s3435_s6 }
  0xa3   : > { %p2569_p8 = pnand %p2567_p4, %p2971_p1 }
  0xa5   : > { %p2570_p10 = pneg %p2569_p8 }
  0xa7   : > { %p2575_p0 = pnand %p2573_p11, %p2570_p10 }
  0xa9   : > { %2578 = shalt.err (!%p2575_p0)
}
  0xaa   : > { %s2579_s1 = scalar_lea.vmem %s514_s22, 256  ;;  %p2587_p6 = scmp.lt.s32.totalorder %s514_s22, %s514_s22 }
  0xab   : > { %p2580_p2 = scmp.ne.s32.totalorder %s514_s22, %s2579_s1  ;;  %p2588_p7 = scmp.lt.s32.totalorder %s2579_s1, %s2579_s1 }
  0xad   : > { %p2582_p3 = pnand %p2580_p2, %p2971_p1  ;;  %p2589_p9 = por %p2588_p7, %p2587_p6 }
  0xaf   : > { %p2583_p5 = pneg %p2582_p3 }
  0xb1   : > { %p2590_p12 = pnand %p2589_p9, %p2583_p5 }
  0xb3   : > { %2593 = shalt.err (!%p2590_p12)
}
  0xb4   : > { %s3490_s24 = smov 4   ;;  %s3491_s19 = smov 64  }
  0xb5   : > { %2284 = dma.hbm_to_vmem [thread:$0]  (!%p2957_p13), %s3435_s6, 256, %s514_s22, [#allocation6], %s3491_s19, %s3491_s19, %s3490_s24  }
  0xb6   : > { %s2786_s25 = smov [#allocation10]   ;;  %s2787_s17 = smov [#allocation13]  }
  0xb7   : > { %s538_s23 = sshll.u32 %s2786_s25, 4  ;;  %s563_s15 = sshll.u32 %s2787_s17, 4  ;;  %s539_s23 = int_to_ptr.vmem [resolvable:$true] %s538_s23  ;;  %s564_s15 = int_to_ptr.vmem [resolvable:$true] %s563_s15 }
  0xb8   : > { %s2594_s28 = scalar_lea.hbm %s3437_s8, 16 }
  0xb9   : > { %p2595_p4 = scmp.ne.s32.totalorder %s3437_s8, %s2594_s28  ;;  %p2601_p11 = scmp.lt.u32.totalorder %s2594_s28, %s3437_s8 }
  0xbb   : > { %p2597_p8 = pnand %p2595_p4, %p2971_p1 }
  0xbd   : > { %p2598_p10 = pneg %p2597_p8 }
  0xbf   : > { %p2603_p0 = pnand %p2601_p11, %p2598_p10 }
  0xc1   : > { %2606 = shalt.err (!%p2603_p0)
}
  0xc2   : > { %s2607_s22 = scalar_lea.vmem %s539_s23, 16  ;;  %s2614_s24 = scalar_lea.vmem %s539_s23, 32 }
  0xc3   : > { %p2608_p2 = scmp.ne.s32.totalorder %s539_s23, %s2607_s22  ;;  %p2615_p6 = scmp.lt.s32.totalorder %s539_s23, %s539_s23 }
  0xc4   : > { %p2616_p7 = scmp.lt.s32.totalorder %s2614_s24, %s2607_s22 }
  0xc5   : > { %p2610_p3 = pnand %p2608_p2, %p2971_p1 }
  0xc6   : > { %p2617_p9 = por %p2616_p7, %p2615_p6 }
  0xc7   : > { %p2611_p5 = pneg %p2610_p3 }
  0xc9   : > { %p2618_p12 = pnand %p2617_p9, %p2611_p5 }
  0xcb   : > { %2621 = shalt.err (!%p2618_p12)
}
  0xcc   : > { %2290 = dma.hbm_to_vmem [thread:$0]  (!%p2957_p13), %s3437_s8, 16, %s539_s23, [#allocation9]  }
  0xcd   : > { %s2622_s25 = scalar_lea.hbm %s3440_s11, 16 }
  0xce   : > { %p2623_p4 = scmp.ne.s32.totalorder %s3440_s11, %s2622_s25  ;;  %p2629_p11 = scmp.lt.u32.totalorder %s2622_s25, %s3440_s11 }
  0xd0   : > { %p2625_p8 = pnand %p2623_p4, %p2971_p1 }
  0xd2   : > { %p2626_p10 = pneg %p2625_p8 }
  0xd4   : > { %p2631_p0 = pnand %p2629_p11, %p2626_p10 }
  0xd6   : > { %2634 = shalt.err (!%p2631_p0)
}
  0xd7   : > { %s2635_s1 = scalar_lea.vmem %s564_s15, 16  ;;  %s2642_s23 = scalar_lea.vmem %s564_s15, 32 }
  0xd8   : > { %p2636_p2 = scmp.ne.s32.totalorder %s564_s15, %s2635_s1  ;;  %p2643_p6 = scmp.lt.s32.totalorder %s564_s15, %s564_s15 }
  0xd9   : > { %p2644_p7 = scmp.lt.s32.totalorder %s2642_s23, %s2635_s1 }
  0xda   : > { %p2638_p3 = pnand %p2636_p2, %p2971_p1 }
  0xdb   : > { %p2645_p9 = por %p2644_p7, %p2643_p6 }
  0xdc   : > { %p2639_p5 = pneg %p2638_p3 }
  0xde   : > { %p2646_p12 = pnand %p2645_p9, %p2639_p5 }
  0xe0   : > { %2649 = shalt.err (!%p2646_p12)
}
  0xe1   : > { %2296 = dma.hbm_to_vmem [thread:$0]  (!%p2957_p13), %s3440_s11, 16, %s564_s15, [#allocation12]  }
  0xe2   : > { %s2788_s24 = smov [#allocation16]   ;;  %s2650_s29 = scalar_lea.hbm %s3442_s13, 16 }
  0xe3   : > { %s585_s3 = sshll.u32 %s2788_s24, 4  ;;  %p2651_p4 = scmp.ne.s32.totalorder %s3442_s13, %s2650_s29  ;;  %s586_s3 = int_to_ptr.vmem [resolvable:$true] %s585_s3 }
  0xe4   : > { %p2657_p11 = scmp.lt.u32.totalorder %s2650_s29, %s3442_s13 }
  0xe5   : > { %p2653_p8 = pnand %p2651_p4, %p2971_p1 }
  0xe7   : > { %p2654_p10 = pneg %p2653_p8 }
  0xe9   : > { %p2659_p0 = pnand %p2657_p11, %p2654_p10 }
  0xeb   : > { %2662 = shalt.err (!%p2659_p0)
}
  0xec   : > { %s2663_s15 = scalar_lea.vmem %s586_s3, 16  ;;  %s2670_s28 = scalar_lea.vmem %s586_s3, 32 }
  0xed   : > { %p2664_p2 = scmp.ne.s32.totalorder %s586_s3, %s2663_s15  ;;  %p2671_p6 = scmp.lt.s32.totalorder %s586_s3, %s586_s3 }
  0xee   : > { %p2672_p7 = scmp.lt.s32.totalorder %s2670_s28, %s2663_s15 }
  0xef   : > { %p2666_p3 = pnand %p2664_p2, %p2971_p1 }
  0xf0   : > { %p2673_p9 = por %p2672_p7, %p2671_p6 }
  0xf1   : > { %p2667_p5 = pneg %p2666_p3 }
  0xf3   : > { %p2674_p12 = pnand %p2673_p9, %p2667_p5 }
  0xf5   : > { %2677 = shalt.err (!%p2674_p12)
}
  0xf6   : > { %2302 = dma.hbm_to_vmem [thread:$0]  (!%p2957_p13), %s3442_s13, 16, %s586_s3, [#allocation15]  }
  0xf7   : > { %p3492_p4 = scmp.ne.s32.totalorder %s3484_s26, 0 }
  0xf8   : > { %p3493_p8 = scmp.ne.s32.totalorder (!%p3492_p4), %s3485_s27, 0 }
  0xf9   : > { %627 = sbr.rel (%p3492_p4) target bundleno = 3970 (0xf82), region = 92 }
 0x100   : > { %2731 = dma.done.wait (%p3493_p8), [#allocation3], 16  }
 0x101   : > { %2733 = vsyncadd (%p3493_p8), [#allocation3], 4294967280 }
 0x102   : > { %2735 = dma.done.wait (%p3493_p8), [#allocation6], 512  }
 0x103   : > { %2737 = vsyncadd (%p3493_p8), [#allocation6], 4294966784 }
 0x104   : > { %2739 = dma.done.wait (%p3493_p8), [#allocation9], 32  }
 0x105   : > { %2741 = vsyncadd (%p3493_p8), [#allocation9], 4294967264 }
 0x106   : > { %2743 = dma.done.wait (%p3493_p8), [#allocation12], 32  }
 0x107   : > { %2745 = vsyncadd (%p3493_p8), [#allocation12], 4294967264 }
 0x108   : > { %2747 = dma.done.wait (%p3493_p8), [#allocation15], 32  }
 0x109   : > { %2749 = vsyncadd (%p3493_p8), [#allocation15], 4294967264  ;;  %p719_p13 = scmp.lt.s32.totalorder %s2768_s30, 1  ;;  %s3494_s22 = sld [smem:[#allocation33_spill]]  ;;  %vm735_vm0 = vcmask 261120   ;;  %v2390_v14 = vld [vmem:[%s3433_s4] sm:$0xff]  }
 0x10a   : > { %s3495_s5 = sld [smem:[#allocation34_spill]]  ;;  %v2392_v15 = vld [vmem:[#allocation7] sm:$0xff]   ;;  %v2789_v16 = vmov 0.0   ;;  %v2391_v17 = vld [vmem:[%s3433_s4 + $0x8] sm:$0xff]   ;;  %vm2790_vm1 = vmmov 0   ;;  %v2394_v18 = vld [vmem:[#allocation7 + $0x8] sm:$0xff]  }
 0x10b   : > { %s720_s21 = scalar_select %p719_p13, %s2768_s30, 1  ;;  %2121 = vmatprep.subr.bf16.mxu1 %v2789_v16  ;;  %2137 = vmatprep.subr.bf16.mxu0 %v2789_v16  ;;  %v2038_v28 = vld [vmem:[#allocation2] ss:$0 sm:$0xff]  ;;  %v2393_v33 = vld [vmem:[#allocation5] sm:$0xff]   ;;  %v2395_v37 = vld [vmem:[#allocation5 + $0x8] sm:$0xff]   ;;  %vm1051_vm2 = vcmask 1043456  }
 0x10c   : > { %2122 = vmatpush3.bf16.msra.mxu1 %v2390_v14  ;;  %2138 = vmatpush3.bf16.msra.mxu0 %v2392_v15  ;;  %s3496_s28 = sld [smem:[#allocation35_spill]]  ;;  %v2039_v39 = vld [vmem:[#allocation8] ss:$0 sm:$0xff]  ;;  %v2047_v44 = vld [vmem:[#allocation11] ss:$0 sm:$0xff]  ;;  %s2791_s1 = smov 120  }
 0x10d   : > { %s2035_s26 = sshll.u32 %s720_s21, 3  ;;  %2123 = vmatprep.subr.bf16.mxu1 %v2789_v16  ;;  %2125 = vmatprep.mubr.msk.bf16.mxu1 %vm2790_vm1, %v2789_v16  ;;  %v2043_v52 = vld [vmem:[#allocation10] ss:$0 sm:$0xff]  ;;  %vm988_vm3 = vcmask 64512   ;;  %s2792_s23 = smov 112   ;;  %vm1779_vm5 = vcmask 523264  }
 0x10e   : > { %2139 = vmatprep.subr.bf16.mxu0 %v2789_v16  ;;  %2141 = vmatprep.mubr.msk.bf16.mxu0 %vm2790_vm1, %v2789_v16  ;;  %s3499_s27 = sld [smem:[#allocation39_spill]]  ;;  %s3500_s25 = sld [smem:[#allocation30_spill]] }
 0x10f   : > { %s725_s24 = scalar_lea.vmem %s3494_s22, %s2035_s26  ;;  %s2793_s22 = smov 104  }
 0x110   : > { %s729_s29 = scalar_lea.vmem %s3495_s5, %s2035_s26  ;;  %v3173_v0 = vld [vmem:[%s725_s24] sm:$0xff]  ;;  %2124 = vmatpush3.bf16.msra.mxu1 %v2391_v17  ;;  %2140 = vmatpush3.bf16.msra.mxu0 %v2394_v18  ;;  %s3498_s24 = sld [smem:[#allocation25_spill]] }
 0x111   : > { %v732_v1 = vld [vmem:[%s729_s29] sm:$0xff]  ;;  %v765_v2 = vsel %vm735_vm0, %v3173_v0, 0.0  ;;  %2129 = vmatprep.subr.bf16.mxu1 %v2789_v16  ;;  %2151 = vmatprep.subr.bf16.mxu0 %v2789_v16  ;;  %s2077_s17 = sshll.u32 %s2768_s30, 7  ;;  %s2794_s26 = smov [#allocation17]  }
 0x112   : > { %v736_v3 = vsel %vm735_vm0, %v732_v1, 0.0  ;;  %766 = vadd.xlane.f32.xlu0 %v765_v2  ;;  %v2037_v26 = vld [vmem:[%s3496_s28] ss:$0 sm:$0xff]  ;;  %s2682_s20 = sshll.u32 %s2794_s26, 4  ;;  %s2683_s20 = int_to_ptr.vmem [resolvable:$false] %s2682_s20 }
 0x113   : > { %s2684_s2 = scalar_lea.vmem %s2683_s20, 256 }
 0x114   : > { %p3502_p10 = scmp.ne.s32.totalorder %s3500_s25, 0 }
 0x116   : > { %737 = vadd.xlane.f32.xlu0 %v736_v3  ;;  %v980_v3 = vlaneseq  ;;  %s716_s3 = sand.u32 1, %s3498_s24  }
 0x117   : > { %s2034_s19 = sshll.u32 %s716_s3, 3  ;;  %s1826_s30 = scalar_lea.sflag [#allocation4], %s716_s3 }
 0x118   : > { %s718_s0 = scalar_lea.vmem [#allocation17], %s2034_s19 }
 0x119   : > { %s1840_s18 = sshll.u32 %s718_s0, 4  ;;  %s3383_s18 = int_to_ptr.vmem [resolvable:$true] %s1840_s18 }
 0x11a   : > { %s2678_s21 = scalar_lea.vmem %s3383_s18, 128  ;;  %p2685_p2 = scmp.lt.s32.totalorder %s3383_s18, %s2683_s20 }
 0x11b   : > { %p2679_p1 = scmp.ne.s32.totalorder %s3383_s18, %s2678_s21  ;;  %p2686_p3 = scmp.lt.s32.totalorder %s2684_s2, %s2678_s21 }
 0x11d   : > { %p2680_p11 = pnand %p2679_p1, %p3502_p10  ;;  %p2687_p5 = por %p2686_p3, %p2685_p2 }
 0x11f   : > { %p2681_p0 = pneg %p2680_p11 }
 0x121   : > { %p2688_p6 = pnand %p2687_p5, %p2681_p0 }
 0x19f   : > { %v767_v4 = vpop.xlane.xlu0 %766 }
 0x1a0   : > { %v768_v5 = vmul.f32 0.03125, %v767_v4  ;;  %v3236_v4 = vshrl.u32 %v980_v3, 7 }
 0x1a2   : > { %v769_v6 = vsub.f32 %v3173_v0, %v768_v5  ;;  %v3238_v5 = vand.u32 127, %v980_v3 }
 0x1a3   : > { %v738_v7 = vpop.xlane.xlu0 %737 }
 0x1a4   : > { %v740_v8 = vmul.f32 0.03125, %v738_v7  ;;  %v770_v9 = vmul.f32 %v769_v6, %v769_v6  ;;  %vm987_vm4 = vcmp.le.s32.totalorder %v3238_v5, %v3236_v4 }
 0x1a6   : > { %v741_v10 = vsub.f32 %v732_v1, %v740_v8  ;;  %v771_v11 = vsel %vm735_vm0, %v770_v9, 0.0 }
 0x1a7   : > { %772 = vadd.xlane.f32.xlu1 %v771_v11 }
 0x1a8   : > { %v742_v12 = vmul.f32 %v741_v10, %v741_v10 }
 0x1aa   : > { %v743_v13 = vsel %vm735_vm0, %v742_v12, 0.0 }
 0x1ab   : > { %744 = vadd.xlane.f32.xlu1 %v743_v13 }
 0x234   : > { %v773_v19 = vpop.xlane.xlu1 %772 }
 0x235   : > { %v774_v20 = vmul.f32 0.03125, %v773_v19 }
 0x237   : > { %v775_v21 = vadd.f32 1e-05, %v774_v20 }
 0x238   : > { %v745_v22 = vpop.xlane.xlu1 %744 }
 0x239   : > { %2402 = vrsqrt.f32 %v775_v21  ;;  %v746_v23 = vmul.f32 0.03125, %v745_v22 }
 0x23b   : > { %v747_v24 = vadd.f32 1e-05, %v746_v23 }
 0x23d   : > { %2404 = vrsqrt.f32 %v747_v24 }
 0x243   : > { %v2403_v25 = vpop.eup %2402 }
 0x244   : > { %v777_v27 = vmul.f32 %v2403_v25, %v769_v6 }
 0x246   : > { %v778_v29 = vmul.f32 %v2037_v26, %v777_v27 }
 0x247   : > { %v2405_v30 = vpop.eup %2404 }
 0x248   : > { %v779_v31 = vadd.f32 %v2038_v28, %v778_v29  ;;  %v749_v32 = vmul.f32 %v2405_v30, %v741_v10 }
 0x24a   : > { %v780_v34 = vpack.c.bf16 %v779_v31, %v779_v31  ;;  %v756_v35 = vmul.f32 %v2037_v26, %v749_v32 }
 0x24c   : > { %2126 = vmatmul.mubr.msk.bf16.vlgmr.msra.gmra.mrb[0].mxu1 %vm735_vm0, %v780_v34  ;;  %v763_v36 = vadd.f32 %v2038_v28, %v756_v35  ;;  %v1212_v35 = vld [vmem:[%s3439_s10 + $0x4] sm:$0xf] }
 0x24d   : > { %2130 = vmatpush3.bf16.msra.mxu1 %v2393_v33  ;;  %2133 = vmatprep.mubr.msk.bf16.mxu1 %vm2790_vm1, %v2789_v16 }
 0x24e   : > { %2131 = vmatprep.subr.bf16.mxu1 %v2789_v16  ;;  %v764_v38 = vpack.c.bf16 %v763_v36, %v763_v36  ;;  %v1217_v36 = vsel %vm1051_vm2, %v1212_v35, 0 }
 0x250   : > { %2142 = vmatmul.mubr.msk.bf16.vlgmr.msra.gmra.mrb[0].mxu0 %vm735_vm0, %v764_v38 }
 0x251   : > { %2132 = vmatpush3.bf16.msra.mxu1 %v2395_v37  ;;  %2153 = vmatprep.mubr.msk.bf16.mxu0 %vm2790_vm1, %v2789_v16 }
 0x252   : > { %2145 = vmatprep.subr.bf16.mxu1 %v2789_v16 }
 0x254   : > { %2134 = vmatmul.mubr.msk.bf16.vlgmr.msra.gmra.mrb[4].mxu1 %vm735_vm0, %v764_v38 }
 0x255   : > { %2147 = vmatprep.mubr.msk.bf16.mxu1 %vm2790_vm1, %v2789_v16 }
 0x31f   : > { %v841_v40 = vpop.f32.mrb[0].mxu1 }
 0x320   : > { %v842_v41 = vadd.f32 %v2039_v39, %v841_v40  ;;  %v2127_v42 = vpop.f32.mrb[1].mxu1  ;;  %v1096_v39 = vld [vmem:[%s3439_s10] sm:$0xf] }
 0x321   : > { %v844_v43 = vpop.f32.mrb[2].mxu1  ;;  %v1263_v42 = vsel %vm1051_vm2, %v1096_v39, 0 }
 0x322   : > { %v976_v45 = vmul.f32 0.35355338, %v842_v41  ;;  %v2128_v46 = vpop.f32.mrb[3].mxu1 }
 0x323   : > { %v970_v47 = vpop.f32.mrb[0].mxu0 }
 0x324   : > { %v3211_v48 = vpack.c.bf16 %v976_v45, %v976_v45  ;;  %v971_v49 = vadd.f32 %v2047_v44, %v970_v47  ;;  %v2143_v50 = vpop.f32.mrb[1].mxu0 }
 0x325   : > { %v973_v51 = vpop.f32.mrb[2].mxu0 }
 0x326   : > { %v3213_v53 = vpack.c.bf16 %v971_v49, %v971_v49  ;;  %1098 = vrot.lane.b32.xlu1 %v3211_v48, %s2791_s1  ;;  %v2144_v54 = vpop.f32.mrb[3].mxu0 }
 0x327   : > { %v907_v55 = vpop.f32.mrb[4].mxu1 }
 0x328   : > { %v908_v56 = vadd.f32 %v2043_v52, %v907_v55  ;;  %v2135_v57 = vpop.f32.mrb[5].mxu1  ;;  %v1053_v58 = vsel %vm1051_vm2, %v3213_v53, 0 }
 0x329   : > { %v910_v59 = vpop.f32.mrb[6].mxu1  ;;  %2152 = vmatpush3.bf16.msra.mxu0 %v1053_v58 }
 0x32a   : > { %v3219_v60 = vpack.c.bf16 %v908_v56, %v908_v56  ;;  %v2136_v61 = vpop.f32.mrb[7].mxu1  ;;  %2163 = vmatprep.subr.bf16.mxu0 %v2789_v16 }
 0x32c   : > { %1101 = vrot.lane.b32.xlu0 %v3219_v60, %s2791_s1  ;;  %v993_v62 = vsel %vm988_vm3, %v3219_v60, 0 }
 0x32d   : > { %2146 = vmatpush3.bf16.xpose.msra.mxu1 %v993_v62 }
 0x32e   : > { %2157 = vmatprep.subr.bf16.mxu1 %v2789_v16 }
 0x334   : > { %2148 = vmatmul.mubr.msk.bf16.vlgmr.msra.gmra.mrb[8].mxu1 %vm988_vm3, %v3211_v48 }
 0x335   : > { %2159 = vmatprep.mubr.msk.bf16.mxu1 %vm2790_vm1, %v2789_v16 }
 0x398   : > { %v1099_v2 = vpop.permute.xlu1 %1098 }
 0x39e   : > { %v1102_v63 = vpop.permute.xlu0 %1101 }
 0x39f   : > { %v1107_v1 = vsel %vm988_vm3, %v1102_v63, 0 }
 0x3a0   : > { %2158 = vmatpush3.bf16.xpose.msra.mxu1 %v1107_v1 }
 0x3a1   : > { %2169 = vmatprep.subr.bf16.mxu1 %v2789_v16 }
 0x3a7   : > { %2160 = vmatmul.mubr.msk.bf16.vlgmr.msra.gmra.mrb[12].mxu1 %vm988_vm3, %v1099_v2 }
 0x3a8   : > { %2171 = vmatprep.mubr.msk.bf16.mxu1 %vm2790_vm1, %v2789_v16  ;;  %2170 = vmatpush3.bf16.msra.mxu1 %v1217_v36 }
 0x3a9   : > { %2181 = vmatprep.subr.bf16.mxu1 %v2789_v16 }
 0x407   : > { %v1029_v6 = vpop.f32.mrb[8].mxu1 }
 0x408   : > { %v1035_v7 = vsel %vm987_vm4, %v1029_v6, -1e+30  ;;  %v2149_v8 = vpop.f32.mrb[9].mxu1 }
 0x409   : > { %v1032_v9 = vpop.f32.mrb[10].mxu1  ;;  %v1036_v10 = vsel %vm988_vm3, %v1035_v7, -inf }
 0x40a   : > { %1037 = vmax.xlane.f32.xlu1 %v1036_v10  ;;  %v2150_v11 = vpop.f32.mrb[11].mxu1 }
 0x47a   : > { %v1143_v12 = vpop.f32.mrb[12].mxu1 }
 0x47b   : > { %v1149_v13 = vsel %vm987_vm4, %v1143_v12, -1e+30  ;;  %v2161_v14 = vpop.f32.mrb[13].mxu1 }
 0x47c   : > { %v1146_v15 = vpop.f32.mrb[14].mxu1  ;;  %v1150_v17 = vsel %vm988_vm3, %v1149_v13, -inf }
 0x47d   : > { %1151 = vmax.xlane.f32.xlu0 %v1150_v17  ;;  %v2162_v18 = vpop.f32.mrb[15].mxu1 }
 0x497   : > { %v1038_v19 = vpop.xlane.xlu1 %1037 }
 0x498   : > { %v1039_v20 = vsub.f32 %v1035_v7, %v1038_v19 }
 0x49a   : > { %v1040_v21 = vmul.f32 1.442695, %v1039_v20 }
 0x49c   : > { %2406 = vpow2.f32 %v1040_v21 }
 0x4a6   : > { %v2407_v22 = vpop.eup %2406 }
 0x4a7   : > { %v1042_v23 = vsel %vm988_vm3, %v2407_v22, 0.0 }
 0x4a8   : > { %1043 = vadd.xlane.f32.xlu0 %v1042_v23 }
 0x4be   : > { %1163 = vrot.lane.b32.xlu0 %v3213_v53, %s2791_s1  ;;  %s3501_s1 = sld [smem:[#allocation40_spill]] }
 0x50a   : > { %v1152_v24 = vpop.xlane.xlu0 %1151 }
 0x50b   : > { %v1153_v25 = vsub.f32 %v1149_v13, %v1152_v24 }
 0x50d   : > { %v1154_v26 = vmul.f32 1.442695, %v1153_v25 }
 0x50f   : > { %2408 = vpow2.f32 %v1154_v26  ;;  %v1417_v26 = vld [vmem:[%s3439_s10 + $0x8] sm:$0xf] }
 0x519   : > { %v2409_v27 = vpop.eup %2408 }
 0x51a   : > { %v1156_v28 = vsel %vm988_vm3, %v2409_v27, 0.0 }
 0x51b   : > { %1157 = vadd.xlane.f32.xlu1 %v1156_v28 }
 0x52c   : > { %1307 = vrot.lane.b32.xlu1 %v3219_v60, %s2792_s23 }
 0x530   : > { %1305 = vrot.lane.b32.xlu1 %v3211_v48, %s2792_s23 }
 0x535   : > { %v1044_v29 = vpop.xlane.xlu0 %1043 }
 0x536   : > { %2410 = vrcp.f32 %v1044_v29 }
 0x539   : > { %v1164_v32 = vpop.permute.xlu0 %1163 }
 0x53a   : > { %v1169_v34 = vsel %vm1051_vm2, %v1164_v32, 0 }
 0x540   : > { %v2411_v30 = vpop.eup %2410 }
 0x541   : > { %v1046_v31 = vmul.f32 %v2411_v30, %v2407_v22 }
 0x543   : > { %v1047_v33 = vpack.c.bf16 %v1046_v31, %v1046_v31 }
 0x545   : > { %2154 = vmatmul.mubr.msk.bf16.vlgmr.msra.gmra.mrb[4].mxu0 %vm988_vm3, %v1047_v33 }
 0x546   : > { %2164 = vmatpush3.bf16.msra.mxu0 %v1169_v34  ;;  %2165 = vmatprep.mubr.msk.bf16.mxu0 %vm2790_vm1, %v2789_v16 }
 0x547   : > { %2175 = vmatprep.subr.bf16.mxu0 %v2789_v16 }
 0x5a8   : > { %v1158_v37 = vpop.xlane.xlu1 %1157 }
 0x5a9   : > { %2412 = vrcp.f32 %v1158_v37 }
 0x5ac   : > { %v1308_v49 = vpop.permute.xlu1 %1307 }
 0x5ad   : > { %v1313_v55 = vsel %vm988_vm3, %v1308_v49, 0 }
 0x5b0   : > { %v1306_v57 = vpop.permute.xlu1 %1305 }
 0x5b3   : > { %v2413_v38 = vpop.eup %2412 }
 0x5b4   : > { %v1160_v40 = vmul.f32 %v2413_v38, %v2409_v27  ;;  %v1422_v27 = vsel %vm1051_vm2, %v1417_v26, 0  ;;  %v2399_v26 = vld [vmem:[%s3445_s16 + $0x8] sm:$0xff]  }
 0x5b6   : > { %v1161_v41 = vpack.c.bf16 %v1160_v40, %v1160_v40 }
 0x5b8   : > { %2166 = vmatmul.mubr.msk.bf16.vlgmr.msra.gmra.mrb[8].mxu0 %vm988_vm3, %v1161_v41 }
 0x5b9   : > { %2176 = vmatpush3.bf16.msra.mxu0 %v1263_v42  ;;  %2177 = vmatprep.mubr.msk.bf16.mxu0 %vm2790_vm1, %v2789_v16 }
 0x5ba   : > { %2187 = vmatprep.subr.bf16.mxu0 %v2789_v16 }
 0x618   : > { %v1089_v43 = vpop.f32.mrb[4].mxu0 }
 0x619   : > { %v1095_v44 = vpack.c.bf16 %v1089_v43, %v1089_v43  ;;  %v2155_v45 = vpop.f32.mrb[5].mxu0 }
 0x61a   : > { %v1092_v46 = vpop.f32.mrb[6].mxu0 }
 0x61b   : > { %v2156_v47 = vpop.f32.mrb[7].mxu0  ;;  %2178 = vmatmul.mubr.msk.bf16.vlgmr.msra.gmra.mrb[12].mxu0 %vm988_vm3, %v1095_v44  ;;  %v1577_v44 = vld [vmem:[%s3439_s10 + $0xc] sm:$0xf] }
 0x61c   : > { %2189 = vmatprep.mubr.msk.bf16.mxu0 %vm2790_vm1, %v2789_v16 }
 0x68b   : > { %v1205_v50 = vpop.f32.mrb[8].mxu0 }
 0x68c   : > { %v1211_v51 = vpack.c.bf16 %v1205_v50, %v1205_v50  ;;  %v2167_v52 = vpop.f32.mrb[9].mxu0 }
 0x68d   : > { %v1208_v54 = vpop.f32.mrb[10].mxu0 }
 0x68e   : > { %v2168_v56 = vpop.f32.mrb[11].mxu0  ;;  %2172 = vmatmul.mubr.msk.bf16.vlgmr.msra.gmra.mrb[16].mxu1 %vm988_vm3, %v1211_v51 }
 0x68f   : > { %2182 = vmatpush3.bf16.xpose.msra.mxu1 %v1313_v55  ;;  %2183 = vmatprep.mubr.msk.bf16.mxu1 %vm2790_vm1, %v2789_v16 }
 0x690   : > { %2193 = vmatprep.subr.bf16.mxu1 %v2789_v16 }
 0x696   : > { %2184 = vmatmul.mubr.msk.bf16.vlgmr.msra.gmra.mrb[20].mxu1 %vm988_vm3, %v1306_v57 }
 0x697   : > { %2195 = vmatprep.mubr.msk.bf16.mxu1 %vm2790_vm1, %v2789_v16  ;;  %2194 = vmatpush3.bf16.msra.mxu1 %v1422_v27  ;;  %v2400_v27 = vld [vmem:[%s3445_s16 + $0x10] sm:$0xff]  }
 0x698   : > { %2205 = vmatprep.subr.bf16.mxu1 %v2789_v16 }
 0x6ee   : > { %v1299_v58 = vpop.f32.mrb[12].mxu0 }
 0x6ef   : > { %v2179_v59 = vpop.f32.mrb[13].mxu0 }
 0x6f0   : > { %v1302_v61 = vpop.f32.mrb[14].mxu0 }
 0x6f1   : > { %v2180_v62 = vpop.f32.mrb[15].mxu0 }
 0x761   : > { %v1253_v63 = vpop.f32.mrb[16].mxu1 }
 0x762   : > { %v3287_v1 = vadd.f32 %v1299_v58, %v1253_v63  ;;  %v2173_v2 = vpop.f32.mrb[17].mxu1  ;;  %v2063_v63 = vld [vmem:[#allocation13] ss:$0 sm:$0xff] }
 0x763   : > { %v1256_v3 = vpop.f32.mrb[18].mxu1 }
 0x764   : > { %v2174_v6 = vpop.f32.mrb[19].mxu1 }
 0x769   : > { %v1349_v7 = vpop.f32.mrb[20].mxu1 }
 0x76a   : > { %v1355_v8 = vsel %vm987_vm4, %v1349_v7, -1e+30  ;;  %v2185_v9 = vpop.f32.mrb[21].mxu1 }
 0x76b   : > { %v1352_v10 = vpop.f32.mrb[22].mxu1  ;;  %v1356_v11 = vsel %vm988_vm3, %v1355_v8, -inf }
 0x76c   : > { %1357 = vmax.xlane.f32.xlu1 %v1356_v11  ;;  %v2186_v12 = vpop.f32.mrb[23].mxu1 }
 0x77d   : > { %1467 = vrot.lane.b32.xlu1 %v3219_v60, %s2793_s22 }
 0x781   : > { %1465 = vrot.lane.b32.xlu1 %v3211_v48, %s2793_s22 }
 0x7f9   : > { %v1358_v13 = vpop.xlane.xlu1 %1357 }
 0x7fa   : > { %v1359_v14 = vsub.f32 %v1355_v8, %v1358_v13 }
 0x7fc   : > { %v1360_v15 = vmul.f32 1.442695, %v1359_v14 }
 0x7fd   : > { %v1468_v22 = vpop.permute.xlu1 %1467 }
 0x7fe   : > { %2414 = vpow2.f32 %v1360_v15  ;;  %v1473_v24 = vsel %vm988_vm3, %v1468_v22, 0  ;;  %v2396_v15 = vld [vmem:[%s3443_s14] sm:$0xff]  }
 0x801   : > { %v1466_v25 = vpop.permute.xlu1 %1465 }
 0x808   : > { %v2415_v17 = vpop.eup %2414 }
 0x809   : > { %v1362_v18 = vsel %vm988_vm3, %v2415_v17, 0.0 }
 0x80a   : > { %1363 = vadd.xlane.f32.xlu0 %v1362_v18 }
 0x820   : > { %1368 = vrot.lane.b32.xlu0 %v3213_v53, %s2792_s23  ;;  %s3381_s23 = scalar_lea.hbm %s3501_s1, %s2077_s17 }
 0x897   : > { %v1364_v19 = vpop.xlane.xlu0 %1363 }
 0x898   : > { %2416 = vrcp.f32 %v1364_v19 }
 0x89b   : > { %v1369_v20 = vpop.permute.xlu0 %1368 }
 0x89c   : > { %v1374_v21 = vsel %vm1051_vm2, %v1369_v20, 0 }
 0x89d   : > { %2188 = vmatpush3.bf16.msra.mxu0 %v1374_v21  ;;  %v2064_v21 = vld [vmem:[#allocation14] ss:$0 sm:$0xff] }
 0x89e   : > { %2199 = vmatprep.subr.bf16.mxu0 %v2789_v16 }
 0x8a2   : > { %v2417_v48 = vpop.eup %2416 }
 0x8a3   : > { %v1366_v60 = vmul.f32 %v2417_v48, %v2415_v17 }
 0x8a5   : > { %v1367_v23 = vpack.c.bf16 %v1366_v60, %v1366_v60  ;;  %v2065_v60 = vld [vmem:[#allocation16] ss:$0 sm:$0xff] }
 0x8a7   : > { %2190 = vmatmul.mubr.msk.bf16.vlgmr.msra.gmra.mrb[16].mxu0 %vm988_vm3, %v1367_v23 }
 0x8a8   : > { %2200 = vmatpush3.bf16.xpose.msra.mxu0 %v1473_v24  ;;  %2201 = vmatprep.mubr.msk.bf16.mxu0 %vm2790_vm1, %v2789_v16 }
 0x8a9   : > { %2211 = vmatprep.subr.bf16.mxu0 %v2789_v16 }
 0x8af   : > { %2202 = vmatmul.mubr.msk.bf16.vlgmr.msra.gmra.mrb[20].mxu0 %vm988_vm3, %v1466_v25  ;;  %v2398_v25 = vld [vmem:[%s3445_s16] sm:$0xff]  }
 0x8b0   : > { %2213 = vmatprep.mubr.msk.bf16.mxu0 %vm2790_vm1, %v2789_v16 }
 0x97a   : > { %v1410_v28 = vpop.f32.mrb[16].mxu0 }
 0x97b   : > { %v1416_v29 = vpack.c.bf16 %v1410_v28, %v1410_v28  ;;  %v2191_v30 = vpop.f32.mrb[17].mxu0  ;;  %v2401_v28 = vld [vmem:[%s3445_s16 + $0x18] sm:$0xff]  }
 0x97c   : > { %v1413_v31 = vpop.f32.mrb[18].mxu0 }
 0x97d   : > { %v2192_v32 = vpop.f32.mrb[19].mxu0  ;;  %2196 = vmatmul.mubr.msk.bf16.vlgmr.msra.gmra.mrb[24].mxu1 %vm988_vm3, %v1416_v29 }
 0x97e   : > { %2207 = vmatprep.mubr.msk.bf16.mxu1 %vm2790_vm1, %v2789_v16 }
 0x982   : > { %v1509_v33 = vpop.f32.mrb[20].mxu0 }
 0x983   : > { %v1515_v34 = vsel %vm987_vm4, %v1509_v33, -1e+30  ;;  %v2203_v35 = vpop.f32.mrb[21].mxu0 }
 0x984   : > { %v1512_v36 = vpop.f32.mrb[22].mxu0  ;;  %v1516_v37 = vsel %vm988_vm3, %v1515_v34, -inf }
 0x985   : > { %1517 = vmax.xlane.f32.xlu0 %v1516_v37  ;;  %v2204_v38 = vpop.f32.mrb[23].mxu0 }
 0x99b   : > { %1528 = vrot.lane.b32.xlu0 %v3213_v53, %s2793_s22  ;;  %v1582_v53 = vsel %vm1051_vm2, %v1577_v44, 0  ;;  %s3497_s22 = sld [smem:[#allocation38_spill]] }
 0x99c   : > { %2212 = vmatpush3.bf16.msra.mxu0 %v1582_v53 }
 0x99d   : > { %2225 = vmatprep.subr.bf16.mxu0 %v2789_v16 }
 0x9a1   : > { %v2066_v29 = vld [vmem:[%s3497_s22] ss:$0 sm:$0xff] }
 0xa12   : > { %v1518_v39 = vpop.xlane.xlu0 %1517 }
 0xa13   : > { %v1519_v40 = vsub.f32 %v1515_v34, %v1518_v39 }
 0xa15   : > { %v1520_v41 = vmul.f32 1.442695, %v1519_v40 }
 0xa16   : > { %v1529_v42 = vpop.permute.xlu0 %1528 }
 0xa17   : > { %2418 = vpow2.f32 %v1520_v41  ;;  %v1534_v43 = vsel %vm1051_vm2, %v1529_v42, 0 }
 0xa18   : > { %2206 = vmatpush3.bf16.msra.mxu1 %v1534_v43 }
 0xa19   : > { %2217 = vmatprep.subr.bf16.mxu1 %v2789_v16 }
 0xa21   : > { %v2419_v4 = vpop.eup %2418 }
 0xa22   : > { %v1522_v5 = vsel %vm988_vm3, %v2419_v4, 0.0 }
 0xa23   : > { %1523 = vadd.xlane.f32.xlu1 %v1522_v5 }
 0xa50   : > { %v1458_v45 = vpop.f32.mrb[24].mxu1 }
 0xa51   : > { %v1464_v46 = vadd.f32 %v1458_v45, %v3287_v1  ;;  %v2197_v47 = vpop.f32.mrb[25].mxu1 }
 0xa52   : > { %v1461_v49 = vpop.f32.mrb[26].mxu1 }
 0xa53   : > { %v2198_v50 = vpop.f32.mrb[27].mxu1 }
 0xab0   : > { %v1524_v51 = vpop.xlane.xlu1 %1523 }
 0xab1   : > { %2420 = vrcp.f32 %v1524_v51 }
 0xabb   : > { %v2421_v52 = vpop.eup %2420 }
 0xabc   : > { %v1526_v54 = vmul.f32 %v2421_v52, %v2419_v4  ;;  %v2070_v4 = vld [vmem:[%s3499_s27] ss:$0 sm:$0xff] }
 0xabe   : > { %v1527_v55 = vpack.c.bf16 %v1526_v54, %v1526_v54 }
 0xac0   : > { %2208 = vmatmul.mubr.msk.bf16.vlgmr.msra.gmra.mrb[28].mxu1 %vm988_vm3, %v1527_v55 }
 0xac1   : > { %2221 = vmatprep.mubr.msk.bf16.mxu1 %vm2790_vm1, %v2789_v16  ;;  %2218 = vmatpush3.bf16.msra.mxu1 %v2396_v15 }
 0xac2   : > { %2219 = vmatprep.subr.bf16.mxu1 %v2789_v16 }
 0xb93   : > { %v1570_v56 = vpop.f32.mrb[28].mxu1 }
 0xb94   : > { %v1576_v57 = vpack.c.bf16 %v1570_v56, %v1570_v56  ;;  %v2209_v58 = vpop.f32.mrb[29].mxu1 }
 0xb95   : > { %v1573_v59 = vpop.f32.mrb[30].mxu1 }
 0xb96   : > { %v2210_v61 = vpop.f32.mrb[31].mxu1  ;;  %2214 = vmatmul.mubr.msk.bf16.vlgmr.msra.gmra.mrb[24].mxu0 %vm988_vm3, %v1576_v57 }
 0xb97   : > { %2233 = vmatprep.mubr.msk.bf16.mxu0 %vm2790_vm1, %v2789_v16  ;;  %2226 = vmatpush3.bf16.msra.mxu0 %v2398_v25 }
 0xb98   : > { %2227 = vmatprep.subr.bf16.mxu0 %v2789_v16 }
 0xb9b   : > { %2228 = vmatpush3.bf16.msra.mxu0 %v2399_v26 }
 0xb9c   : > { %2229 = vmatprep.subr.bf16.mxu0 %v2789_v16 }
 0xb9f   : > { %2230 = vmatpush3.bf16.msra.mxu0 %v2400_v27 }
 0xba0   : > { %2231 = vmatprep.subr.bf16.mxu0 %v2789_v16 }
 0xba3   : > { %2232 = vmatpush3.bf16.msra.mxu0 %v2401_v28 }
 0xc69   : > { %v1618_v62 = vpop.f32.mrb[24].mxu0 }
 0xc6a   : > { %v1624_v1 = vadd.f32 %v1618_v62, %v1464_v46  ;;  %v2215_v2 = vpop.f32.mrb[25].mxu0 }
 0xc6b   : > { %v1621_v3 = vpop.f32.mrb[26].mxu0 }
 0xc6c   : > { %v1632_v6 = vadd.f32 %v2063_v63, %v1624_v1  ;;  %v2216_v7 = vpop.f32.mrb[27].mxu0 }
 0xc6e   : > { %v3340_v8 = vadd.f32 %v1632_v6, %v3173_v0  ;;  %v2397_v0 = vld [vmem:[%s3443_s14 + $0x8] sm:$0xff]  }
 0xc6f   : > { %2220 = vmatpush3.bf16.msra.mxu1 %v2397_v0 }
 0xc70   : > { %v1636_v9 = vsel %vm735_vm0, %v3340_v8, 0.0 }
 0xc71   : > { %1637 = vadd.xlane.f32.xlu1 %v1636_v9 }
 0xcfe   : > { %v1638_v10 = vpop.xlane.xlu1 %1637 }
 0xcff   : > { %v1639_v11 = vmul.f32 0.03125, %v1638_v10 }
 0xd01   : > { %v1640_v12 = vsub.f32 %v3340_v8, %v1639_v11 }
 0xd03   : > { %v1641_v13 = vmul.f32 %v1640_v12, %v1640_v12 }
 0xd05   : > { %v1642_v14 = vsel %vm735_vm0, %v1641_v13, 0.0 }
 0xd06   : > { %1643 = vadd.xlane.f32.xlu1 %v1642_v14 }
 0xd93   : > { %v1644_v17 = vpop.xlane.xlu1 %1643 }
 0xd94   : > { %v1645_v18 = vmul.f32 0.03125, %v1644_v17 }
 0xd96   : > { %v1646_v19 = vadd.f32 1e-05, %v1645_v18 }
 0xd98   : > { %2422 = vrsqrt.f32 %v1646_v19 }
 0xda2   : > { %v2423_v20 = vpop.eup %2422 }
 0xda3   : > { %v1648_v48 = vmul.f32 %v2423_v20, %v1640_v12 }
 0xda5   : > { %v1655_v22 = vmul.f32 %v2064_v21, %v1648_v48 }
 0xda7   : > { %v1662_v23 = vadd.f32 %v2065_v60, %v1655_v22 }
 0xda9   : > { %v1663_v24 = vpack.c.bf16 %v1662_v23, %v1662_v23 }
 0xdab   : > { %2222 = vmatmul.mubr.msk.bf16.vlgmr.msra.gmra.mrb[32].mxu1 %vm735_vm0, %v1663_v24 }
 0xe7e   : > { %v1724_v30 = vpop.f32.mrb[32].mxu1 }
 0xe7f   : > { %v1725_v31 = vadd.f32 %v2066_v29, %v1724_v30  ;;  %v2223_v32 = vpop.f32.mrb[33].mxu1 }
 0xe80   : > { %v1727_v33 = vpop.f32.mrb[34].mxu1 }
 0xe81   : > { %v1731_v34 = vmul.f32 0.044715, %v1725_v31  ;;  %v2224_v35 = vpop.f32.mrb[35].mxu1  ;;  %v1730_v16 = vmul.f32 0.5, %v1725_v31 }
 0xe83   : > { %v1732_v36 = vmul.f32 %v1731_v34, %v1725_v31 }
 0xe85   : > { %v1733_v37 = vmul.f32 %v1732_v36, %v1725_v31 }
 0xe87   : > { %v1734_v38 = vadd.f32 %v1733_v37, %v1725_v31 }
 0xe89   : > { %v1735_v39 = vmul.f32 0.7978846, %v1734_v38 }
 0xe8b   : > { %2424 = vtanh.f32 %v1735_v39 }
 0xe95   : > { %v2425_v40 = vpop.eup %2424 }
 0xe96   : > { %v1737_v41 = vadd.f32 1.0, %v2425_v40 }
 0xe98   : > { %v1738_v42 = vmul.f32 %v1737_v41, %v1730_v16 }
 0xe9a   : > { %v1739_v43 = vpack.c.bf16 %v1738_v42, %v1738_v42 }
 0xe9c   : > { %2234 = vmatmul.mubr.msk.bf16.vlgmr.msra.gmra.mrb[28].mxu0 %vm1779_vm5, %v1739_v43 }
 0xf6f   : > { %v1817_v5 = vpop.f32.mrb[28].mxu0 }
 0xf70   : > { %v1818_v44 = vadd.f32 %v2070_v4, %v1817_v5  ;;  %v2235_v53 = vpop.f32.mrb[29].mxu0 }
 0xf71   : > { %v1820_v45 = vpop.f32.mrb[30].mxu0 }
 0xf72   : > { %v1823_v46 = vadd.f32 %v1818_v44, %v3340_v8  ;;  %v2236_v47 = vpop.f32.mrb[31].mxu0 }
 0xf74   : > { %1824 = vst.msk [vmem:[%s718_s0] sm:$0xff] %vm735_vm0, %v1823_v46 }
 0xf75   : > { %2691 = shalt.err (!%p2688_p6)
}
 0xf76   : > { %s2692_s22 = scalar_lea.hbm %s3381_s23, 128  ;;  %s2696_s19 = scalar_lea.hbm %s3501_s1, 256 }
 0xf77   : > { %p2693_p7 = scmp.ne.s32.totalorder %s3381_s23, %s2692_s22  ;;  %p2697_p4 = scmp.lt.u32.totalorder %s3381_s23, %s3501_s1 }
 0xf78   : > { %p2698_p8 = scmp.lt.u32.totalorder %s2696_s19, %s2692_s22  ;;  %p2700_p1 = scmp.lt.u32.totalorder %s2692_s22, %s3381_s23 }
 0xf79   : > { %p2694_p9 = pnand %p2693_p7, %p3502_p10 }
 0xf7a   : > { %p2699_p13 = por %p2698_p8, %p2697_p4 }
 0xf7b   : > { %p2695_p12 = pneg %p2694_p9 }
 0xf7c   : > { %p2701_p11 = por %p2700_p1, %p2699_p13 }
 0xf7e   : > { %p2702_p0 = pnand %p2701_p11, %p2695_p12 }
 0xf80   : > { %2705 = shalt.err (!%p2702_p0)
}
 0xf81   : > { %2273 = dma.vmem_to_hbm [thread:$0]  (%p3502_p10), %s3383_s18, 128, %s3381_s23, %s1826_s30  }
 0xf82 PF: > { %s3503_s27 = sld [smem:[#allocation28_spill]]  ;;  %s3504_s17 = sld [smem:[#allocation24_spill]] }
 0xf83   : > { %s3505_s0 = sld [smem:[#allocation31_spill]] }
 0xf88   : > { %p2325_p2 = scmp.ge.s32.totalorder %s3503_s27, 2  ;;  %s1852_s15 = sand.u32 1, %s3504_s17  }
 0xf89   : > { %p3506_p3 = scmp.ne.s32.totalorder %s3505_s0, 0  ;;  %s1853_s28 = scalar_lea.sflag [#allocation4], %s1852_s15 }
 0xf8b   : > { %p2304_p5 = pnand %p2325_p2, %p3506_p3 }
 0xf8d   : > { %2751 = dma.done.wait (!%p2304_p5), %s1853_s28, 128  }
 0xf8e   : > { %2753 = vsyncadd (!%p2304_p5), %s1853_s28, 4294967168  ;;  %s36_s19 = sadd.s32 1, %s3503_s27   ;;  %s3507_s27 = sld [smem:[#allocation25_spill]] }
 0xf8f   : > { %p33_p6 = scmp.ge.s32.totalorder %s36_s19, 4   ;;  %s3508_s28 = sld [smem:[#allocation26_spill]] }
 0xf90   : > { %s3509_s29 = sld [smem:[#allocation32_spill]]  ;;  %s3510_s30 = sld [smem:[#allocation27_spill]] }
 0xf91   : > { %s3511_s0 = sld [smem:[#allocation29_spill]]  ;;  %35 = sbr.rel (!%p33_p6) target bundleno = 18 (0x12), region = 167 }
 0xf98   :  { %1858 = vsyncpa [#allocation3], 1 }
 0xf99   :  { %1860 = vsyncpa [#allocation3 + $0x1], 1 }
 0xf9a   :  { %1861 = vsyncpa [#allocation6], 1 }
 0xf9b   :  { %1862 = vsyncpa [#allocation9], 1 }
 0xf9c   :  { %1863 = vsyncpa [#allocation12], 1 }
 0xf9d   :  { %1864 = vsyncpa [#allocation15], 1 }
 0xf9e   :  { %1865 = vsyncpa [#allocation4], 1 }
 0xf9f   :  { %1867 = vsyncpa [#allocation4 + $0x1], 1 }

// kernel: tpu_custom_call.1
= control target key start
LH: loop header
LB: loop body
LE: loop exit
PB: predicated region body
PF: predicated region fallthrough
CT: control target
= control target key end

     0   :  { %s3429_s0 = inlined_call_operand.vmem [shape: f32[2,8,32], index: 0, kind: input, shape index: {}]   ;;  %s3430_s1 = inlined_call_operand.vmem [shape: f32[2,8,32], index: 1, kind: input, shape index: {}]   ;;  %s3431_s2 = inlined_call_operand.vmem [shape: f32[1,32], index: 2, kind: input, shape index: {}]   ;;  %s3432_s3 = inlined_call_operand.hbm [shape: f32[1,32], index: 3, kind: input, shape index: {}]   ;;  %s3433_s4 = inlined_call_operand.vmem [shape: bf16[32,32], index: 4, kind: input, shape index: {}]   ;;  %s3434_s5 = inlined_call_operand.hbm [shape: bf16[32,32], index: 5, kind: input, shape index: {}]   ;;  %s3435_s6 = inlined_call_operand.hbm [shape: bf16[32,32], index: 6, kind: input, shape index: {}]   ;;  %s3436_s7 = inlined_call_operand.hbm [shape: f32[1,32], index: 7, kind: input, shape index: {}]   ;;  %s3437_s8 = inlined_call_operand.hbm [shape: f32[1,32], index: 8, kind: input, shape index: {}]   ;;  %s3438_s9 = inlined_call_operand.hbm [shape: f32[1,32], index: 9, kind: input, shape index: {}]   ;;  %s3439_s10 = inlined_call_operand.vmem [shape: bf16[32,32], index: 10, kind: input, shape index: {}]   ;;  %s3440_s11 = inlined_call_operand.hbm [shape: f32[1,32], index: 11, kind: input, shape index: {}]   ;;  %s3441_s12 = inlined_call_operand.hbm [shape: f32[1,32], index: 12, kind: input, shape index: {}]   ;;  %s3442_s13 = inlined_call_operand.hbm [shape: f32[1,32], index: 13, kind: input, shape index: {}]   ;;  %s3443_s14 = inlined_call_operand.vmem [shape: bf16[32,64], index: 14, kind: input, shape index: {}]   ;;  %s3444_s15 = inlined_call_operand.vmem [shape: f32[1,64], index: 15, kind: input, shape index: {}]   ;;  %s3445_s16 = inlined_call_operand.vmem [shape: bf16[64,32], index: 16, kind: input, shape index: {}]   ;;  %s3446_s17 = inlined_call_operand.vmem [shape: f32[1,32], index: 17, kind: input, shape index: {}]   ;;  %s3447_s18 = inlined_call_operand.hbm [shape: f32[2,8,32], index: 18, kind: output, shape index: {}]  }
   0x1   :  { %3465 = sst [smem:[#allocation33_spill]] %s3429_s0 }
   0x2   :  { %3466 = sst [smem:[#allocation34_spill]] %s3430_s1 }
   0x3   :  { %3467 = sst [smem:[#allocation35_spill]] %s3431_s2 }
   0x4   :  { %3468 = sst [smem:[#allocation36_spill]] %s3432_s3 }
   0x5   :  { %3469 = sst [smem:[#allocation37_spill]] %s3434_s5 }
   0x6   :  { %3470 = sst [smem:[#allocation38_spill]] %s3444_s15 }
   0x7   :  { %3471 = sst [smem:[#allocation39_spill]] %s3446_s17 }
   0x8   :  { %3472 = sst [smem:[#allocation40_spill]] %s3447_s18 }
   0x9   :  { %23 = vsyncpa [#allocation3], 0 }
   0xa   :  { %24 = vsyncpa [#allocation6], 0 }
   0xb   :  { %25 = vsyncpa [#allocation9], 0 }
   0xc   :  { %26 = vsyncpa [#allocation12], 0 }
   0xd   :  { %27 = vsyncpa [#allocation15], 0 }
   0xe   :  { %28 = vsyncpa [#allocation4], 0 }
   0xf   :  { %30 = vsyncpa [#allocation4 + $0x1], 0  ;;  %s2890_s27 = smov 0   ;;  %s2892_s28 = smov 0  }
  0x10   :  { %s2894_s29 = smov 0   ;;  %s2896_s30 = smov 0  }
  0x11   :  { %s2898_s0 = smov 0   ;;  %s2900_s19 = smov 0  }
  0x12 LB: > { %3473 = sst [smem:[#allocation24_spill]] %s2756_s27  ;;  %s2011_s1 = sadd.s32 4294967295, %s2776_s19   ;;  %s2776_s19 = sphi %s2900_s19, %s36_s19   ;;  %s2772_s0 = sphi %s2898_s0, %s3511_s0   ;;  %s2768_s30 = sphi %s2896_s30, %s3510_s30   ;;  %s2764_s29 = sphi %s2894_s29, %s3509_s29   ;;  %s2760_s28 = sphi %s2892_s28, %s3508_s28   ;;  %s2756_s27 = sphi %s2890_s27, %s3507_s27  }
  0x13   : > { %3474 = sst [smem:[#allocation25_spill]] %s2760_s28  ;;  %s2012_s20 = sadd.s32 4294967294, %s2776_s19  }
  0x14   : > { %3475 = sst [smem:[#allocation26_spill]] %s2764_s29  ;;  %s48_s21 = sadd.s32 1, %s2772_s0 }
  0x15   : > { %3476 = sst [smem:[#allocation27_spill]] %s2772_s0  ;;  %s447_s22 = sadd.s32 1, %s2764_s29 }
  0x16   : > { %3477 = sst [smem:[#allocation28_spill]] %s2776_s19  ;;  %p50_p0 = scmp.ge.s32.totalorder %s48_s21, 2 }
  0x17   : > { %p457_p1 = scmp.ne.s32.totalorder %s2764_s29, %s2760_s28  ;;  %p458_p2 = scmp.eq.s32.totalorder %s2011_s1, 1 }
  0x18   : > { %p463_p3 = scmp.ne.s32.totalorder %s2760_s28, %s2756_s27  ;;  %s3513_s21 = smov (%p50_p0, %s48_s21), 0 }
  0x19   : > { %3478 = sst [smem:[#allocation29_spill]] %s3513_s21  ;;  %p2930_p4 = por %p458_p2, %p457_p1 }
  0x1a   : > { %p464_p5 = scmp.eq.s32.totalorder %s2012_s20, 1  ;;  %s442_s23 = ssub.s32 %s2772_s0, %s3513_s21 }
  0x1b   : > { %s3479_s2 = scalar_select %p2930_p4, 1, 0 }
  0x1c   : > { %p2013_p6 = scmp.ge.s32.totalorder %s2776_s19, 1  ;;  %p445_p7 = scmp.eq.s32.totalorder %s442_s23, 0 }
  0x1d   : > { %3480 = sst [smem:[#allocation30_spill]] %s3479_s2  ;;  %p2937_p8 = por %p464_p5, %p463_p3 }
  0x1e   : > { %p471_p9 = scmp.lt.s32.totalorder %s2776_s19, 3  ;;  %p2949_p11 = scmp.eq.s32.totalorder %s2011_s1, 0 }
  0x1f   : > { %s3481_s24 = scalar_select %p2937_p8, 1, 0 }
  0x20   : > { %s2943_s25 = scalar_select %p445_p7, %s2764_s29, %s447_s22  }
  0x21   : > { %3482 = sst [smem:[#allocation31_spill]] %s3481_s24  ;;  %p2945_p10 = pnand %p2013_p6, %p471_p9 }
  0x22   : > { %3483 = sst [smem:[#allocation32_spill]] %s2943_s25  ;;  %s2778_s20 = smov [#allocation5]  }
  0x23   : > { %s3484_s26 = scalar_select %p2945_p10, 1, 0 }
  0x24   : > { %s3485_s27 = scalar_select %p2949_p11, 1, 0 }
  0x25   : > { %p2275_p12 = pneg %p2945_p10  ;;  %s500_s23 = sshll.u32 %s2778_s20, 4  ;;  %s501_s23 = int_to_ptr.vmem [resolvable:$true] %s500_s23 }
  0x26   : > { %s2779_s22 = smov [#allocation8]   ;;  %s3487_s5 = sld [smem:[#allocation37_spill]] }
  0x27   : > { %p2957_p13 = pnand %p2949_p11, %p2275_p12  ;;  %s527_s0 = sshll.u32 %s2779_s22, 4  ;;  %s2961_s0 = int_to_ptr.vmem [resolvable:$true] %s527_s0 }
  0x29   : > { %p2971_p1 = pneg %p2957_p13 }
  0x2c   : > { %s2426_s29 = scalar_lea.hbm %s3487_s5, 256 }
  0x2d   : > { %p2427_p0 = scmp.ne.s32.totalorder %s3487_s5, %s2426_s29  ;;  %p2433_p5 = scmp.lt.u32.totalorder %s2426_s29, %s3487_s5 }
  0x2f   : > { %p2429_p2 = pnand %p2971_p1, %p2427_p0 }
  0x31   : > { %p2430_p3 = pneg %p2429_p2 }
  0x33   : > { %p2435_p6 = pnand %p2433_p5, %p2430_p3 }
  0x35   : > { %2438 = shalt.err (!%p2435_p6)
}
  0x36   : > { %s2439_s25 = scalar_lea.vmem %s501_s23, 256  ;;  %p2447_p8 = scmp.lt.s32.totalorder %s501_s23, %s501_s23 }
  0x37   : > { %p2440_p7 = scmp.ne.s32.totalorder %s501_s23, %s2439_s25  ;;  %p2448_p4 = scmp.lt.s32.totalorder %s2439_s25, %s2439_s25 }
  0x39   : > { %p2442_p9 = pnand %p2440_p7, %p2971_p1  ;;  %p2449_p11 = por %p2448_p4, %p2447_p8 }
  0x3b   : > { %p2443_p12 = pneg %p2442_p9 }
  0x3d   : > { %p2450_p10 = pnand %p2449_p11, %p2443_p12 }
  0x3f   : > { %2453 = shalt.err (!%p2450_p10)
}
  0x40   : > { %s3463_s19 = smov 64   ;;  %s3464_s24 = smov 4  }
  0x41   : > { %2281 = dma.hbm_to_vmem [thread:$0]  (!%p2957_p13), %s3487_s5, 256, %s501_s23, [#allocation6], %s3463_s19, %s3463_s19, %s3464_s24  }
  0x42   : > { %s2454_s2 = scalar_lea.hbm %s3436_s7, 16 }
  0x43   : > { %p2455_p4 = scmp.ne.s32.totalorder %s3436_s7, %s2454_s2  ;;  %p2461_p11 = scmp.lt.u32.totalorder %s2454_s2, %s3436_s7 }
  0x45   : > { %p2457_p8 = pnand %p2455_p4, %p2971_p1 }
  0x47   : > { %p2458_p10 = pneg %p2457_p8 }
  0x49   : > { %p2463_p0 = pnand %p2461_p11, %p2458_p10 }
  0x4b   : > { %2466 = shalt.err (!%p2463_p0)
}
  0x4c   : > { %s2467_s23 = scalar_lea.vmem %s2961_s0, 16  ;;  %s2474_s17 = scalar_lea.vmem %s2961_s0, 32 }
  0x4d   : > { %p2468_p2 = scmp.ne.s32.totalorder %s2961_s0, %s2467_s23  ;;  %p2475_p6 = scmp.lt.s32.totalorder %s2961_s0, %s2961_s0 }
  0x4e   : > { %p2476_p7 = scmp.lt.s32.totalorder %s2474_s17, %s2467_s23 }
  0x4f   : > { %p2470_p3 = pnand %p2468_p2, %p2971_p1 }
  0x50   : > { %p2477_p9 = por %p2476_p7, %p2475_p6 }
  0x51   : > { %p2471_p5 = pneg %p2470_p3 }
  0x53   : > { %p2478_p12 = pnand %p2477_p9, %p2471_p5 }
  0x55   : > { %2481 = shalt.err (!%p2478_p12)
}
  0x56   : > { %2287 = dma.hbm_to_vmem [thread:$0]  (!%p2957_p13), %s3436_s7, 16, %s2961_s0, [#allocation9]  }
  0x57   : > { %s2782_s2 = smov [#allocation11]   ;;  %s2783_s29 = smov [#allocation14]  }
  0x58   : > { %s549_s18 = sshll.u32 %s2782_s2, 4  ;;  %s574_s1 = sshll.u32 %s2783_s29, 4  ;;  %s550_s18 = int_to_ptr.vmem [resolvable:$true] %s549_s18  ;;  %s575_s1 = int_to_ptr.vmem [resolvable:$true] %s574_s1 }
  0x59   : > { %s2482_s23 = scalar_lea.hbm %s3438_s9, 16 }
  0x5a   : > { %p2483_p4 = scmp.ne.s32.totalorder %s3438_s9, %s2482_s23  ;;  %p2489_p11 = scmp.lt.u32.totalorder %s2482_s23, %s3438_s9 }
  0x5c   : > { %p2485_p8 = pnand %p2483_p4, %p2971_p1 }
  0x5e   : > { %p2486_p10 = pneg %p2485_p8 }
  0x60   : > { %p2491_p0 = pnand %p2489_p11, %p2486_p10 }
  0x62   : > { %2494 = shalt.err (!%p2491_p0)
}
  0x63   : > { %s2495_s0 = scalar_lea.vmem %s550_s18, 16  ;;  %s2502_s28 = scalar_lea.vmem %s550_s18, 32 }
  0x64   : > { %p2496_p2 = scmp.ne.s32.totalorder %s550_s18, %s2495_s0  ;;  %p2503_p6 = scmp.lt.s32.totalorder %s550_s18, %s550_s18 }
  0x65   : > { %p2504_p7 = scmp.lt.s32.totalorder %s2502_s28, %s2495_s0 }
  0x66   : > { %p2498_p3 = pnand %p2496_p2, %p2971_p1 }
  0x67   : > { %p2505_p9 = por %p2504_p7, %p2503_p6 }
  0x68   : > { %p2499_p5 = pneg %p2498_p3 }
  0x6a   : > { %p2506_p12 = pnand %p2505_p9, %p2499_p5 }
  0x6c   : > { %2509 = shalt.err (!%p2506_p12)
}
  0x6d   : > { %2293 = dma.hbm_to_vmem [thread:$0]  (!%p2957_p13), %s3438_s9, 16, %s550_s18, [#allocation12]  }
  0x6e   : > { %s2510_s22 = scalar_lea.hbm %s3441_s12, 16 }
  0x6f   : > { %p2511_p4 = scmp.ne.s32.totalorder %s3441_s12, %s2510_s22  ;;  %p2517_p11 = scmp.lt.u32.totalorder %s2510_s22, %s3441_s12 }
  0x71   : > { %p2513_p8 = pnand %p2511_p4, %p2971_p1 }
  0x73   : > { %p2514_p10 = pneg %p2513_p8 }
  0x75   : > { %p2519_p0 = pnand %p2517_p11, %p2514_p10 }
  0x77   : > { %2522 = shalt.err (!%p2519_p0)
}
  0x78   : > { %s2523_s0 = scalar_lea.vmem %s575_s1, 16  ;;  %s2530_s18 = scalar_lea.vmem %s575_s1, 32 }
  0x79   : > { %p2524_p2 = scmp.ne.s32.totalorder %s575_s1, %s2523_s0  ;;  %p2531_p6 = scmp.lt.s32.totalorder %s575_s1, %s575_s1 }
  0x7a   : > { %p2532_p7 = scmp.lt.s32.totalorder %s2530_s18, %s2523_s0 }
  0x7b   : > { %p2526_p3 = pnand %p2524_p2, %p2971_p1 }
  0x7c   : > { %p2533_p9 = por %p2532_p7, %p2531_p6 }
  0x7d   : > { %p2527_p5 = pneg %p2526_p3 }
  0x7f   : > { %p2534_p12 = pnand %p2533_p9, %p2527_p5 }
  0x81   : > { %2537 = shalt.err (!%p2534_p12)
}
  0x82   : > { %2299 = dma.hbm_to_vmem [thread:$0]  (!%p2957_p13), %s3441_s12, 16, %s575_s1, [#allocation15]  }
  0x83   : > { %s2784_s2 = smov [#allocation2]   ;;  %s2785_s29 = smov [#allocation7]  }
  0x84   : > { %s487_s24 = sshll.u32 %s2784_s2, 4  ;;  %s513_s22 = sshll.u32 %s2785_s29, 4  ;;  %s488_s24 = int_to_ptr.vmem [resolvable:$true] %s487_s24  ;;  %s514_s22 = int_to_ptr.vmem [resolvable:$true] %s513_s22 }
  0x85   : > { %s3489_s3 = sld [smem:[#allocation36_spill]] }
  0x8b   : > { %s2538_s17 = scalar_lea.hbm %s3489_s3, 16 }
  0x8c   : > { %p2539_p4 = scmp.ne.s32.totalorder %s3489_s3, %s2538_s17  ;;  %p2545_p11 = scmp.lt.u32.totalorder %s2538_s17, %s3489_s3 }
  0x8e   : > { %p2541_p8 = pnand %p2539_p4, %p2971_p1 }
  0x90   : > { %p2542_p10 = pneg %p2541_p8 }
  0x92   : > { %p2547_p0 = pnand %p2545_p11, %p2542_p10 }
  0x94   : > { %2550 = shalt.err (!%p2547_p0)
}
  0x95   : > { %s2551_s1 = scalar_lea.vmem %s488_s24, 16  ;;  %s2558_s19 = scalar_lea.vmem %s488_s24, 32 }
  0x96   : > { %p2552_p2 = scmp.ne.s32.totalorder %s488_s24, %s2551_s1  ;;  %p2559_p6 = scmp.lt.s32.totalorder %s488_s24, %s488_s24 }
  0x97   : > { %p2560_p7 = scmp.lt.s32.totalorder %s2558_s19, %s2551_s1 }
  0x98   : > { %p2554_p3 = pnand %p2552_p2, %p2971_p1 }
  0x99   : > { %p2561_p9 = por %p2560_p7, %p2559_p6 }
  0x9a   : > { %p2555_p5 = pneg %p2554_p3 }
  0x9c   : > { %p2562_p12 = pnand %p2561_p9, %p2555_p5 }
  0x9e   : > { %2565 = shalt.err (!%p2562_p12)
}
  0x9f   : > { %2278 = dma.hbm_to_vmem [thread:$0]  (!%p2957_p13), %s3489_s3, 16, %s488_s24, [#allocation3]  }
  0xa0   : > { %s2566_s17 = scalar_lea.hbm %s3435_s6, 256 }
  0xa1   : > { %p2567_p4 = scmp.ne.s32.totalorder %s3435_s6, %s2566_s17  ;;  %p2573_p11 = scmp.lt.u32.totalorder %s2566_s17, %s3435_s6 }
  0xa3   : > { %p2569_p8 = pnand %p2567_p4, %p2971_p1 }
  0xa5   : > { %p2570_p10 = pneg %p2569_p8 }
  0xa7   : > { %p2575_p0 = pnand %p2573_p11, %p2570_p10 }
  0xa9   : > { %2578 = shalt.err (!%p2575_p0)
}
  0xaa   : > { %s2579_s1 = scalar_lea.vmem %s514_s22, 256  ;;  %p2587_p6 = scmp.lt.s32.totalorder %s514_s22, %s514_s22 }
  0xab   : > { %p2580_p2 = scmp.ne.s32.totalorder %s514_s22, %s2579_s1  ;;  %p2588_p7 = scmp.lt.s32.totalorder %s2579_s1, %s2579_s1 }
  0xad   : > { %p2582_p3 = pnand %p2580_p2, %p2971_p1  ;;  %p2589_p9 = por %p2588_p7, %p2587_p6 }
  0xaf   : > { %p2583_p5 = pneg %p2582_p3 }
  0xb1   : > { %p2590_p12 = pnand %p2589_p9, %p2583_p5 }
  0xb3   : > { %2593 = shalt.err (!%p2590_p12)
}
  0xb4   : > { %s3490_s24 = smov 4   ;;  %s3491_s19 = smov 64  }
  0xb5   : > { %2284 = dma.hbm_to_vmem [thread:$0]  (!%p2957_p13), %s3435_s6, 256, %s514_s22, [#allocation6], %s3491_s19, %s3491_s19, %s3490_s24  }
  0xb6   : > { %s2786_s25 = smov [#allocation10]   ;;  %s2787_s17 = smov [#allocation13]  }
  0xb7   : > { %s538_s23 = sshll.u32 %s2786_s25, 4  ;;  %s563_s15 = sshll.u32 %s2787_s17, 4  ;;  %s539_s23 = int_to_ptr.vmem [resolvable:$true] %s538_s23  ;;  %s564_s15 = int_to_ptr.vmem [resolvable:$true] %s563_s15 }
  0xb8   : > { %s2594_s28 = scalar_lea.hbm %s3437_s8, 16 }
  0xb9   : > { %p2595_p4 = scmp.ne.s32.totalorder %s3437_s8, %s2594_s28  ;;  %p2601_p11 = scmp.lt.u32.totalorder %s2594_s28, %s3437_s8 }
  0xbb   : > { %p2597_p8 = pnand %p2595_p4, %p2971_p1 }
  0xbd   : > { %p2598_p10 = pneg %p2597_p8 }
  0xbf   : > { %p2603_p0 = pnand %p2601_p11, %p2598_p10 }
  0xc1   : > { %2606 = shalt.err (!%p2603_p0)
}
  0xc2   : > { %s2607_s22 = scalar_lea.vmem %s539_s23, 16  ;;  %s2614_s24 = scalar_lea.vmem %s539_s23, 32 }
  0xc3   : > { %p2608_p2 = scmp.ne.s32.totalorder %s539_s23, %s2607_s22  ;;  %p2615_p6 = scmp.lt.s32.totalorder %s539_s23, %s539_s23 }
  0xc4   : > { %p2616_p7 = scmp.lt.s32.totalorder %s2614_s24, %s2607_s22 }
  0xc5   : > { %p2610_p3 = pnand %p2608_p2, %p2971_p1 }
  0xc6   : > { %p2617_p9 = por %p2616_p7, %p2615_p6 }
  0xc7   : > { %p2611_p5 = pneg %p2610_p3 }
  0xc9   : > { %p2618_p12 = pnand %p2617_p9, %p2611_p5 }
  0xcb   : > { %2621 = shalt.err (!%p2618_p12)
}
  0xcc   : > { %2290 = dma.hbm_to_vmem [thread:$0]  (!%p2957_p13), %s3437_s8, 16, %s539_s23, [#allocation9]  }
  0xcd   : > { %s2622_s25 = scalar_lea.hbm %s3440_s11, 16 }
  0xce   : > { %p2623_p4 = scmp.ne.s32.totalorder %s3440_s11, %s2622_s25  ;;  %p2629_p11 = scmp.lt.u32.totalorder %s2622_s25, %s3440_s11 }
  0xd0   : > { %p2625_p8 = pnand %p2623_p4, %p2971_p1 }
  0xd2   : > { %p2626_p10 = pneg %p2625_p8 }
  0xd4   : > { %p2631_p0 = pnand %p2629_p11, %p2626_p10 }
  0xd6   : > { %2634 = shalt.err (!%p2631_p0)
}
  0xd7   : > { %s2635_s1 = scalar_lea.vmem %s564_s15, 16  ;;  %s2642_s23 = scalar_lea.vmem %s564_s15, 32 }
  0xd8   : > { %p2636_p2 = scmp.ne.s32.totalorder %s564_s15, %s2635_s1  ;;  %p2643_p6 = scmp.lt.s32.totalorder %s564_s15, %s564_s15 }
  0xd9   : > { %p2644_p7 = scmp.lt.s32.totalorder %s2642_s23, %s2635_s1 }
  0xda   : > { %p2638_p3 = pnand %p2636_p2, %p2971_p1 }
  0xdb   : > { %p2645_p9 = por %p2644_p7, %p2643_p6 }
  0xdc   : > { %p2639_p5 = pneg %p2638_p3 }
  0xde   : > { %p2646_p12 = pnand %p2645_p9, %p2639_p5 }
  0xe0   : > { %2649 = shalt.err (!%p2646_p12)
}
  0xe1   : > { %2296 = dma.hbm_to_vmem [thread:$0]  (!%p2957_p13), %s3440_s11, 16, %s564_s15, [#allocation12]  }
  0xe2   : > { %s2788_s24 = smov [#allocation16]   ;;  %s2650_s29 = scalar_lea.hbm %s3442_s13, 16 }
  0xe3   : > { %s585_s3 = sshll.u32 %s2788_s24, 4  ;;  %p2651_p4 = scmp.ne.s32.totalorder %s3442_s13, %s2650_s29  ;;  %s586_s3 = int_to_ptr.vmem [resolvable:$true] %s585_s3 }
  0xe4   : > { %p2657_p11 = scmp.lt.u32.totalorder %s2650_s29, %s3442_s13 }
  0xe5   : > { %p2653_p8 = pnand %p2651_p4, %p2971_p1 }
  0xe7   : > { %p2654_p10 = pneg %p2653_p8 }
  0xe9   : > { %p2659_p0 = pnand %p2657_p11, %p2654_p10 }
  0xeb   : > { %2662 = shalt.err (!%p2659_p0)
}
  0xec   : > { %s2663_s15 = scalar_lea.vmem %s586_s3, 16  ;;  %s2670_s28 = scalar_lea.vmem %s586_s3, 32 }
  0xed   : > { %p2664_p2 = scmp.ne.s32.totalorder %s586_s3, %s2663_s15  ;;  %p2671_p6 = scmp.lt.s32.totalorder %s586_s3, %s586_s3 }
  0xee   : > { %p2672_p7 = scmp.lt.s32.totalorder %s2670_s28, %s2663_s15 }
  0xef   : > { %p2666_p3 = pnand %p2664_p2, %p2971_p1 }
  0xf0   : > { %p2673_p9 = por %p2672_p7, %p2671_p6 }
  0xf1   : > { %p2667_p5 = pneg %p2666_p3 }
  0xf3   : > { %p2674_p12 = pnand %p2673_p9, %p2667_p5 }
  0xf5   : > { %2677 = shalt.err (!%p2674_p12)
}
  0xf6   : > { %2302 = dma.hbm_to_vmem [thread:$0]  (!%p2957_p13), %s3442_s13, 16, %s586_s3, [#allocation15]  }
  0xf7   : > { %p3492_p4 = scmp.ne.s32.totalorder %s3484_s26, 0 }
  0xf8   : > { %p3493_p8 = scmp.ne.s32.totalorder (!%p3492_p4), %s3485_s27, 0 }
  0xf9   : > { %627 = sbr.rel (%p3492_p4) target bundleno = 3970 (0xf82), region = 92 }
 0x100   : > { %2731 = dma.done.wait (%p3493_p8), [#allocation3], 16  }
 0x101   : > { %2733 = vsyncadd (%p3493_p8), [#allocation3], 4294967280 }
 0x102   : > { %2735 = dma.done.wait (%p3493_p8), [#allocation6], 512  }
 0x103   : > { %2737 = vsyncadd (%p3493_p8), [#allocation6], 4294966784 }
 0x104   : > { %2739 = dma.done.wait (%p3493_p8), [#allocation9], 32  }
 0x105   : > { %2741 = vsyncadd (%p3493_p8), [#allocation9], 4294967264 }
 0x106   : > { %2743 = dma.done.wait (%p3493_p8), [#allocation12], 32  }
 0x107   : > { %2745 = vsyncadd (%p3493_p8), [#allocation12], 4294967264 }
 0x108   : > { %2747 = dma.done.wait (%p3493_p8), [#allocation15], 32  }
 0x109   : > { %2749 = vsyncadd (%p3493_p8), [#allocation15], 4294967264  ;;  %p719_p13 = scmp.lt.s32.totalorder %s2768_s30, 1  ;;  %s3494_s22 = sld [smem:[#allocation33_spill]]  ;;  %vm735_vm0 = vcmask 261120   ;;  %v2390_v14 = vld [vmem:[%s3433_s4] sm:$0xff]  }
 0x10a   : > { %s3495_s5 = sld [smem:[#allocation34_spill]]  ;;  %v2392_v15 = vld [vmem:[#allocation7] sm:$0xff]   ;;  %v2789_v16 = vmov 0.0   ;;  %v2391_v17 = vld [vmem:[%s3433_s4 + $0x8] sm:$0xff]   ;;  %vm2790_vm1 = vmmov 0   ;;  %v2394_v18 = vld [vmem:[#allocation7 + $0x8] sm:$0xff]  }
 0x10b   : > { %s720_s21 = scalar_select %p719_p13, %s2768_s30, 1  ;;  %2121 = vmatprep.subr.bf16.mxu1 %v2789_v16  ;;  %2137 = vmatprep.subr.bf16.mxu0 %v2789_v16  ;;  %v2038_v28 = vld [vmem:[#allocation2] ss:$0 sm:$0xff]  ;;  %v2393_v33 = vld [vmem:[#allocation5] sm:$0xff]   ;;  %v2395_v37 = vld [vmem:[#allocation5 + $0x8] sm:$0xff]   ;;  %vm1051_vm2 = vcmask 1043456  }
 0x10c   : > { %2122 = vmatpush3.bf16.msra.mxu1 %v2390_v14  ;;  %2138 = vmatpush3.bf16.msra.mxu0 %v2392_v15  ;;  %s3496_s28 = sld [smem:[#allocation35_spill]]  ;;  %v2039_v39 = vld [vmem:[#allocation8] ss:$0 sm:$0xff]  ;;  %v2047_v44 = vld [vmem:[#allocation11] ss:$0 sm:$0xff]  ;;  %s2791_s1 = smov 120  }
 0x10d   : > { %s2035_s26 = sshll.u32 %s720_s21, 3  ;;  %2123 = vmatprep.subr.bf16.mxu1 %v2789_v16  ;;  %2125 = vmatprep.mubr.msk.bf16.mxu1 %vm2790_vm1, %v2789_v16  ;;  %v2043_v52 = vld [vmem:[#allocation10] ss:$0 sm:$0xff]  ;;  %vm988_vm3 = vcmask 64512   ;;  %s2792_s23 = smov 112   ;;  %vm1779_vm5 = vcmask 523264  }
 0x10e   : > { %2139 = vmatprep.subr.bf16.mxu0 %v2789_v16  ;;  %2141 = vmatprep.mubr.msk.bf16.mxu0 %vm2790_vm1, %v2789_v16  ;;  %s3499_s27 = sld [smem:[#allocation39_spill]]  ;;  %s3500_s25 = sld [smem:[#allocation30_spill]] }
 0x10f   : > { %s725_s24 = scalar_lea.vmem %s3494_s22, %s2035_s26  ;;  %s2793_s22 = smov 104  }
 0x110   : > { %s729_s29 = scalar_lea.vmem %s3495_s5, %s2035_s26  ;;  %v3173_v0 = vld [vmem:[%s725_s24] sm:$0xff]  ;;  %2124 = vmatpush3.bf16.msra.mxu1 %v2391_v17  ;;  %2140 = vmatpush3.bf16.msra.mxu0 %v2394_v18  ;;  %s3498_s24 = sld [smem:[#allocation25_spill]] }
 0x111   : > { %v732_v1 = vld [vmem:[%s729_s29] sm:$0xff]  ;;  %v765_v2 = vsel %vm735_vm0, %v3173_v0, 0.0  ;;  %2129 = vmatprep.subr.bf16.mxu1 %v2789_v16  ;;  %2151 = vmatprep.subr.bf16.mxu0 %v2789_v16  ;;  %s2077_s17 = sshll.u32 %s2768_s30, 7  ;;  %s2794_s26 = smov [#allocation17]  }
 0x112   : > { %v736_v3 = vsel %vm735_vm0, %v732_v1, 0.0  ;;  %766 = vadd.xlane.f32.xlu0 %v765_v2  ;;  %v2037_v26 = vld [vmem:[%s3496_s28] ss:$0 sm:$0xff]  ;;  %s2682_s20 = sshll.u32 %s2794_s26, 4  ;;  %s2683_s20 = int_to_ptr.vmem [resolvable:$false] %s2682_s20 }
 0x113   : > { %s2684_s2 = scalar_lea.vmem %s2683_s20, 256 }
 0x114   : > { %p3502_p10 = scmp.ne.s32.totalorder %s3500_s25, 0 }
 0x116   : > { %737 = vadd.xlane.f32.xlu0 %v736_v3  ;;  %v980_v3 = vlaneseq  ;;  %s716_s3 = sand.u32 1, %s3498_s24  }
 0x117   : > { %s2034_s19 = sshll.u32 %s716_s3, 3  ;;  %s1826_s30 = scalar_lea.sflag [#allocation4], %s716_s3 }
 0x118   : > { %s718_s0 = scalar_lea.vmem [#allocation17], %s2034_s19 }
 0x119   : > { %s1840_s18 = sshll.u32 %s718_s0, 4  ;;  %s3383_s18 = int_to_ptr.vmem [resolvable:$true] %s1840_s18 }
 0x11a   : > { %s2678_s21 = scalar_lea.vmem %s3383_s18, 128  ;;  %p2685_p2 = scmp.lt.s32.totalorder %s3383_s18, %s2683_s20 }
 0x11b   : > { %p2679_p1 = scmp.ne.s32.totalorder %s3383_s18, %s2678_s21  ;;  %p2686_p3 = scmp.lt.s32.totalorder %s2684_s2, %s2678_s21 }
 0x11d   : > { %p2680_p11 = pnand %p2679_p1, %p3502_p10  ;;  %p2687_p5 = por %p2686_p3, %p2685_p2 }
 0x11f   : > { %p2681_p0 = pneg %p2680_p11 }
 0x121   : > { %p2688_p6 = pnand %p2687_p5, %p2681_p0 }
 0x19f   : > { %v767_v4 = vpop.xlane.xlu0 %766 }
 0x1a0   : > { %v768_v5 = vmul.f32 0.03125, %v767_v4  ;;  %v3236_v4 = vshrl.u32 %v980_v3, 7 }
 0x1a2   : > { %v769_v6 = vsub.f32 %v3173_v0, %v768_v5  ;;  %v3238_v5 = vand.u32 127, %v980_v3 }
 0x1a3   : > { %v738_v7 = vpop.xlane.xlu0 %737 }
 0x1a4   : > { %v740_v8 = vmul.f32 0.03125, %v738_v7  ;;  %v770_v9 = vmul.f32 %v769_v6, %v769_v6  ;;  %vm987_vm4 = vcmp.le.s32.totalorder %v3238_v5, %v3236_v4 }
 0x1a6   : > { %v741_v10 = vsub.f32 %v732_v1, %v740_v8  ;;  %v771_v11 = vsel %vm735_vm0, %v770_v9, 0.0 }
 0x1a7   : > { %772 = vadd.xlane.f32.xlu1 %v771_v11 }
 0x1a8   : > { %v742_v12 = vmul.f32 %v741_v10, %v741_v10 }
 0x1aa   : > { %v743_v13 = vsel %vm735_vm0, %v742_v12, 0.0 }
 0x1ab   : > { %744 = vadd.xlane.f32.xlu1 %v743_v13 }
 0x234   : > { %v773_v19 = vpop.xlane.xlu1 %772 }
 0x235   : > { %v774_v20 = vmul.f32 0.03125, %v773_v19 }
 0x237   : > { %v775_v21 = vadd.f32 1e-05, %v774_v20 }
 0x238   : > { %v745_v22 = vpop.xlane.xlu1 %744 }
 0x239   : > { %2402 = vrsqrt.f32 %v775_v21  ;;  %v746_v23 = vmul.f32 0.03125, %v745_v22 }
 0x23b   : > { %v747_v24 = vadd.f32 1e-05, %v746_v23 }
 0x23d   : > { %2404 = vrsqrt.f32 %v747_v24 }
 0x243   : > { %v2403_v25 = vpop.eup %2402 }
 0x244   : > { %v777_v27 = vmul.f32 %v2403_v25, %v769_v6 }
 0x246   : > { %v778_v29 = vmul.f32 %v2037_v26, %v777_v27 }
 0x247   : > { %v2405_v30 = vpop.eup %2404 }
 0x248   : > { %v779_v31 = vadd.f32 %v2038_v28, %v778_v29  ;;  %v749_v32 = vmul.f32 %v2405_v30, %v741_v10 }
 0x24a   : > { %v780_v34 = vpack.c.bf16 %v779_v31, %v779_v31  ;;  %v756_v35 = vmul.f32 %v2037_v26, %v749_v32 }
 0x24c   : > { %2126 = vmatmul.mubr.msk.bf16.vlgmr.msra.gmra.mrb[0].mxu1 %vm735_vm0, %v780_v34  ;;  %v763_v36 = vadd.f32 %v2038_v28, %v756_v35  ;;  %v1212_v35 = vld [vmem:[%s3439_s10 + $0x4] sm:$0xf] }
 0x24d   : > { %2130 = vmatpush3.bf16.msra.mxu1 %v2393_v33  ;;  %2133 = vmatprep.mubr.msk.bf16.mxu1 %vm2790_vm1, %v2789_v16 }
 0x24e   : > { %2131 = vmatprep.subr.bf16.mxu1 %v2789_v16  ;;  %v764_v38 = vpack.c.bf16 %v763_v36, %v763_v36  ;;  %v1217_v36 = vsel %vm1051_vm2, %v1212_v35, 0 }
 0x250   : > { %2142 = vmatmul.mubr.msk.bf16.vlgmr.msra.gmra.mrb[0].mxu0 %vm735_vm0, %v764_v38 }
 0x251   : > { %2132 = vmatpush3.bf16.msra.mxu1 %v2395_v37  ;;  %2153 = vmatprep.mubr.msk.bf16.mxu0 %vm2790_vm1, %v2789_v16 }
 0x252   : > { %2145 = vmatprep.subr.bf16.mxu1 %v2789_v16 }
 0x254   : > { %2134 = vmatmul.mubr.msk.bf16.vlgmr.msra.gmra.mrb[4].mxu1 %vm735_vm0, %v764_v38 }
 0x255   : > { %2147 = vmatprep.mubr.msk.bf16.mxu1 %vm2790_vm1, %v2789_v16 }
 0x31f   : > { %v841_v40 = vpop.f32.mrb[0].mxu1 }
 0x320   : > { %v842_v41 = vadd.f32 %v2039_v39, %v841_v40  ;;  %v2127_v42 = vpop.f32.mrb[1].mxu1  ;;  %v1096_v39 = vld [vmem:[%s3439_s10] sm:$0xf] }
 0x321   : > { %v844_v43 = vpop.f32.mrb[2].mxu1  ;;  %v1263_v42 = vsel %vm1051_vm2, %v1096_v39, 0 }
 0x322   : > { %v976_v45 = vmul.f32 0.35355338, %v842_v41  ;;  %v2128_v46 = vpop.f32.mrb[3].mxu1 }
 0x323   : > { %v970_v47 = vpop.f32.mrb[0].mxu0 }
 0x324   : > { %v3211_v48 = vpack.c.bf16 %v976_v45, %v976_v45  ;;  %v971_v49 = vadd.f32 %v2047_v44, %v970_v47  ;;  %v2143_v50 = vpop.f32.mrb[1].mxu0 }
 0x325   : > { %v973_v51 = vpop.f32.mrb[2].mxu0 }
 0x326   : > { %v3213_v53 = vpack.c.bf16 %v971_v49, %v971_v49  ;;  %1098 = vrot.lane.b32.xlu1 %v3211_v48, %s2791_s1  ;;  %v2144_v54 = vpop.f32.mrb[3].mxu0 }
 0x327   : > { %v907_v55 = vpop.f32.mrb[4].mxu1 }
 0x328   : > { %v908_v56 = vadd.f32 %v2043_v52, %v907_v55  ;;  %v2135_v57 = vpop.f32.mrb[5].mxu1  ;;  %v1053_v58 = vsel %vm1051_vm2, %v3213_v53, 0 }
 0x329   : > { %v910_v59 = vpop.f32.mrb[6].mxu1  ;;  %2152 = vmatpush3.bf16.msra.mxu0 %v1053_v58 }
 0x32a   : > { %v3219_v60 = vpack.c.bf16 %v908_v56, %v908_v56  ;;  %v2136_v61 = vpop.f32.mrb[7].mxu1  ;;  %2163 = vmatprep.subr.bf16.mxu0 %v2789_v16 }
 0x32c   : > { %1101 = vrot.lane.b32.xlu0 %v3219_v60, %s2791_s1  ;;  %v993_v62 = vsel %vm988_vm3, %v3219_v60, 0 }
 0x32d   : > { %2146 = vmatpush3.bf16.xpose.msra.mxu1 %v993_v62 }
 0x32e   : > { %2157 = vmatprep.subr.bf16.mxu1 %v2789_v16 }
 0x334   : > { %2148 = vmatmul.mubr.msk.bf16.vlgmr.msra.gmra.mrb[8].mxu1 %vm988_vm3, %v3211_v48 }
 0x335   : > { %2159 = vmatprep.mubr.msk.bf16.mxu1 %vm2790_vm1, %v2789_v16 }
 0x398   : > { %v1099_v2 = vpop.permute.xlu1 %1098 }
 0x39e   : > { %v1102_v63 = vpop.permute.xlu0 %1101 }
 0x39f   : > { %v1107_v1 = vsel %vm988_vm3, %v1102_v63, 0 }
 0x3a0   : > { %2158 = vmatpush3.bf16.xpose.msra.mxu1 %v1107_v1 }
 0x3a1   : > { %2169 = vmatprep.subr.bf16.mxu1 %v2789_v16 }
 0x3a7   : > { %2160 = vmatmul.mubr.msk.bf16.vlgmr.msra.gmra.mrb[12].mxu1 %vm988_vm3, %v1099_v2 }
 0x3a8   : > { %2171 = vmatprep.mubr.msk.bf16.mxu1 %vm2790_vm1, %v2789_v16  ;;  %2170 = vmatpush3.bf16.msra.mxu1 %v1217_v36 }
 0x3a9   : > { %2181 = vmatprep.subr.bf16.mxu1 %v2789_v16 }
 0x407   : > { %v1029_v6 = vpop.f32.mrb[8].mxu1 }
 0x408   : > { %v1035_v7 = vsel %vm987_vm4, %v1029_v6, -1e+30  ;;  %v2149_v8 = vpop.f32.mrb[9].mxu1 }
 0x409   : > { %v1032_v9 = vpop.f32.mrb[10].mxu1  ;;  %v1036_v10 = vsel %vm988_vm3, %v1035_v7, -inf }
 0x40a   : > { %1037 = vmax.xlane.f32.xlu1 %v1036_v10  ;;  %v2150_v11 = vpop.f32.mrb[11].mxu1 }
 0x47a   : > { %v1143_v12 = vpop.f32.mrb[12].mxu1 }
 0x47b   : > { %v1149_v13 = vsel %vm987_vm4, %v1143_v12, -1e+30  ;;  %v2161_v14 = vpop.f32.mrb[13].mxu1 }
 0x47c   : > { %v1146_v15 = vpop.f32.mrb[14].mxu1  ;;  %v1150_v17 = vsel %vm988_vm3, %v1149_v13, -inf }
 0x47d   : > { %1151 = vmax.xlane.f32.xlu0 %v1150_v17  ;;  %v2162_v18 = vpop.f32.mrb[15].mxu1 }
 0x497   : > { %v1038_v19 = vpop.xlane.xlu1 %1037 }
 0x498   : > { %v1039_v20 = vsub.f32 %v1035_v7, %v1038_v19 }
 0x49a   : > { %v1040_v21 = vmul.f32 1.442695, %v1039_v20 }
 0x49c   : > { %2406 = vpow2.f32 %v1040_v21 }
 0x4a6   : > { %v2407_v22 = vpop.eup %2406 }
 0x4a7   : > { %v1042_v23 = vsel %vm988_vm3, %v2407_v22, 0.0 }
 0x4a8   : > { %1043 = vadd.xlane.f32.xlu0 %v1042_v23 }
 0x4be   : > { %1163 = vrot.lane.b32.xlu0 %v3213_v53, %s2791_s1  ;;  %s3501_s1 = sld [smem:[#allocation40_spill]] }
 0x50a   : > { %v1152_v24 = vpop.xlane.xlu0 %1151 }
 0x50b   : > { %v1153_v25 = vsub.f32 %v1149_v13, %v1152_v24 }
 0x50d   : > { %v1154_v26 = vmul.f32 1.442695, %v1153_v25 }
 0x50f   : > { %2408 = vpow2.f32 %v1154_v26  ;;  %v1417_v26 = vld [vmem:[%s3439_s10 + $0x8] sm:$0xf] }
 0x519   : > { %v2409_v27 = vpop.eup %2408 }
 0x51a   : > { %v1156_v28 = vsel %vm988_vm3, %v2409_v27, 0.0 }
 0x51b   : > { %1157 = vadd.xlane.f32.xlu1 %v1156_v28 }
 0x52c   : > { %1307 = vrot.lane.b32.xlu1 %v3219_v60, %s2792_s23 }
 0x530   : > { %1305 = vrot.lane.b32.xlu1 %v3211_v48, %s2792_s23 }
 0x535   : > { %v1044_v29 = vpop.xlane.xlu0 %1043 }
 0x536   : > { %2410 = vrcp.f32 %v1044_v29 }
 0x539   : > { %v1164_v32 = vpop.permute.xlu0 %1163 }
 0x53a   : > { %v1169_v34 = vsel %vm1051_vm2, %v1164_v32, 0 }
 0x540   : > { %v2411_v30 = vpop.eup %2410 }
 0x541   : > { %v1046_v31 = vmul.f32 %v2411_v30, %v2407_v22 }
 0x543   : > { %v1047_v33 = vpack.c.bf16 %v1046_v31, %v1046_v31 }
 0x545   : > { %2154 = vmatmul.mubr.msk.bf16.vlgmr.msra.gmra.mrb[4].mxu0 %vm988_vm3, %v1047_v33 }
 0x546   : > { %2164 = vmatpush3.bf16.msra.mxu0 %v1169_v34  ;;  %2165 = vmatprep.mubr.msk.bf16.mxu0 %vm2790_vm1, %v2789_v16 }
 0x547   : > { %2175 = vmatprep.subr.bf16.mxu0 %v2789_v16 }
 0x5a8   : > { %v1158_v37 = vpop.xlane.xlu1 %1157 }
 0x5a9   : > { %2412 = vrcp.f32 %v1158_v37 }
 0x5ac   : > { %v1308_v49 = vpop.permute.xlu1 %1307 }
 0x5ad   : > { %v1313_v55 = vsel %vm988_vm3, %v1308_v49, 0 }
 0x5b0   : > { %v1306_v57 = vpop.permute.xlu1 %1305 }
 0x5b3   : > { %v2413_v38 = vpop.eup %2412 }
 0x5b4   : > { %v1160_v40 = vmul.f32 %v2413_v38, %v2409_v27  ;;  %v1422_v27 = vsel %vm1051_vm2, %v1417_v26, 0  ;;  %v2399_v26 = vld [vmem:[%s3445_s16 + $0x8] sm:$0xff]  }
 0x5b6   : > { %v1161_v41 = vpack.c.bf16 %v1160_v40, %v1160_v40 }
 0x5b8   : > { %2166 = vmatmul.mubr.msk.bf16.vlgmr.msra.gmra.mrb[8].mxu0 %vm988_vm3, %v1161_v41 }
 0x5b9   : > { %2176 = vmatpush3.bf16.msra.mxu0 %v1263_v42  ;;  %2177 = vmatprep.mubr.msk.bf16.mxu0 %vm2790_vm1, %v2789_v16 }
 0x5ba   : > { %2187 = vmatprep.subr.bf16.mxu0 %v2789_v16 }
 0x618   : > { %v1089_v43 = vpop.f32.mrb[4].mxu0 }
 0x619   : > { %v1095_v44 = vpack.c.bf16 %v1089_v43, %v1089_v43  ;;  %v2155_v45 = vpop.f32.mrb[5].mxu0 }
 0x61a   : > { %v1092_v46 = vpop.f32.mrb[6].mxu0 }
 0x61b   : > { %v2156_v47 = vpop.f32.mrb[7].mxu0  ;;  %2178 = vmatmul.mubr.msk.bf16.vlgmr.msra.gmra.mrb[12].mxu0 %vm988_vm3, %v1095_v44  ;;  %v1577_v44 = vld [vmem:[%s3439_s10 + $0xc] sm:$0xf] }
 0x61c   : > { %2189 = vmatprep.mubr.msk.bf16.mxu0 %vm2790_vm1, %v2789_v16 }
 0x68b   : > { %v1205_v50 = vpop.f32.mrb[8].mxu0 }
 0x68c   : > { %v1211_v51 = vpack.c.bf16 %v1205_v50, %v1205_v50  ;;  %v2167_v52 = vpop.f32.mrb[9].mxu0 }
 0x68d   : > { %v1208_v54 = vpop.f32.mrb[10].mxu0 }
 0x68e   : > { %v2168_v56 = vpop.f32.mrb[11].mxu0  ;;  %2172 = vmatmul.mubr.msk.bf16.vlgmr.msra.gmra.mrb[16].mxu1 %vm988_vm3, %v1211_v51 }
 0x68f   : > { %2182 = vmatpush3.bf16.xpose.msra.mxu1 %v1313_v55  ;;  %2183 = vmatprep.mubr.msk.bf16.mxu1 %vm2790_vm1, %v2789_v16 }
 0x690   : > { %2193 = vmatprep.subr.bf16.mxu1 %v2789_v16 }
 0x696   : > { %2184 = vmatmul.mubr.msk.bf16.vlgmr.msra.gmra.mrb[20].mxu1 %vm988_vm3, %v1306_v57 }
 0x697   : > { %2195 = vmatprep.mubr.msk.bf16.mxu1 %vm2790_vm1, %v2789_v16  ;;  %2194 = vmatpush3.bf16.msra.mxu1 %v1422_v27  ;;  %v2400_v27 = vld [vmem:[%s3445_s16 + $0x10] sm:$0xff]  }
 0x698   : > { %2205 = vmatprep.subr.bf16.mxu1 %v2789_v16 }
 0x6ee   : > { %v1299_v58 = vpop.f32.mrb[12].mxu0 }
 0x6ef   : > { %v2179_v59 = vpop.f32.mrb[13].mxu0 }
 0x6f0   : > { %v1302_v61 = vpop.f32.mrb[14].mxu0 }
 0x6f1   : > { %v2180_v62 = vpop.f32.mrb[15].mxu0 }
 0x761   : > { %v1253_v63 = vpop.f32.mrb[16].mxu1 }
 0x762   : > { %v3287_v1 = vadd.f32 %v1299_v58, %v1253_v63  ;;  %v2173_v2 = vpop.f32.mrb[17].mxu1  ;;  %v2063_v63 = vld [vmem:[#allocation13] ss:$0 sm:$0xff] }
 0x763   : > { %v1256_v3 = vpop.f32.mrb[18].mxu1 }
 0x764   : > { %v2174_v6 = vpop.f32.mrb[19].mxu1 }
 0x769   : > { %v1349_v7 = vpop.f32.mrb[20].mxu1 }
 0x76a   : > { %v1355_v8 = vsel %vm987_vm4, %v1349_v7, -1e+30  ;;  %v2185_v9 = vpop.f32.mrb[21].mxu1 }
 0x76b   : > { %v1352_v10 = vpop.f32.mrb[22].mxu1  ;;  %v1356_v11 = vsel %vm988_vm3, %v1355_v8, -inf }
 0x76c   : > { %1357 = vmax.xlane.f32.xlu1 %v1356_v11  ;;  %v2186_v12 = vpop.f32.mrb[23].mxu1 }
 0x77d   : > { %1467 = vrot.lane.b32.xlu1 %v3219_v60, %s2793_s22 }
 0x781   : > { %1465 = vrot.lane.b32.xlu1 %v3211_v48, %s2793_s22 }
 0x7f9   : > { %v1358_v13 = vpop.xlane.xlu1 %1357 }
 0x7fa   : > { %v1359_v14 = vsub.f32 %v1355_v8, %v1358_v13 }
 0x7fc   : > { %v1360_v15 = vmul.f32 1.442695, %v1359_v14 }
 0x7fd   : > { %v1468_v22 = vpop.permute.xlu1 %1467 }
 0x7fe   : > { %2414 = vpow2.f32 %v1360_v15  ;;  %v1473_v24 = vsel %vm988_vm3, %v1468_v22, 0  ;;  %v2396_v15 = vld [vmem:[%s3443_s14] sm:$0xff]  }
 0x801   : > { %v1466_v25 = vpop.permute.xlu1 %1465 }
 0x808   : > { %v2415_v17 = vpop.eup %2414 }
 0x809   : > { %v1362_v18 = vsel %vm988_vm3, %v2415_v17, 0.0 }
 0x80a   : > { %1363 = vadd.xlane.f32.xlu0 %v1362_v18 }
 0x820   : > { %1368 = vrot.lane.b32.xlu0 %v3213_v53, %s2792_s23  ;;  %s3381_s23 = scalar_lea.hbm %s3501_s1, %s2077_s17 }
 0x897   : > { %v1364_v19 = vpop.xlane.xlu0 %1363 }
 0x898   : > { %2416 = vrcp.f32 %v1364_v19 }
 0x89b   : > { %v1369_v20 = vpop.permute.xlu0 %1368 }
 0x89c   : > { %v1374_v21 = vsel %vm1051_vm2, %v1369_v20, 0 }
 0x89d   : > { %2188 = vmatpush3.bf16.msra.mxu0 %v1374_v21  ;;  %v2064_v21 = vld [vmem:[#allocation14] ss:$0 sm:$0xff] }
 0x89e   : > { %2199 = vmatprep.subr.bf16.mxu0 %v2789_v16 }
 0x8a2   : > { %v2417_v48 = vpop.eup %2416 }
 0x8a3   : > { %v1366_v60 = vmul.f32 %v2417_v48, %v2415_v17 }
 0x8a5   : > { %v1367_v23 = vpack.c.bf16 %v1366_v60, %v1366_v60  ;;  %v2065_v60 = vld [vmem:[#allocation16] ss:$0 sm:$0xff] }
 0x8a7   : > { %2190 = vmatmul.mubr.msk.bf16.vlgmr.msra.gmra.mrb[16].mxu0 %vm988_vm3, %v1367_v23 }
 0x8a8   : > { %2200 = vmatpush3.bf16.xpose.msra.mxu0 %v1473_v24  ;;  %2201 = vmatprep.mubr.msk.bf16.mxu0 %vm2790_vm1, %v2789_v16 }
 0x8a9   : > { %2211 = vmatprep.subr.bf16.mxu0 %v2789_v16 }
 0x8af   : > { %2202 = vmatmul.mubr.msk.bf16.vlgmr.msra.gmra.mrb[20].mxu0 %vm988_vm3, %v1466_v25  ;;  %v2398_v25 = vld [vmem:[%s3445_s16] sm:$0xff]  }
 0x8b0   : > { %2213 = vmatprep.mubr.msk.bf16.mxu0 %vm2790_vm1, %v2789_v16 }
 0x97a   : > { %v1410_v28 = vpop.f32.mrb[16].mxu0 }
 0x97b   : > { %v1416_v29 = vpack.c.bf16 %v1410_v28, %v1410_v28  ;;  %v2191_v30 = vpop.f32.mrb[17].mxu0  ;;  %v2401_v28 = vld [vmem:[%s3445_s16 + $0x18] sm:$0xff]  }
 0x97c   : > { %v1413_v31 = vpop.f32.mrb[18].mxu0 }
 0x97d   : > { %v2192_v32 = vpop.f32.mrb[19].mxu0  ;;  %2196 = vmatmul.mubr.msk.bf16.vlgmr.msra.gmra.mrb[24].mxu1 %vm988_vm3, %v1416_v29 }
 0x97e   : > { %2207 = vmatprep.mubr.msk.bf16.mxu1 %vm2790_vm1, %v2789_v16 }
 0x982   : > { %v1509_v33 = vpop.f32.mrb[20].mxu0 }
 0x983   : > { %v1515_v34 = vsel %vm987_vm4, %v1509_v33, -1e+30  ;;  %v2203_v35 = vpop.f32.mrb[21].mxu0 }
 0x984   : > { %v1512_v36 = vpop.f32.mrb[22].mxu0  ;;  %v1516_v37 = vsel %vm988_vm3, %v1515_v34, -inf }
 0x985   : > { %1517 = vmax.xlane.f32.xlu0 %v1516_v37  ;;  %v2204_v38 = vpop.f32.mrb[23].mxu0 }
 0x99b   : > { %1528 = vrot.lane.b32.xlu0 %v3213_v53, %s2793_s22  ;;  %v1582_v53 = vsel %vm1051_vm2, %v1577_v44, 0  ;;  %s3497_s22 = sld [smem:[#allocation38_spill]] }
 0x99c   : > { %2212 = vmatpush3.bf16.msra.mxu0 %v1582_v53 }
 0x99d   : > { %2225 = vmatprep.subr.bf16.mxu0 %v2789_v16 }
 0x9a1   : > { %v2066_v29 = vld [vmem:[%s3497_s22] ss:$0 sm:$0xff] }
 0xa12   : > { %v1518_v39 = vpop.xlane.xlu0 %1517 }
 0xa13   : > { %v1519_v40 = vsub.f32 %v1515_v34, %v1518_v39 }
 0xa15   : > { %v1520_v41 = vmul.f32 1.442695, %v1519_v40 }
 0xa16   : > { %v1529_v42 = vpop.permute.xlu0 %1528 }
 0xa17   : > { %2418 = vpow2.f32 %v1520_v41  ;;  %v1534_v43 = vsel %vm1051_vm2, %v1529_v42, 0 }
 0xa18   : > { %2206 = vmatpush3.bf16.msra.mxu1 %v1534_v43 }
 0xa19   : > { %2217 = vmatprep.subr.bf16.mxu1 %v2789_v16 }
 0xa21   : > { %v2419_v4 = vpop.eup %2418 }
 0xa22   : > { %v1522_v5 = vsel %vm988_vm3, %v2419_v4, 0.0 }
 0xa23   : > { %1523 = vadd.xlane.f32.xlu1 %v1522_v5 }
 0xa50   : > { %v1458_v45 = vpop.f32.mrb[24].mxu1 }
 0xa51   : > { %v1464_v46 = vadd.f32 %v1458_v45, %v3287_v1  ;;  %v2197_v47 = vpop.f32.mrb[25].mxu1 }
 0xa52   : > { %v1461_v49 = vpop.f32.mrb[26].mxu1 }
 0xa53   : > { %v2198_v50 = vpop.f32.mrb[27].mxu1 }
 0xab0   : > { %v1524_v51 = vpop.xlane.xlu1 %1523 }
 0xab1   : > { %2420 = vrcp.f32 %v1524_v51 }
 0xabb   : > { %v2421_v52 = vpop.eup %2420 }
 0xabc   : > { %v1526_v54 = vmul.f32 %v2421_v52, %v2419_v4  ;;  %v2070_v4 = vld [vmem:[%s3499_s27] ss:$0 sm:$0xff] }
 0xabe   : > { %v1527_v55 = vpack.c.bf16 %v1526_v54, %v1526_v54 }
 0xac0   : > { %2208 = vmatmul.mubr.msk.bf16.vlgmr.msra.gmra.mrb[28].mxu1 %vm988_vm3, %v1527_v55 }
 0xac1   : > { %2221 = vmatprep.mubr.msk.bf16.mxu1 %vm2790_vm1, %v2789_v16  ;;  %2218 = vmatpush3.bf16.msra.mxu1 %v2396_v15 }
 0xac2   : > { %2219 = vmatprep.subr.bf16.mxu1 %v2789_v16 }
 0xb93   : > { %v1570_v56 = vpop.f32.mrb[28].mxu1 }
 0xb94   : > { %v1576_v57 = vpack.c.bf16 %v1570_v56, %v1570_v56  ;;  %v2209_v58 = vpop.f32.mrb[29].mxu1 }
 0xb95   : > { %v1573_v59 = vpop.f32.mrb[30].mxu1 }
 0xb96   : > { %v2210_v61 = vpop.f32.mrb[31].mxu1  ;;  %2214 = vmatmul.mubr.msk.bf16.vlgmr.msra.gmra.mrb[24].mxu0 %vm988_vm3, %v1576_v57 }
 0xb97   : > { %2233 = vmatprep.mubr.msk.bf16.mxu0 %vm2790_vm1, %v2789_v16  ;;  %2226 = vmatpush3.bf16.msra.mxu0 %v2398_v25 }
 0xb98   : > { %2227 = vmatprep.subr.bf16.mxu0 %v2789_v16 }
 0xb9b   : > { %2228 = vmatpush3.bf16.msra.mxu0 %v2399_v26 }
 0xb9c   : > { %2229 = vmatprep.subr.bf16.mxu0 %v2789_v16 }
 0xb9f   : > { %2230 = vmatpush3.bf16.msra.mxu0 %v2400_v27 }
 0xba0   : > { %2231 = vmatprep.subr.bf16.mxu0 %v2789_v16 }
 0xba3   : > { %2232 = vmatpush3.bf16.msra.mxu0 %v2401_v28 }
 0xc69   : > { %v1618_v62 = vpop.f32.mrb[24].mxu0 }
 0xc6a   : > { %v1624_v1 = vadd.f32 %v1618_v62, %v1464_v46  ;;  %v2215_v2 = vpop.f32.mrb[25].mxu0 }
 0xc6b   : > { %v1621_v3 = vpop.f32.mrb[26].mxu0 }
 0xc6c   : > { %v1632_v6 = vadd.f32 %v2063_v63, %v1624_v1  ;;  %v2216_v7 = vpop.f32.mrb[27].mxu0 }
 0xc6e   : > { %v3340_v8 = vadd.f32 %v1632_v6, %v3173_v0  ;;  %v2397_v0 = vld [vmem:[%s3443_s14 + $0x8] sm:$0xff]  }
 0xc6f   : > { %2220 = vmatpush3.bf16.msra.mxu1 %v2397_v0 }
 0xc70   : > { %v1636_v9 = vsel %vm735_vm0, %v3340_v8, 0.0 }
 0xc71   : > { %1637 = vadd.xlane.f32.xlu1 %v1636_v9 }
 0xcfe   : > { %v1638_v10 = vpop.xlane.xlu1 %1637 }
 0xcff   : > { %v1639_v11 = vmul.f32 0.03125, %v1638_v10 }
 0xd01   : > { %v1640_v12 = vsub.f32 %v3340_v8, %v1639_v11 }
 0xd03   : > { %v1641_v13 = vmul.f32 %v1640_v12, %v1640_v12 }
 0xd05   : > { %v1642_v14 = vsel %vm735_vm0, %v1641_v13, 0.0 }
 0xd06   : > { %1643 = vadd.xlane.f32.xlu1 %v1642_v14 }
 0xd93   : > { %v1644_v17 = vpop.xlane.xlu1 %1643 }
 0xd94   : > { %v1645_v18 = vmul.f32 0.03125, %v1644_v17 }
 0xd96   : > { %v1646_v19 = vadd.f32 1e-05, %v1645_v18 }
 0xd98   : > { %2422 = vrsqrt.f32 %v1646_v19 }
 0xda2   : > { %v2423_v20 = vpop.eup %2422 }
 0xda3   : > { %v1648_v48 = vmul.f32 %v2423_v20, %v1640_v12 }
 0xda5   : > { %v1655_v22 = vmul.f32 %v2064_v21, %v1648_v48 }
 0xda7   : > { %v1662_v23 = vadd.f32 %v2065_v60, %v1655_v22 }
 0xda9   : > { %v1663_v24 = vpack.c.bf16 %v1662_v23, %v1662_v23 }
 0xdab   : > { %2222 = vmatmul.mubr.msk.bf16.vlgmr.msra.gmra.mrb[32].mxu1 %vm735_vm0, %v1663_v24 }
 0xe7e   : > { %v1724_v30 = vpop.f32.mrb[32].mxu1 }
 0xe7f   : > { %v1725_v31 = vadd.f32 %v2066_v29, %v1724_v30  ;;  %v2223_v32 = vpop.f32.mrb[33].mxu1 }
 0xe80   : > { %v1727_v33 = vpop.f32.mrb[34].mxu1 }
 0xe81   : > { %v1731_v34 = vmul.f32 0.044715, %v1725_v31  ;;  %v2224_v35 = vpop.f32.mrb[35].mxu1  ;;  %v1730_v16 = vmul.f32 0.5, %v1725_v31 }
 0xe83   : > { %v1732_v36 = vmul.f32 %v1731_v34, %v1725_v31 }
 0xe85   : > { %v1733_v37 = vmul.f32 %v1732_v36, %v1725_v31 }
 0xe87   : > { %v1734_v38 = vadd.f32 %v1733_v37, %v1725_v31 }
 0xe89   : > { %v1735_v39 = vmul.f32 0.7978846, %v1734_v38 }
 0xe8b   : > { %2424 = vtanh.f32 %v1735_v39 }
 0xe95   : > { %v2425_v40 = vpop.eup %2424 }
 0xe96   : > { %v1737_v41 = vadd.f32 1.0, %v2425_v40 }
 0xe98   : > { %v1738_v42 = vmul.f32 %v1737_v41, %v1730_v16 }
 0xe9a   : > { %v1739_v43 = vpack.c.bf16 %v1738_v42, %v1738_v42 }
 0xe9c   : > { %2234 = vmatmul.mubr.msk.bf16.vlgmr.msra.gmra.mrb[28].mxu0 %vm1779_vm5, %v1739_v43 }
 0xf6f   : > { %v1817_v5 = vpop.f32.mrb[28].mxu0 }
 0xf70   : > { %v1818_v44 = vadd.f32 %v2070_v4, %v1817_v5  ;;  %v2235_v53 = vpop.f32.mrb[29].mxu0 }
 0xf71   : > { %v1820_v45 = vpop.f32.mrb[30].mxu0 }
 0xf72   : > { %v1823_v46 = vadd.f32 %v1818_v44, %v3340_v8  ;;  %v2236_v47 = vpop.f32.mrb[31].mxu0 }
 0xf74   : > { %1824 = vst.msk [vmem:[%s718_s0] sm:$0xff] %vm735_vm0, %v1823_v46 }
 0xf75   : > { %2691 = shalt.err (!%p2688_p6)
}
 0xf76   : > { %s2692_s22 = scalar_lea.hbm %s3381_s23, 128  ;;  %s2696_s19 = scalar_lea.hbm %s3501_s1, 256 }
 0xf77   : > { %p2693_p7 = scmp.ne.s32.totalorder %s3381_s23, %s2692_s22  ;;  %p2697_p4 = scmp.lt.u32.totalorder %s3381_s23, %s3501_s1 }
 0xf78   : > { %p2698_p8 = scmp.lt.u32.totalorder %s2696_s19, %s2692_s22  ;;  %p2700_p1 = scmp.lt.u32.totalorder %s2692_s22, %s3381_s23 }
 0xf79   : > { %p2694_p9 = pnand %p2693_p7, %p3502_p10 }
 0xf7a   : > { %p2699_p13 = por %p2698_p8, %p2697_p4 }
 0xf7b   : > { %p2695_p12 = pneg %p2694_p9 }
 0xf7c   : > { %p2701_p11 = por %p2700_p1, %p2699_p13 }
 0xf7e   : > { %p2702_p0 = pnand %p2701_p11, %p2695_p12 }
 0xf80   : > { %2705 = shalt.err (!%p2702_p0)
}
 0xf81   : > { %2273 = dma.vmem_to_hbm [thread:$0]  (%p3502_p10), %s3383_s18, 128, %s3381_s23, %s1826_s30  }
 0xf82 PF: > { %s3503_s27 = sld [smem:[#allocation28_spill]]  ;;  %s3504_s17 = sld [smem:[#allocation24_spill]] }
 0xf83   : > { %s3505_s0 = sld [smem:[#allocation31_spill]] }
 0xf88   : > { %p2325_p2 = scmp.ge.s32.totalorder %s3503_s27, 2  ;;  %s1852_s15 = sand.u32 1, %s3504_s17  }
 0xf89   : > { %p3506_p3 = scmp.ne.s32.totalorder %s3505_s0, 0  ;;  %s1853_s28 = scalar_lea.sflag [#allocation4], %s1852_s15 }
 0xf8b   : > { %p2304_p5 = pnand %p2325_p2, %p3506_p3 }
 0xf8d   : > { %2751 = dma.done.wait (!%p2304_p5), %s1853_s28, 128  }
 0xf8e   : > { %2753 = vsyncadd (!%p2304_p5), %s1853_s28, 4294967168  ;;  %s36_s19 = sadd.s32 1, %s3503_s27   ;;  %s3507_s27 = sld [smem:[#allocation25_spill]] }
 0xf8f   : > { %p33_p6 = scmp.ge.s32.totalorder %s36_s19, 4   ;;  %s3508_s28 = sld [smem:[#allocation26_spill]] }
 0xf90   : > { %s3509_s29 = sld [smem:[#allocation32_spill]]  ;;  %s3510_s30 = sld [smem:[#allocation27_spill]] }
 0xf91   : > { %s3511_s0 = sld [smem:[#allocation29_spill]]  ;;  %35 = sbr.rel (!%p33_p6) target bundleno = 18 (0x12), region = 167 }
 0xf98   :  { %1858 = vsyncpa [#allocation3], 1 }
 0xf99   :  { %1860 = vsyncpa [#allocation3 + $0x1], 1 }
 0xf9a   :  { %1861 = vsyncpa [#allocation6], 1 }
 0xf9b   :  { %1862 = vsyncpa [#allocation9], 1 }
 0xf9c   :  { %1863 = vsyncpa [#allocation12], 1 }
 0xf9d   :  { %1864 = vsyncpa [#allocation15], 1 }
 0xf9e   :  { %1865 = vsyncpa [#allocation4], 1 }
 0xf9f   :  { %1867 = vsyncpa [#allocation4 + $0x1], 1 }

</bundles_post_ra>
